<compile_context>
chip_gen: v7x
topology: tpu7x:2x2x1
jax: 0.10.0
libtpu: 0.0.40
codegen_flags: <defaults>
</compile_context>

<pallas_src>
import functools
import math

import jax
import jax.numpy as jnp
from jax import lax
from jax.experimental import pallas as pl
from jax.experimental.pallas import tpu as pltpu

_VMEM_LIMIT = 48 * 1024 * 1024  # <= v7x physical VMEM (64 MiB)


def _cp(dimension_semantics):
    return pltpu.CompilerParams(
        dimension_semantics=dimension_semantics,
        vmem_limit_bytes=_VMEM_LIMIT,
    )


def _round_up(x, m):
    return ((x + m - 1) // m) * m


def _tile_and_pad(dim, target, align):
    """Pick tile <= target (multiple of `align`) and a padded dim that the tile
    divides exactly.  Prefers exact divisors (no padding), else minimal padding.
    Never falls back to a full oversized block (VMEM-safe for odd shapes)."""
    if dim <= target:
        t = _round_up(dim, align)
        return t, t
    best = None
    t = (target // align) * align
    while t >= align:
        pad = _round_up(dim, t) - dim
        if pad == 0:
            return t, dim
        if best is None or pad < best[1]:
            best = (t, pad)
        t -= align
    t, pad = best
    return t, dim + pad


# ----------------------------------------------------------------------------
# Pallas kernels
# ----------------------------------------------------------------------------
def _mm_bn_kernel(x_ref, w_ref, shift_ref, o_ref, acc_ref, *, relu):
    """Tiled (tm,tk)@(tk,tn) accumulation; epilogue = +shift (+ReLU), bf16 store."""
    @pl.when(pl.program_id(2) == 0)
    def _():
        acc_ref[...] = jnp.zeros_like(acc_ref)

    acc_ref[...] += jnp.dot(
        x_ref[...], w_ref[...], preferred_element_type=jnp.float32
    )

    @pl.when(pl.program_id(2) == pl.num_programs(2) - 1)
    def _():
        out = acc_ref[...] + shift_ref[...]
        if relu:
            out = jnp.maximum(out, 0.0)
        o_ref[...] = out.astype(o_ref.dtype)


def _mm_bn_res_kernel(x_ref, w_ref, shift_ref, res_ref, o_ref, acc_ref, *, relu):
    """Same as above; epilogue adds the (bf16) residual in f32 before ReLU."""
    @pl.when(pl.program_id(2) == 0)
    def _():
        acc_ref[...] = jnp.zeros_like(acc_ref)

    acc_ref[...] += jnp.dot(
        x_ref[...], w_ref[...], preferred_element_type=jnp.float32
    )

    @pl.when(pl.program_id(2) == pl.num_programs(2) - 1)
    def _():
        out = acc_ref[...] + shift_ref[...] + res_ref[...].astype(jnp.float32)
        if relu:
            out = jnp.maximum(out, 0.0)
        o_ref[...] = out.astype(o_ref.dtype)


def _conv3x3_kernel(x_ref, w_ref, shift_ref, o_ref, *, Wp, rows, relu):
    """Direct stride-1/pad-1 3x3 conv on the padded, row-flattened image.

    x_ref:    (1, Hp*Wp, C)  padded image, flattened over (H, W)
    w_ref:    (3, 3, C, tn)  BN-scale-folded weights
    o_ref:    (1, rows, tn)  rows = H*Wp (output in padded-row layout, the
                             Wp-W junk columns per image row are discarded by
                             the caller)
    Tap (di, dj) of every output row is a *contiguous* chunk of the flattened
    input at static offset di*Wp + dj, so the 9 taps are 9 plain matmuls
    accumulated in f32 with no im2col materialization in HBM.
    """
    acc = None
    for di in range(3):
        for dj in range(3):
            lhs = x_ref[0, pl.ds(di * Wp + dj, rows), :]
            p = jnp.dot(lhs, w_ref[di, dj], preferred_element_type=jnp.float32)
            acc = p if acc is None else acc + p
    out = acc + shift_ref[...]
    if relu:
        out = jnp.maximum(out, 0.0)
    o_ref[0] = out.astype(o_ref.dtype)


def _maxpool_kernel(*refs):
    """9 input taps (tm, C) -> elementwise max."""
    o_ref = refs[-1]
    m = refs[0][...]
    for r in refs[1:-1]:
        m = jnp.maximum(m, r[...])
    o_ref[...] = m


def _pool_fc_kernel(f_ref, w_ref, b_ref, o_ref, *, use_max):
    """f: (N, HW, C) bf16; adaptive (1,1) pool over HW (in f32) then Linear(C, vec)."""
    f = f_ref[...].astype(jnp.float32)
    pooled = jnp.max(f, axis=1) if use_max else jnp.mean(f, axis=1)
    o_ref[...] = (
        jnp.dot(pooled, w_ref[...], preferred_element_type=jnp.float32) + b_ref[...]
    )


# ----------------------------------------------------------------------------
# Direct 3x3 conv (no im2col) and the generic matmul conv
# ----------------------------------------------------------------------------
def _direct3_fits(N, H, W, C, Cout):
    Hp, Wp = H + 3, W + 2
    rows = H * Wp
    tn = min(256, Cout)
    est = (
        2 * Hp * Wp * C * 2      # x block (double-buffered, bf16)
        + 2 * 9 * C * tn * 2     # weight block
        + 2 * rows * tn * 2      # out block
        + rows * tn * 4          # f32 accumulator temp
        + 2 * rows * C * 2       # transient tap slices
    )
    return est <= 32 * 1024 * 1024


def _conv3x3_direct(x, w, sh, *, relu):
    """x: (N,H,W,C) bf16; w: (3,3,C,Cout) bf16 (BN scale folded); sh: (1,Cout) f32.
    stride 1 / padding 1.  Returns (N,H,W,Cout) bf16."""
    N, H, W, C = x.shape
    Cout = w.shape[3]
    Hp, Wp = H + 3, W + 2          # top 1 / bottom 2, left 1 / right 1 zero pad
    rows = H * Wp                  # per-image output rows incl. (Wp - W) junk cols
    xf = jnp.pad(x, ((0, 0), (1, 2), (1, 1), (0, 0))).reshape(N, Hp * Wp, C)

    tn = min(256, Cout)
    while Cout % tn:
        tn //= 2
    grid = (N, Cout // tn)

    out = pl.pallas_call(
        functools.partial(_conv3x3_kernel, Wp=Wp, rows=rows, relu=relu),
        out_shape=jax.ShapeDtypeStruct((N, rows, Cout), jnp.bfloat16),
        grid=grid,
        in_specs=[
            pl.BlockSpec((1, Hp * Wp, C), lambda n, j: (n, 0, 0)),
            pl.BlockSpec((3, 3, C, tn), lambda n, j: (0, 0, 0, j)),
            pl.BlockSpec((1, tn), lambda n, j: (0, j)),
        ],
        out_specs=pl.BlockSpec((1, rows, tn), lambda n, j: (n, 0, j)),
        compiler_params=_cp(("parallel", "parallel")),
        cost_estimate=pl.CostEstimate(
            flops=2 * N * rows * 9 * C * Cout,
            transcendentals=0,
            bytes_accessed=xf.size * 2 + w.size * 2 + N * rows * Cout * 2 + Cout * 4,
        ),
    )(xf, w, sh)
    return out.reshape(N, H, Wp, Cout)[:, :, :W, :]


def _matmul_conv(pm, wm, sh, rm, *, relu):
    """pm: (M,K) bf16, wm: (K,Cout) bf16, sh: (1,Cout) f32, rm: None | (M,Cout) bf16."""
    M, K = pm.shape
    Cout = wm.shape[1]

    tm, Mp = _tile_and_pad(M, 1024, 8)
    tk, Kp = _tile_and_pad(K, 1024, 128)
    tn, Cp = _tile_and_pad(Cout, 512, 128)
    # v7x megacore: keep both TensorCores busy when M fits in a single block.
    if Mp // tm == 1 and Cp // tn < 2 and Cp >= 256:
        tn = Cp // 2

    if Mp != M or Kp != K:
        pm = jnp.pad(pm, ((0, Mp - M), (0, Kp - K)))
    if Kp != K or Cp != Cout:
        wm = jnp.pad(wm, ((0, Kp - K), (0, Cp - Cout)))
    if Cp != Cout:
        sh = jnp.pad(sh, ((0, 0), (0, Cp - Cout)))
    if rm is not None and (Mp != M or Cp != Cout):
        rm = jnp.pad(rm, ((0, Mp - M), (0, Cp - Cout)))

    grid = (Mp // tm, Cp // tn, Kp // tk)
    n_steps = grid[0] * grid[1] * grid[2]
    # Skinny-M (GEMV-like) deep 1x1 layers: deeper buffering on the weight stream.
    use_buffered = _BUFFERED_OK and Mp <= 128 and Kp >= 512 and n_steps >= 4
    w_kwargs = {"pipeline_mode": pl.Buffered(3)} if use_buffered else {}

    in_specs = [
        pl.BlockSpec((tm, tk), lambda i, j, k: (i, k)),
        pl.BlockSpec((tk, tn), lambda i, j, k: (k, j), **w_kwargs),
        pl.BlockSpec((1, tn), lambda i, j, k: (0, j)),
    ]
    out_spec = pl.BlockSpec((tm, tn), lambda i, j, k: (i, j))
    scratch = [pltpu.VMEM((tm, tn), jnp.float32)]
    cost = pl.CostEstimate(
        flops=2 * Mp * Kp * Cp,
        transcendentals=0,
        bytes_accessed=Mp * Kp * 2 + Kp * Cp * 2 + Mp * Cp * 2 + Cp * 4
        + (Mp * Cp * 2 if rm is not None else 0),
    )
    cp = _cp(("parallel", "parallel", "arbitrary"))

    if rm is None:
        out = pl.pallas_call(
            functools.partial(_mm_bn_kernel, relu=relu),
            out_shape=jax.ShapeDtypeStruct((Mp, Cp), jnp.bfloat16),
            grid=grid,
            in_specs=in_specs,
            out_specs=out_spec,
            scratch_shapes=scratch,
            compiler_params=cp,
            cost_estimate=cost,
        )(pm, wm, sh)
    else:
        out = pl.pallas_call(
            functools.partial(_mm_bn_res_kernel, relu=relu),
            out_shape=jax.ShapeDtypeStruct((Mp, Cp), jnp.bfloat16),
            grid=grid,
            in_specs=in_specs + [pl.BlockSpec((tm, tn), lambda i, j, k: (i, j))],
            out_specs=out_spec,
            scratch_shapes=scratch,
            compiler_params=cp,
            cost_estimate=cost,
        )(pm, wm, sh, rm)

    if Mp != M or Cp != Cout:
        out = out[:M, :Cout]
    return out


# ----------------------------------------------------------------------------
# One-time feature probes (fall back to the known-good path on failure)
# ----------------------------------------------------------------------------
def _safe_probe(fn):
    try:
        jax.block_until_ready(fn())
        return True
    except Exception:
        return False


def _buffered_probe():
    def k(x_ref, o_ref):
        o_ref[...] = x_ref[...] * 2.0

    x = jnp.zeros((8, 512), jnp.float32)
    return pl.pallas_call(
        k,
        out_shape=jax.ShapeDtypeStruct((8, 512), jnp.float32),
        grid=(4,),
        in_specs=[pl.BlockSpec((8, 128), lambda i: (0, i),
                               pipeline_mode=pl.Buffered(3))],
        out_specs=pl.BlockSpec((8, 128), lambda i: (0, i)),
        compiler_params=_cp(("arbitrary",)),
    )(x)


def _direct3_probe():
    k1, k2 = jax.random.split(jax.random.PRNGKey(1))
    x = jax.random.normal(k1, (1, 8, 8, 128), jnp.float32)
    w = jax.random.normal(k2, (3, 3, 128, 128), jnp.float32) * 0.05
    sh = jnp.zeros((1, 128), jnp.float32)
    got = _conv3x3_direct(
        x.astype(jnp.bfloat16), w.astype(jnp.bfloat16), sh, relu=False
    ).astype(jnp.float32)
    ref = lax.conv_general_dilated(
        x, w, (1, 1), ((1, 1), (1, 1)),
        dimension_numbers=("NHWC", "HWIO", "NHWC"),
    )
    err = float(jnp.max(jnp.abs(got - ref)))
    tol = 0.05 * float(jnp.max(jnp.abs(ref))) + 0.05
    if err > tol:
        raise ValueError(f"direct 3x3 conv mismatch: {err} > {tol}")
    return got


_BUFFERED_OK = _safe_probe(_buffered_probe)
_DIRECT3_OK = _safe_probe(_direct3_probe)


# ----------------------------------------------------------------------------
# Jitted wrappers around pallas_call
# ----------------------------------------------------------------------------
@functools.partial(jax.jit, static_argnames=("stride", "padding", "relu"))
def conv_bn_act(x, w, scale, shift, residual, *, stride, padding, relu):
    """x: (N,H,W,Cx) NHWC (f32 or bf16). w: (kh,kw,Cin,Cout). residual: None or
    (N,Ho,Wo,Cout) bf16.  Returns bf16 (N,Ho,Wo,Cout_padded) where Cout is
    zero-padded up to a multiple of 128 (padded channels stay exactly zero)."""
    N, H, W, C = x.shape
    kh, kw, Cin_w, Cout = w.shape
    Hout = (H + 2 * padding - kh) // stride + 1
    Wout = (W + 2 * padding - kw) // stride + 1

    # fold eval-mode BN scale into the weights (exact); shift stays in f32 epilogue
    wf = w.astype(jnp.float32) * scale.reshape(1, 1, 1, Cout)
    sh = shift.reshape(1, Cout).astype(jnp.float32)

    # (a) input may carry zero-padded channels from a previous layer -> pad Cin,
    # (b) pad Cout up to a multiple of 128 so stores stay lane-dense (exact).
    if C > Cin_w:
        wf = jnp.pad(wf, ((0, 0), (0, 0), (0, C - Cin_w), (0, 0)))
    Cout_p = max(_round_up(Cout, 128), 128)
    if Cout_p != Cout:
        wf = jnp.pad(wf, ((0, 0), (0, 0), (0, 0), (0, Cout_p - Cout)))
        sh = jnp.pad(sh, ((0, 0), (0, Cout_p - Cout)))
    wb = wf.astype(jnp.bfloat16)
    xb = x.astype(jnp.bfloat16)

    # ---- direct (no-im2col) path for stride-1 3x3 convs ----------------------
    if (_DIRECT3_OK and kh == 3 and kw == 3 and stride == 1 and padding == 1
            and residual is None and _direct3_fits(N, H, W, C, Cout_p)):
        return _conv3x3_direct(xb, wb, sh, relu=relu)

    # ---- matmul path: 1x1 strided reshape, or kxk im2col (stem + stride-2 3x3)
    M = N * Hout * Wout
    K = kh * kw * C
    if kh == 1 and kw == 1 and padding == 0:
        pm = (xb if stride == 1 else xb[:, ::stride, ::stride, :]).reshape(M, K)
    else:
        xp = xb
        if padding > 0:
            xp = jnp.pad(xb, ((0, 0), (padding, padding), (padding, padding), (0, 0)))
        taps = []
        for di in range(kh):
            for dj in range(kw):
                taps.append(
                    lax.slice(
                        xp,
                        (0, di, dj, 0),
                        (N, di + (Hout - 1) * stride + 1,
                         dj + (Wout - 1) * stride + 1, C),
                        (1, stride, stride, 1),
                    )
                )
        pm = jnp.stack(taps, axis=3).reshape(M, K)

    rm = None
    if residual is not None:
        rm = residual.reshape(M, Cout_p).astype(jnp.bfloat16)

    out = _matmul_conv(pm, wb.reshape(K, Cout_p), sh, rm, relu=relu)
    return out.reshape(N, Hout, Wout, Cout_p)


@jax.jit
def maxpool_3x3_s2(x):
    """3x3 / stride 2 / pad 1 max pool (NHWC, bf16); 9-operand max kernel."""
    N, H, W, C = x.shape
    Hout = (H + 2 - 3) // 2 + 1
    Wout = (W + 2 - 3) // 2 + 1
    M = N * Hout * Wout
    xp = jnp.pad(
        x, ((0, 0), (1, 1), (1, 1), (0, 0)), mode="constant",
        constant_values=-jnp.inf,
    )
    taps = []
    for di in range(3):
        for dj in range(3):
            taps.append(
                lax.slice(
                    xp,
                    (0, di, dj, 0),
                    (N, di + (Hout - 1) * 2 + 1, dj + (Wout - 1) * 2 + 1, C),
                    (1, 2, 2, 1),
                ).reshape(M, C)
            )

    tm, Mp = _tile_and_pad(M, 2048, 8)
    if Mp != M:
        taps = [jnp.pad(t, ((0, Mp - M), (0, 0))) for t in taps]
    spec = pl.BlockSpec((tm, C), lambda i: (i, 0))
    out = pl.pallas_call(
        _maxpool_kernel,
        out_shape=jax.ShapeDtypeStruct((Mp, C), x.dtype),
        grid=(Mp // tm,),
        in_specs=[spec] * 9,
        out_specs=spec,
        compiler_params=_cp(("parallel",)),
    )(*taps)
    return out[:M].reshape(N, Hout, Wout, C)


@functools.partial(jax.jit, static_argnames=("use_max",))
def pool_fc(feat, w, b, *, use_max):
    """feat: (N, HW, C) bf16.  Adaptive (1,1) pool + Linear(C, vec_dim), fused."""
    N, HW, C = feat.shape
    vec = w.shape[1]
    return pl.pallas_call(
        functools.partial(_pool_fc_kernel, use_max=use_max),
        out_shape=jax.ShapeDtypeStruct((N, vec), jnp.float32),
        grid=(1,),
        in_specs=[
            pl.BlockSpec((N, HW, C), lambda i: (0, 0, 0)),
            pl.BlockSpec((C, vec), lambda i: (0, 0)),
            pl.BlockSpec((1, vec), lambda i: (0, 0)),
        ],
        out_specs=pl.BlockSpec((N, vec), lambda i: (0, 0)),
        compiler_params=_cp(("arbitrary",)),
    )(feat, w, b.reshape(1, vec))


# ----------------------------------------------------------------------------
# Deterministic parameter construction (ResNet-101 shapes; synthetic weights)
# ----------------------------------------------------------------------------
class _KeyGen:
    def __init__(self, key):
        self.key = key

    def __call__(self):
        self.key, sub = jax.random.split(self.key)
        return sub


def _conv_bn_params(kg, kh, kw, cin, cout):
    w = jax.random.normal(kg(), (kh, kw, cin, cout), jnp.float32) * (
        1.0 / math.sqrt(kh * kw * cin)
    )
    gamma = 1.0 + 0.1 * jax.random.normal(kg(), (cout,), jnp.float32)
    beta = 0.1 * jax.random.normal(kg(), (cout,), jnp.float32)
    run_mean = jnp.zeros((cout,), jnp.float32)
    run_var = jnp.ones((cout,), jnp.float32)
    eps = 1e-5
    scale = gamma / jnp.sqrt(run_var + eps)
    shift = beta - run_mean * scale
    return (w, scale, shift)


def build_resnet_based_net_params(key, depth=101, vec_dim=128):
    blocks_per_stage = {50: [3, 4, 6, 3], 101: [3, 4, 23, 3], 152: [3, 8, 36, 3]}[depth]
    kg = _KeyGen(key)
    params = {}
    params["stem"] = _conv_bn_params(kg, 7, 7, 3, 64)

    inplanes = 64
    stages = []
    for si, (planes, nblocks) in enumerate(zip([64, 128, 256, 512], blocks_per_stage)):
        stage_stride = 1 if si == 0 else 2
        blocks = []
        for b in range(nblocks):
            s = stage_stride if b == 0 else 1
            blk = {
                "stride": s,
                "conv1": _conv_bn_params(kg, 1, 1, inplanes, planes),
                "conv2": _conv_bn_params(kg, 3, 3, planes, planes),
                "conv3": _conv_bn_params(kg, 1, 1, planes, planes * 4),
            }
            if b == 0:
                blk["downsample"] = _conv_bn_params(kg, 1, 1, inplanes, planes * 4)
            blocks.append(blk)
            inplanes = planes * 4
        stages.append(blocks)
    params["stages"] = stages

    # fc (Linear(2048, vec_dim)); c2_xavier_fill replaced by deterministic init.
    params["fc_w"] = jax.random.normal(kg(), (2048, vec_dim), jnp.float32) * (
        1.0 / math.sqrt(2048)
    )
    params["fc_b"] = jnp.zeros((vec_dim,), jnp.float32)
    return params


# ----------------------------------------------------------------------------
# Forward pass (ResNetbasedNet.forward)
# ----------------------------------------------------------------------------
def resnet_based_net_forward(x_nchw, params, max_pool=False):
    # x_nchw is (N, 3, H, W) like PyTorch; converted to NHWC internally.
    x = jnp.transpose(x_nchw.astype(jnp.float32), (0, 2, 3, 1))

    # stem: 7x7/s2 conv + bn + relu (Cout padded 64->128), then 3x3/s2 maxpool
    w, sc, sh = params["stem"]
    x = conv_bn_act(x, w, sc, sh, None, stride=2, padding=3, relu=True)
    x = maxpool_3x3_s2(x)

    # bottleneck stages
    # TODO(synk): per-block 1x1->3x3->1x1 (+residual) fusion keeping deep-stage
    # activations in VMEM across the block is not implemented.
    for blocks in params["stages"]:
        for blk in blocks:
            stride = blk["stride"]
            if "downsample" in blk:
                dw, dsc, dsh = blk["downsample"]
                identity = conv_bn_act(
                    x, dw, dsc, dsh, None, stride=stride, padding=0, relu=False
                )
            else:
                identity = x
            w1, s1, b1 = blk["conv1"]
            w2, s2, b2 = blk["conv2"]
            w3, s3, b3 = blk["conv3"]
            out = conv_bn_act(x, w1, s1, b1, None, stride=1, padding=0, relu=True)
            out = conv_bn_act(out, w2, s2, b2, None, stride=stride, padding=1, relu=True)
            # conv3 + bn3 + residual add + relu, fused in one kernel
            x = conv_bn_act(out, w3, s3, b3, identity, stride=1, padding=0, relu=True)

    # adaptive (1,1) pool (avg by default, max if max_pool) + flatten + fc, fused
    N, H, W, C = x.shape
    feat = x.reshape(N, H * W, C)
    return pool_fc(feat, params["fc_w"], params["fc_b"], use_max=max_pool)


# ----------------------------------------------------------------------------
if __name__ == "__main__":
    key = jax.random.PRNGKey(0)
    kparam, kdata = jax.random.split(key)

    # ResNet stem requires 3 input channels; 64x64 spatial survives the /32 downsampling.
    params = build_resnet_based_net_params(kparam, depth=101, vec_dim=128)
    x = jax.random.normal(kdata, (2, 3, 64, 64), jnp.float32)  # NCHW

    out = resnet_based_net_forward(x, params, max_pool=False)
    out = jax.block_until_ready(out)

    assert out.shape == (2, 128), out.shape
    assert jnp.all(jnp.isfinite(out))
    print("KERNEL_OK")
</pallas_src>

<mosaic_0001>
module attributes {stable_mosaic.version = 11 : i64} {
  func.func @_conv3x3_kernel(%arg0: i32, %arg1: i32, %arg2: memref<1x110x128xbf16, #tpu.memory_space<vmem>>, %arg3: memref<3x3x128x128xbf16, #tpu.memory_space<vmem>>, %arg4: memref<1x128xf32, #tpu.memory_space<vmem>>, %arg5: memref<1x80x128xbf16, #tpu.memory_space<vmem>>) attributes {dimension_semantics = [#tpu.dimension_semantics<parallel>, #tpu.dimension_semantics<parallel>], iteration_bounds = array<i64: 1, 1>, scalar_prefetch = 0 : i64, scratch_operands = 0 : i64, tpu.core_type = #tpu.core_type<tc>, window_params = [{transform_indices = @transform_0, window_bounds = array<i64: 1, 110, 128>}, {transform_indices = @transform_1, window_bounds = array<i64: 3, 3, 128, 128>}, {transform_indices = @transform_2, window_bounds = array<i64: 1, 128>}, {transform_indices = @transform_3, window_bounds = array<i64: 1, 80, 128>}]} {
    %c0 = arith.constant 0 : index
    %c0_0 = arith.constant 0 : index
    %c0_1 = arith.constant 0 : index
    %0 = vector.load %arg2[%c0, %c0_0, %c0_1] : memref<1x110x128xbf16, #tpu.memory_space<vmem>>, vector<1x80x128xbf16>
    %1 = vector.shape_cast %0 : vector<1x80x128xbf16> to vector<80x128xbf16>
    %c0_2 = arith.constant 0 : index
    %c0_3 = arith.constant 0 : index
    %c0_4 = arith.constant 0 : index
    %c0_5 = arith.constant 0 : index
    %2 = vector.load %arg3[%c0_2, %c0_3, %c0_4, %c0_5] : memref<3x3x128x128xbf16, #tpu.memory_space<vmem>>, vector<1x1x128x128xbf16>
    %3 = vector.shape_cast %2 : vector<1x1x128x128xbf16> to vector<128x128xbf16>
    %cst = arith.constant dense<0.000000e+00> : vector<80x128xf32>
    %4 = tpu.matmul %1, %3, %cst {dimension_numbers = #tpu.dot_dimension_numbers<[1], [0], [0], [1], [0, 0, 1, 1], [], []>} : vector<80x128xbf16>, vector<128x128xbf16>, vector<80x128xf32> -> vector<80x128xf32>
    %c0_6 = arith.constant 0 : index
    %c1 = arith.constant 1 : index
    %c0_7 = arith.constant 0 : index
    %5 = vector.load %arg2[%c0_6, %c1, %c0_7] : memref<1x110x128xbf16, #tpu.memory_space<vmem>>, vector<1x80x128xbf16>
    %6 = vector.shape_cast %5 : vector<1x80x128xbf16> to vector<80x128xbf16>
    %c0_8 = arith.constant 0 : index
    %c1_9 = arith.constant 1 : index
    %c0_10 = arith.constant 0 : index
    %c0_11 = arith.constant 0 : index
    %7 = vector.load %arg3[%c0_8, %c1_9, %c0_10, %c0_11] : memref<3x3x128x128xbf16, #tpu.memory_space<vmem>>, vector<1x1x128x128xbf16>
    %8 = vector.shape_cast %7 : vector<1x1x128x128xbf16> to vector<128x128xbf16>
    %cst_12 = arith.constant dense<0.000000e+00> : vector<80x128xf32>
    %9 = tpu.matmul %6, %8, %cst_12 {dimension_numbers = #tpu.dot_dimension_numbers<[1], [0], [0], [1], [0, 0, 1, 1], [], []>} : vector<80x128xbf16>, vector<128x128xbf16>, vector<80x128xf32> -> vector<80x128xf32>
    %10 = arith.addf %4, %9 : vector<80x128xf32>
    %c0_13 = arith.constant 0 : index
    %c2 = arith.constant 2 : index
    %c0_14 = arith.constant 0 : index
    %11 = vector.load %arg2[%c0_13, %c2, %c0_14] : memref<1x110x128xbf16, #tpu.memory_space<vmem>>, vector<1x80x128xbf16>
    %12 = vector.shape_cast %11 : vector<1x80x128xbf16> to vector<80x128xbf16>
    %c0_15 = arith.constant 0 : index
    %c2_16 = arith.constant 2 : index
    %c0_17 = arith.constant 0 : index
    %c0_18 = arith.constant 0 : index
    %13 = vector.load %arg3[%c0_15, %c2_16, %c0_17, %c0_18] : memref<3x3x128x128xbf16, #tpu.memory_space<vmem>>, vector<1x1x128x128xbf16>
    %14 = vector.shape_cast %13 : vector<1x1x128x128xbf16> to vector<128x128xbf16>
    %cst_19 = arith.constant dense<0.000000e+00> : vector<80x128xf32>
    %15 = tpu.matmul %12, %14, %cst_19 {dimension_numbers = #tpu.dot_dimension_numbers<[1], [0], [0], [1], [0, 0, 1, 1], [], []>} : vector<80x128xbf16>, vector<128x128xbf16>, vector<80x128xf32> -> vector<80x128xf32>
    %16 = arith.addf %10, %15 : vector<80x128xf32>
    %c0_20 = arith.constant 0 : index
    %c10 = arith.constant 10 : index
    %c0_21 = arith.constant 0 : index
    %17 = vector.load %arg2[%c0_20, %c10, %c0_21] : memref<1x110x128xbf16, #tpu.memory_space<vmem>>, vector<1x80x128xbf16>
    %18 = vector.shape_cast %17 : vector<1x80x128xbf16> to vector<80x128xbf16>
    %c1_22 = arith.constant 1 : index
    %c0_23 = arith.constant 0 : index
    %c0_24 = arith.constant 0 : index
    %c0_25 = arith.constant 0 : index
    %19 = vector.load %arg3[%c1_22, %c0_23, %c0_24, %c0_25] : memref<3x3x128x128xbf16, #tpu.memory_space<vmem>>, vector<1x1x128x128xbf16>
    %20 = vector.shape_cast %19 : vector<1x1x128x128xbf16> to vector<128x128xbf16>
    %cst_26 = arith.constant dense<0.000000e+00> : vector<80x128xf32>
    %21 = tpu.matmul %18, %20, %cst_26 {dimension_numbers = #tpu.dot_dimension_numbers<[1], [0], [0], [1], [0, 0, 1, 1], [], []>} : vector<80x128xbf16>, vector<128x128xbf16>, vector<80x128xf32> -> vector<80x128xf32>
    %22 = arith.addf %16, %21 : vector<80x128xf32>
    %c0_27 = arith.constant 0 : index
    %c11 = arith.constant 11 : index
    %c0_28 = arith.constant 0 : index
    %23 = vector.load %arg2[%c0_27, %c11, %c0_28] : memref<1x110x128xbf16, #tpu.memory_space<vmem>>, vector<1x80x128xbf16>
    %24 = vector.shape_cast %23 : vector<1x80x128xbf16> to vector<80x128xbf16>
    %c1_29 = arith.constant 1 : index
    %c1_30 = arith.constant 1 : index
    %c0_31 = arith.constant 0 : index
    %c0_32 = arith.constant 0 : index
    %25 = vector.load %arg3[%c1_29, %c1_30, %c0_31, %c0_32] : memref<3x3x128x128xbf16, #tpu.memory_space<vmem>>, vector<1x1x128x128xbf16>
    %26 = vector.shape_cast %25 : vector<1x1x128x128xbf16> to vector<128x128xbf16>
    %cst_33 = arith.constant dense<0.000000e+00> : vector<80x128xf32>
    %27 = tpu.matmul %24, %26, %cst_33 {dimension_numbers = #tpu.dot_dimension_numbers<[1], [0], [0], [1], [0, 0, 1, 1], [], []>} : vector<80x128xbf16>, vector<128x128xbf16>, vector<80x128xf32> -> vector<80x128xf32>
    %28 = arith.addf %22, %27 : vector<80x128xf32>
    %c0_34 = arith.constant 0 : index
    %c12 = arith.constant 12 : index
    %c0_35 = arith.constant 0 : index
    %29 = vector.load %arg2[%c0_34, %c12, %c0_35] : memref<1x110x128xbf16, #tpu.memory_space<vmem>>, vector<1x80x128xbf16>
    %30 = vector.shape_cast %29 : vector<1x80x128xbf16> to vector<80x128xbf16>
    %c1_36 = arith.constant 1 : index
    %c2_37 = arith.constant 2 : index
    %c0_38 = arith.constant 0 : index
    %c0_39 = arith.constant 0 : index
    %31 = vector.load %arg3[%c1_36, %c2_37, %c0_38, %c0_39] : memref<3x3x128x128xbf16, #tpu.memory_space<vmem>>, vector<1x1x128x128xbf16>
    %32 = vector.shape_cast %31 : vector<1x1x128x128xbf16> to vector<128x128xbf16>
    %cst_40 = arith.constant dense<0.000000e+00> : vector<80x128xf32>
    %33 = tpu.matmul %30, %32, %cst_40 {dimension_numbers = #tpu.dot_dimension_numbers<[1], [0], [0], [1], [0, 0, 1, 1], [], []>} : vector<80x128xbf16>, vector<128x128xbf16>, vector<80x128xf32> -> vector<80x128xf32>
    %34 = arith.addf %28, %33 : vector<80x128xf32>
    %c0_41 = arith.constant 0 : index
    %c20 = arith.constant 20 : index
    %c0_42 = arith.constant 0 : index
    %35 = vector.load %arg2[%c0_41, %c20, %c0_42] : memref<1x110x128xbf16, #tpu.memory_space<vmem>>, vector<1x80x128xbf16>
    %36 = vector.shape_cast %35 : vector<1x80x128xbf16> to vector<80x128xbf16>
    %c2_43 = arith.constant 2 : index
    %c0_44 = arith.constant 0 : index
    %c0_45 = arith.constant 0 : index
    %c0_46 = arith.constant 0 : index
    %37 = vector.load %arg3[%c2_43, %c0_44, %c0_45, %c0_46] : memref<3x3x128x128xbf16, #tpu.memory_space<vmem>>, vector<1x1x128x128xbf16>
    %38 = vector.shape_cast %37 : vector<1x1x128x128xbf16> to vector<128x128xbf16>
    %cst_47 = arith.constant dense<0.000000e+00> : vector<80x128xf32>
    %39 = tpu.matmul %36, %38, %cst_47 {dimension_numbers = #tpu.dot_dimension_numbers<[1], [0], [0], [1], [0, 0, 1, 1], [], []>} : vector<80x128xbf16>, vector<128x128xbf16>, vector<80x128xf32> -> vector<80x128xf32>
    %40 = arith.addf %34, %39 : vector<80x128xf32>
    %c0_48 = arith.constant 0 : index
    %c21 = arith.constant 21 : index
    %c0_49 = arith.constant 0 : index
    %41 = vector.load %arg2[%c0_48, %c21, %c0_49] : memref<1x110x128xbf16, #tpu.memory_space<vmem>>, vector<1x80x128xbf16>
    %42 = vector.shape_cast %41 : vector<1x80x128xbf16> to vector<80x128xbf16>
    %c2_50 = arith.constant 2 : index
    %c1_51 = arith.constant 1 : index
    %c0_52 = arith.constant 0 : index
    %c0_53 = arith.constant 0 : index
    %43 = vector.load %arg3[%c2_50, %c1_51, %c0_52, %c0_53] : memref<3x3x128x128xbf16, #tpu.memory_space<vmem>>, vector<1x1x128x128xbf16>
    %44 = vector.shape_cast %43 : vector<1x1x128x128xbf16> to vector<128x128xbf16>
    %cst_54 = arith.constant dense<0.000000e+00> : vector<80x128xf32>
    %45 = tpu.matmul %42, %44, %cst_54 {dimension_numbers = #tpu.dot_dimension_numbers<[1], [0], [0], [1], [0, 0, 1, 1], [], []>} : vector<80x128xbf16>, vector<128x128xbf16>, vector<80x128xf32> -> vector<80x128xf32>
    %46 = arith.addf %40, %45 : vector<80x128xf32>
    %c0_55 = arith.constant 0 : index
    %c22 = arith.constant 22 : index
    %c0_56 = arith.constant 0 : index
    %47 = vector.load %arg2[%c0_55, %c22, %c0_56] : memref<1x110x128xbf16, #tpu.memory_space<vmem>>, vector<1x80x128xbf16>
    %48 = vector.shape_cast %47 : vector<1x80x128xbf16> to vector<80x128xbf16>
    %c2_57 = arith.constant 2 : index
    %c2_58 = arith.constant 2 : index
    %c0_59 = arith.constant 0 : index
    %c0_60 = arith.constant 0 : index
    %49 = vector.load %arg3[%c2_57, %c2_58, %c0_59, %c0_60] : memref<3x3x128x128xbf16, #tpu.memory_space<vmem>>, vector<1x1x128x128xbf16>
    %50 = vector.shape_cast %49 : vector<1x1x128x128xbf16> to vector<128x128xbf16>
    %cst_61 = arith.constant dense<0.000000e+00> : vector<80x128xf32>
    %51 = tpu.matmul %48, %50, %cst_61 {dimension_numbers = #tpu.dot_dimension_numbers<[1], [0], [0], [1], [0, 0, 1, 1], [], []>} : vector<80x128xbf16>, vector<128x128xbf16>, vector<80x128xf32> -> vector<80x128xf32>
    %52 = arith.addf %46, %51 : vector<80x128xf32>
    %c0_62 = arith.constant 0 : index
    %c0_63 = arith.constant 0 : index
    %53 = vector.load %arg4[%c0_62, %c0_63] : memref<1x128xf32, #tpu.memory_space<vmem>>, vector<1x128xf32>
    %54 = vector.broadcast %53 : vector<1x128xf32> to vector<80x128xf32>
    %55 = arith.addf %52, %54 : vector<80x128xf32>
    %56 = arith.truncf %55 : vector<80x128xf32> to vector<80x128xbf16>
    %c0_64 = arith.constant 0 : index
    %c0_65 = arith.constant 0 : index
    %c0_66 = arith.constant 0 : index
    %57 = vector.load %arg5[%c0_64, %c0_65, %c0_66] : memref<1x80x128xbf16, #tpu.memory_space<vmem>>, vector<1x80x128xbf16>
    %58 = vector.shape_cast %57 : vector<1x80x128xbf16> to vector<80x128xbf16>
    %59 = vector.shape_cast %56 : vector<80x128xbf16> to vector<1x80x128xbf16>
    tpu.vector_store %arg5[%c0_64, %c0_65, %c0_66], %59 {strides = array<i32>} : memref<1x80x128xbf16, #tpu.memory_space<vmem>>, vector<1x80x128xbf16>,
    return
  }
  func.func @transform_0(%arg0: i32, %arg1: i32) -> (i32, i32, i32) {
    %c0_i32 = arith.constant 0 : i32
    %c0_i32_0 = arith.constant 0 : i32
    %c0_i32_1 = arith.constant 0 : i32
    return %arg0, %c0_i32, %c0_i32_0 : i32, i32, i32
  }
  func.func @transform_1(%arg0: i32, %arg1: i32) -> (i32, i32, i32, i32) {
    %c0_i32 = arith.constant 0 : i32
    %c0_i32_0 = arith.constant 0 : i32
    %c0_i32_1 = arith.constant 0 : i32
    %c0_i32_2 = arith.constant 0 : i32
    return %c0_i32, %c0_i32_0, %c0_i32_1, %arg1 : i32, i32, i32, i32
  }
  func.func @transform_2(%arg0: i32, %arg1: i32) -> (i32, i32) {
    %c0_i32 = arith.constant 0 : i32
    %c0_i32_0 = arith.constant 0 : i32
    return %c0_i32, %arg1 : i32, i32
  }
  func.func @transform_3(%arg0: i32, %arg1: i32) -> (i32, i32, i32) {
    %c0_i32 = arith.constant 0 : i32
    %c0_i32_0 = arith.constant 0 : i32
    return %arg0, %c0_i32, %arg1 : i32, i32, i32
  }
}

module attributes {stable_mosaic.version = 11 : i64} {
  func.func @_mm_bn_kernel(%arg0: i32, %arg1: i32, %arg2: i32, %arg3: memref<1024x256xbf16, #tpu.memory_space<vmem>>, %arg4: memref<256x128xbf16, #tpu.memory_space<vmem>>, %arg5: memref<1x128xf32, #tpu.memory_space<vmem>>, %arg6: memref<1024x128xbf16, #tpu.memory_space<vmem>>, %arg7: memref<1024x128xf32, #tpu.memory_space<vmem>>) attributes {dimension_semantics = [#tpu.dimension_semantics<parallel>, #tpu.dimension_semantics<parallel>, #tpu.dimension_semantics<arbitrary>], iteration_bounds = array<i64: 2, 1, 1>, scalar_prefetch = 0 : i64, scratch_operands = 1 : i64, tpu.core_type = #tpu.core_type<tc>, window_params = [{transform_indices = @transform_0, window_bounds = array<i64: 1024, 256>}, {transform_indices = @transform_1, window_bounds = array<i64: 256, 128>}, {transform_indices = @transform_2, window_bounds = array<i64: 1, 128>}, {transform_indices = @transform_3, window_bounds = array<i64: 1024, 128>}]} {
    %c0_i32 = arith.constant 0 : i32
    %0 = arith.cmpi eq, %arg2, %c0_i32 : i32
    %1 = arith.extui %0 : i1 to i32
    %c0_i32_0 = arith.constant 0 : i32
    %2 = arith.cmpi ne, %1, %c0_i32_0 : i32
    scf.if %2 {
      %cst_10 = arith.constant 0.000000e+00 : f32
      %12 = vector.broadcast %cst_10 : f32 to vector<1024x128xf32>
      %c0_11 = arith.constant 0 : index
      %c0_12 = arith.constant 0 : index
      %13 = vector.load %arg7[%c0_11, %c0_12] : memref<1024x128xf32, #tpu.memory_space<vmem>>, vector<1024x128xf32>
      tpu.vector_store %arg7[%c0_11, %c0_12], %12 {strides = array<i32>} : memref<1024x128xf32, #tpu.memory_space<vmem>>, vector<1024x128xf32>,
    } else {
    }
    %c0 = arith.constant 0 : index
    %c0_1 = arith.constant 0 : index
    %3 = vector.load %arg7[%c0, %c0_1] : memref<1024x128xf32, #tpu.memory_space<vmem>>, vector<1024x128xf32>
    %c0_2 = arith.constant 0 : index
    %c0_3 = arith.constant 0 : index
    %4 = vector.load %arg3[%c0_2, %c0_3] : memref<1024x256xbf16, #tpu.memory_space<vmem>>, vector<1024x256xbf16>
    %c0_4 = arith.constant 0 : index
    %c0_5 = arith.constant 0 : index
    %5 = vector.load %arg4[%c0_4, %c0_5] : memref<256x128xbf16, #tpu.memory_space<vmem>>, vector<256x128xbf16>
    %cst = arith.constant dense<0.000000e+00> : vector<1024x128xf32>
    %6 = tpu.matmul %4, %5, %cst {dimension_numbers = #tpu.dot_dimension_numbers<[1], [0], [0], [1], [0, 0, 1, 1], [], []>} : vector<1024x256xbf16>, vector<256x128xbf16>, vector<1024x128xf32> -> vector<1024x128xf32>
    %7 = arith.addf %3, %6 : vector<1024x128xf32>
    %c0_6 = arith.constant 0 : index
    %c0_7 = arith.constant 0 : index
    %8 = vector.load %arg7[%c0_6, %c0_7] : memref<1024x128xf32, #tpu.memory_space<vmem>>, vector<1024x128xf32>
    tpu.vector_store %arg7[%c0_6, %c0_7], %7 {strides = array<i32>} : memref<1024x128xf32, #tpu.memory_space<vmem>>, vector<1024x128xf32>,
    %c0_i32_8 = arith.constant 0 : i32
    %9 = arith.cmpi eq, %arg2, %c0_i32_8 : i32
    %10 = arith.extui %9 : i1 to i32
    %c0_i32_9 = arith.constant 0 : i32
    %11 = arith.cmpi ne, %10, %c0_i32_9 : i32
    scf.if %11 {
      %c0_10 = arith.constant 0 : index
      %c0_11 = arith.constant 0 : index
      %12 = vector.load %arg7[%c0_10, %c0_11] : memref<1024x128xf32, #tpu.memory_space<vmem>>, vector<1024x128xf32>
      %c0_12 = arith.constant 0 : index
      %c0_13 = arith.constant 0 : index
      %13 = vector.load %arg5[%c0_12, %c0_13] : memref<1x128xf32, #tpu.memory_space<vmem>>, vector<1x128xf32>
      %14 = vector.broadcast %13 : vector<1x128xf32> to vector<1024x128xf32>
      %15 = arith.addf %12, %14 : vector<1024x128xf32>
      %cst_14 = arith.constant 0.000000e+00 : f32
      %16 = vector.broadcast %cst_14 : f32 to vector<1024x128xf32>
      %17 = arith.maximumf %15, %16 : vector<1024x128xf32>
      %18 = arith.truncf %17 : vector<1024x128xf32> to vector<1024x128xbf16>
      %c0_15 = arith.constant 0 : index
      %c0_16 = arith.constant 0 : index
      %19 = vector.load %arg6[%c0_15, %c0_16] : memref<1024x128xbf16, #tpu.memory_space<vmem>>, vector<1024x128xbf16>
      tpu.vector_store %arg6[%c0_15, %c0_16], %18 {strides = array<i32>} : memref<1024x128xbf16, #tpu.memory_space<vmem>>, vector<1024x128xbf16>,
    } else {
    }
    return
  }
  func.func @transform_0(%arg0: i32, %arg1: i32, %arg2: i32) -> (i32, i32) {
    %c0_i32 = arith.constant 0 : i32
    return %arg0, %arg2 : i32, i32
  }
  func.func @transform_1(%arg0: i32, %arg1: i32, %arg2: i32) -> (i32, i32) {
    %c0_i32 = arith.constant 0 : i32
    return %arg2, %arg1 : i32, i32
  }
  func.func @transform_2(%arg0: i32, %arg1: i32, %arg2: i32) -> (i32, i32) {
    %c0_i32 = arith.constant 0 : i32
    %c0_i32_0 = arith.constant 0 : i32
    return %c0_i32, %arg1 : i32, i32
  }
  func.func @transform_3(%arg0: i32, %arg1: i32, %arg2: i32) -> (i32, i32) {
    %c0_i32 = arith.constant 0 : i32
    return %arg0, %arg1 : i32, i32
  }
}

</mosaic_0001>

<bundles_post_ra>
// kernel: tpu_custom_call.1
= control target key start
LH: loop header
LB: loop body
LE: loop exit
PB: predicated region body
PF: predicated region fallthrough
CT: control target
= control target key end

     0   :  { %8 = vsyncpa [#allocation3], 0  ;;  %s3001_s0 = inlined_call_operand.hbm [shape: bf16[1,110,128], index: 0, kind: input, shape index: {}]   ;;  %s3002_s1 = inlined_call_operand.hbm [shape: bf16[3,3,128,128], index: 1, kind: input, shape index: {}]   ;;  %s3003_s2 = inlined_call_operand.vmem [shape: f32[1,128], index: 2, kind: input, shape index: {}]   ;;  %s3004_s3 = inlined_call_operand.hbm [shape: bf16[1,80,128], index: 3, kind: output, shape index: {}]  }
   0x1   :  { %9 = vsyncpa [#allocation6], 0 }
   0x2   :  { %10 = vsyncpa [#allocation4], 0  ;;  %s2609_s12 = smov [#allocation2]   ;;  %s2537_s16 = scalar_lea.hbm %s3001_s0, 896 }
   0x3   :  { %s16_s13 = sshll.u32 %s2609_s12, 4  ;;  %p2538_p0 = scmp.ne.s32.totalorder %s3001_s0, %s2537_s16  ;;  %s17_s13 = int_to_ptr.vmem [resolvable:$true] %s16_s13 }
   0x4   :  { %p2541_p1 = scmp.lt.u32.totalorder %s2537_s16, %s3001_s0 }
   0x6   :  { %p2543_p2 = pnand %p2541_p1, %p2538_p0 }
   0x8   :  { %2546 = shalt.err (!%p2543_p2)
}
   0x9   :  { %s2547_s21 = scalar_lea.vmem %s17_s13, 896  ;;  %p2552_p4 = scmp.lt.s32.totalorder %s17_s13, %s17_s13 }
   0xa   :  { %p2548_p3 = scmp.ne.s32.totalorder %s17_s13, %s2547_s21  ;;  %p2553_p5 = scmp.lt.s32.totalorder %s2547_s21, %s2547_s21 }
   0xc   :  { %p2554_p6 = por %p2553_p5, %p2552_p4 }
   0xe   :  { %p2555_p7 = pnand %p2554_p6, %p2548_p3 }
  0x10   :  { %2558 = shalt.err (!%p2555_p7)
}
  0x11   :  { %s2610_s22 = smov 64   ;;  %s2611_s23 = smov 4  }
  0x12   :  { %22 = dma.hbm_to_vmem [thread:$0]  %s3001_s0, 896, %s17_s13, [#allocation3], %s2610_s22, %s2610_s22, %s2611_s23  }
  0x13   :  { %s2612_s26 = smov [#allocation5]   ;;  %s2559_s30 = scalar_lea.hbm %s3002_s1, 9216 }
  0x14   :  { %s28_s27 = sshll.u32 %s2612_s26, 4  ;;  %p2560_p8 = scmp.ne.s32.totalorder %s3002_s1, %s2559_s30  ;;  %s29_s27 = int_to_ptr.vmem [resolvable:$true] %s28_s27 }
  0x15   :  { %p2563_p9 = scmp.lt.u32.totalorder %s2559_s30, %s3002_s1 }
  0x17   :  { %p2565_p10 = pnand %p2563_p9, %p2560_p8 }
  0x19   :  { %2568 = shalt.err (!%p2565_p10)
}
  0x1a   :  { %s2569_s8 = scalar_lea.vmem %s29_s27, 9216  ;;  %p2574_p12 = scmp.lt.s32.totalorder %s29_s27, %s29_s27 }
  0x1b   :  { %p2570_p11 = scmp.ne.s32.totalorder %s29_s27, %s2569_s8  ;;  %p2575_p13 = scmp.lt.s32.totalorder %s2569_s8, %s2569_s8 }
  0x1d   :  { %p2576_p0 = por %p2575_p13, %p2574_p12 }
  0x1f   :  { %p2577_p1 = pnand %p2576_p0, %p2570_p11 }
  0x21   :  { %2580 = shalt.err (!%p2577_p1)
}
  0x22   :  { %34 = dma.hbm_to_vmem [thread:$0]  %s3002_s1, 9216, %s29_s27, [#allocation6], %s2610_s22, %s2610_s22, %s2611_s23  }
  0x23   :  { %2603 = dma.done.wait [#allocation3], 896  }
  0x24   :  { %2604 = vsyncadd [#allocation3], 4294966400 }
  0x25   :  { %2605 = dma.done.wait [#allocation6], 9216  }
  0x26   :  { %2606 = vsyncadd [#allocation6], 4294958080  ;;  %v2613_v0 = vmov 0.0   ;;  %vm2614_vm0 = vmmov 0   ;;  %v2442_v1 = vld [vmem:[#allocation5 + $0x40] sm:$0xff]   ;;  %v2444_v3 = vld [vmem:[#allocation5 + $0x48] sm:$0xff]  }
  0x27   :  { %2095 = vmatprep.subr.bf16.mxu0 %v2613_v0  ;;  %2131 = vmatprep.subr.bf16.mxu1 %v2613_v0  ;;  %v2443_v2 = vld [vmem:[#allocation5] sm:$0xff]   ;;  %v2445_v4 = vld [vmem:[#allocation5 + $0x8] sm:$0xff]   ;;  %v2446_v5 = vld [vmem:[#allocation5 + $0x50] sm:$0xff]   ;;  %vm116_vm1 = vsmask.f32 7424  ;;  %vm434_vm2 = vcmask 1046528  }
  0x28   :  { %2111 = vmatprep.mubr.msk.bf16.mxu0 %vm2614_vm0, %v2613_v0  ;;  %2147 = vmatprep.mubr.msk.bf16.mxu1 %vm2614_vm0, %v2613_v0  ;;  %v2447_v6 = vld [vmem:[#allocation5 + $0x10] sm:$0xff]   ;;  %v2448_v7 = vld [vmem:[#allocation5 + $0x58] sm:$0xff]   ;;  %v2450_v9 = vld [vmem:[#allocation5 + $0x60] sm:$0xff]   ;;  %vm806_vm3 = vsmask.f32 6400  ;;  %vm1017_vm4 = vcmask 1045504  }
  0x29   :  { %2096 = vmatpush3.bf16.msra.mxu0 %v2442_v1  ;;  %2132 = vmatpush3.bf16.msra.mxu1 %v2443_v2  ;;  %v2449_v8 = vld [vmem:[#allocation5 + $0x18] sm:$0xff]   ;;  %v2451_v10 = vld [vmem:[#allocation5 + $0x20] sm:$0xff]   ;;  %v44_v11 = vld [vmem:[#allocation2] sm:$0xf]  ;;  %vm1389_vm5 = vsmask.f32 5376 }
  0x2a   :  { %2097 = vmatprep.subr.bf16.mxu0 %v2613_v0  ;;  %2133 = vmatprep.subr.bf16.mxu1 %v2613_v0  ;;  %v2680_v12 = vld [vmem:[#allocation2 + $0x4] sm:$0xf]  ;;  %v2683_v15 = vld [vmem:[#allocation2 + $0x8] sm:$0xff]   ;;  %v2456_v23 = vld [vmem:[#allocation5 + $0x78] sm:$0xff]   ;;  %vm1600_vm6 = vcmask 1044480  }
  0x2b   :  { %v2452_v13 = vld [vmem:[#allocation5 + $0x68] sm:$0xff]   ;;  %v1833_v14 = vcombine.low %v44_v11, %v2680_v12  ;;  %v2454_v18 = vld [vmem:[#allocation5 + $0x70] sm:$0xff]   ;;  %v125_v21 = vshll.u32 %v2683_v15, 16  ;;  %v2690_v26 = vld [vmem:[#allocation2 + $0x10] sm:$0xff]   ;;  %v129_v30 = vshrl.u32 %v2683_v15, 16 }
  0x2c   :  { %v2453_v16 = vld [vmem:[#allocation5 + $0x28] sm:$0xff]   ;;  %v2455_v22 = vld [vmem:[#allocation5 + $0x30] sm:$0xff]   ;;  %v2457_v27 = vld [vmem:[#allocation5 + $0x38] sm:$0xff]   ;;  %v133_v31 = vshll.u32 %v2690_v26, 16  ;;  %v137_v41 = vshrl.u32 %v2690_v26, 16 }
  0x2d   :  { %2098 = vmatpush3.bf16.msra.mxu0 %v2444_v3  ;;  %2134 = vmatpush3.bf16.msra.mxu1 %v2445_v4  ;;  %v120_v17 = vshll.u32 %v1833_v14, 16  ;;  %v118_v19 = vshrl.u32 %v1833_v14, 16  ;;  %v127_v25 = vrot.slane %v125_v21, 1  ;;  %v2460_v28 = vld [vmem:[#allocation5 + $0x80] sm:$0xff]   ;;  %v2461_v34 = vld [vmem:[#allocation5 + $0x88] sm:$0xff]   ;;  %v2464_v40 = vld [vmem:[#allocation5 + $0x90] sm:$0xff]  }
  0x2e   :  { %2099 = vmatprep.subr.bf16.mxu0 %v2613_v0  ;;  %2135 = vmatprep.subr.bf16.mxu1 %v2613_v0  ;;  %v2463_v32 = vld [vmem:[#allocation5 + $0xc0] sm:$0xff]   ;;  %v135_v36 = vrot.slane %v133_v31, 1  ;;  %v2465_v37 = vld [vmem:[#allocation5 + $0xc8] sm:$0xff]   ;;  %v2468_v42 = vld [vmem:[#allocation5 + $0xd0] sm:$0xff]  }
  0x2f   :  { %v122_v20 = vrot.slane %v120_v17, 1  ;;  %v2699_v33 = vld [vmem:[#allocation2 + $0x18] sm:$0xff]   ;;  %v131_v35 = vor.u32 %v129_v30, %v127_v25  ;;  %v2467_v44 = vld [vmem:[#allocation5 + $0x98] sm:$0xff]   ;;  %v2712_v45 = vld [vmem:[#allocation2 + $0x20] sm:$0xff]  }
  0x30   :  { %v141_v38 = vshll.u32 %v2699_v33, 16  ;;  %v139_v46 = vor.u32 %v137_v41, %v135_v36  ;;  %v2470_v47 = vld [vmem:[#allocation5 + $0xd8] sm:$0xff]   ;;  %v2469_v48 = vld [vmem:[#allocation5 + $0xa0] sm:$0xff]   ;;  %v145_v50 = vshrl.u32 %v2699_v33, 16  ;;  %v149_v51 = vshll.u32 %v2712_v45, 16  ;;  %v2473_v56 = vld [vmem:[#allocation5 + $0xa8] sm:$0xff]  }
  0x31   :  { %2100 = vmatpush3.bf16.msra.mxu0 %v2446_v5  ;;  %2136 = vmatpush3.bf16.msra.mxu1 %v2447_v6  ;;  %v123_v24 = vor.u32 %v122_v20, %v118_v19  ;;  %v136_v39 = vsel %vm116_vm1, %v131_v35, %v135_v36  ;;  %v2472_v52 = vld [vmem:[#allocation5 + $0xe0] sm:$0xff]   ;;  %v2725_v53 = vld [vmem:[#allocation2 + $0x28] ss:$0 sps:$4 sm:$0x11]   ;;  %v2474_v57 = vld [vmem:[#allocation5 + $0xe8] sm:$0xff]   ;;  %v153_v59 = vshrl.u32 %v2712_v45, 16 }
  0x32   :  { %2101 = vmatprep.subr.bf16.mxu0 %v2613_v0  ;;  %2137 = vmatprep.subr.bf16.mxu1 %v2613_v0  ;;  %v143_v43 = vrot.slane %v141_v38, 1  ;;  %v151_v55 = vrot.slane %v149_v51, 1  ;;  %v157_v60 = vshll.u32 %v2725_v53, 16  ;;  %v2475_v61 = vld [vmem:[#allocation5 + $0xb0] sm:$0xff]   ;;  %v2478_v63 = vld [vmem:[#allocation5 + $0xb8] sm:$0xff]   ;;  %v2486_v20 = vld [vmem:[#allocation5 + $0x140] sm:$0xff]  }
  0x33   :  { %v128_v29 = vsel %vm116_vm1, %v123_v24, %v127_v25  ;;  %v2477_v62 = vld [vmem:[#allocation5 + $0xf0] sm:$0xff]   ;;  %v413_v1 = vld [vmem:[#allocation2] sm:$0xe]  ;;  %v2479_v4 = vld [vmem:[#allocation5 + $0xf8] sm:$0xff]   ;;  %v442_v38 = vrot.slane %v2712_v45, 1 }
  0x34   :  { %v144_v49 = vsel %vm116_vm1, %v139_v46, %v143_v43  ;;  %v147_v54 = vor.u32 %v145_v50, %v143_v43  ;;  %v155_v2 = vor.u32 %v153_v59, %v151_v55  ;;  %v159_v3 = vrot.slane %v157_v60, 1  ;;  %v582_v5 = vld [vmem:[#allocation2 + $0x4] sm:$0xe]  ;;  %v2746_v6 = vld [vmem:[#allocation2 + $0x8] sm:$0xf]  ;;  %v2490_v30 = vld [vmem:[#allocation5 + $0x118] sm:$0xff]  }
  0x35   :  { %2102 = vmatpush3.bf16.msra.mxu0 %v2448_v7  ;;  %2138 = vmatpush3.bf16.msra.mxu1 %v2449_v8  ;;  %v1855_v8 = vcombine.low %v413_v1, %v2680_v12  ;;  %v436_v12 = vrot.slane %v2683_v15, 1  ;;  %v2484_v21 = vld [vmem:[#allocation5 + $0x108] sm:$0xff]   ;;  %v2487_v25 = vld [vmem:[#allocation5 + $0x110] sm:$0xff]   ;;  %v2492_v35 = vld [vmem:[#allocation5 + $0x120] sm:$0xff]  }
  0x36   :  { %2103 = vmatprep.subr.bf16.mxu0 %v2613_v0  ;;  %2139 = vmatprep.subr.bf16.mxu1 %v2613_v0  ;;  %v152_v58 = vsel %vm116_vm1, %v147_v54, %v151_v55  ;;  %v160_v7 = vsel %vm116_vm1, %v155_v2, %v159_v3  ;;  %v2795_v36 = vld [vmem:[#allocation2 + $0x24] sm:$0xff]   ;;  %v2502_v54 = vld [vmem:[#allocation5 + $0x178] sm:$0xff]  }
  0x37   :  { %v435_v11 = vrot.slane %v1855_v8, 1  ;;  %v2497_v41 = vld [vmem:[#allocation5 + $0x168] sm:$0xff]   ;;  %v2500_v46 = vld [vmem:[#allocation5 + $0x170] sm:$0xff]  }
  0x38   :  { %v996_v55 = vld [vmem:[#allocation2 + $0x4] sm:$0xc] }
  0x39   :  { %2104 = vmatpush3.bf16.msra.mxu0 %v2450_v9  ;;  %2140 = vmatpush3.bf16.msra.mxu1 %v2451_v10  ;;  %v2752_v9 = vcombine.low %v582_v5, %v2746_v6  ;;  %v2754_v10 = vld [vmem:[#allocation2 + $0xc] sm:$0xff]   ;;  %v437_v17 = vsel %vm434_vm2, %v435_v11, %v436_v12 }
  0x3a   :  { %2105 = vmatprep.subr.bf16.mxu0 %v2613_v0  ;;  %2141 = vmatprep.subr.bf16.mxu1 %v2613_v0  ;;  %v816_v50 = vshrl.u32 %v2754_v10, 16  ;;  %v819_v51 = vshll.u32 %v2754_v10, 16  ;;  %v1019_v5 = vrot.slane %v2754_v10, 2 }
  0x3c   :  { %v818_v59 = vrot.slane %v816_v50, 1  ;;  %v821_v60 = vrot.slane %v819_v51, 2  ;;  %v2516_v50 = vld [vmem:[#allocation5 + $0x1b0] sm:$0xff]   ;;  %v2874_v51 = vld [vmem:[#allocation2 + $0x10] sm:$0xff]  }
  0x3d   :  { %2106 = vmatpush3.bf16.msra.mxu0 %v2452_v13  ;;  %2142 = vmatpush3.bf16.msra.mxu1 %v2453_v16  ;;  %v638_v13 = vrot.slane %v2752_v9, 1  ;;  %v2483_v16 = vld [vmem:[#allocation5 + $0x100] sm:$0xff]  }
  0x3e   :  { %2107 = vmatprep.subr.bf16.mxu0 %v2613_v0  ;;  %2143 = vmatprep.subr.bf16.mxu1 %v2613_v0  ;;  %v822_v1 = vor.u32 %v821_v60, %v818_v59  ;;  %v1402_v59 = vshll.u32 %v2874_v51, 16  ;;  %v2520_v60 = vld [vmem:[#allocation5 + $0x1f8] sm:$0xff]  }
  0x41   :  { %2108 = vmatpush3.bf16.msra.mxu0 %v2454_v18  ;;  %2144 = vmatpush3.bf16.msra.mxu1 %v2455_v22  ;;  %v2767_v18 = vld [vmem:[#allocation2 + $0x14] sm:$0xff]  }
  0x42   :  { %2109 = vmatprep.subr.bf16.mxu0 %v2613_v0  ;;  %2145 = vmatprep.subr.bf16.mxu1 %v2613_v0  ;;  %v641_v22 = vrot.slane %v2767_v18, 1  ;;  %v825_v2 = vshrl.u32 %v2767_v18, 16  ;;  %v828_v3 = vshll.u32 %v2767_v18, 16 }
  0x44   :  { %v827_v8 = vrot.slane %v825_v2, 1 }
  0x45   :  { %2110 = vmatpush3.bf16.msra.mxu0 %v2456_v23  ;;  %2146 = vmatpush3.bf16.msra.mxu1 %v2457_v27  ;;  %v2488_v23 = vld [vmem:[#allocation5 + $0x148] sm:$0xff]  }
  0x46   :  { %2167 = vmatprep.subr.bf16.mxu0 %v2613_v0  ;;  %2203 = vmatprep.subr.bf16.mxu1 %v2613_v0  ;;  %v2781_v27 = vld [vmem:[#allocation2 + $0x1c] sm:$0xff]  }
  0x47   :  { %v643_v31 = vrot.slane %v2781_v27, 1 }
  0x48   :  { %2112 = vmatmul.mubr.bf16.vlgmr.msra.gmra.mrb[0].mxu0 %v128_v29  ;;  %2148 = vmatmul.mubr.bf16.vlgmr.msra.gmra.mrb[0].mxu1 %v1833_v14  ;;  %v639_v14 = vrot.slane %v2754_v10, 1  ;;  %v440_v29 = vrot.slane %v2699_v33, 1  ;;  %v1021_v10 = vrot.slane %v2767_v18, 2 }
  0x49   :  { %2168 = vmatpush3.bf16.msra.mxu0 %v2460_v28  ;;  %2115 = vmatprep.mubr.msk.bf16.mxu0 %vm2614_vm0, %v2613_v0  ;;  %v2491_v28 = vld [vmem:[#allocation5 + $0x150] sm:$0xff]  }
  0x4a   :  { %2169 = vmatprep.subr.bf16.mxu0 %v2613_v0  ;;  %2151 = vmatprep.mubr.msk.bf16.mxu1 %vm2614_vm0, %v2613_v0  ;;  %v640_v19 = vsel %vm434_vm2, %v638_v13, %v639_v14  ;;  %v2505_v13 = vld [vmem:[#allocation5 + $0x188] sm:$0xff]  }
  0x4b   :  { %2204 = vmatpush3.bf16.msra.mxu1 %v2463_v32  ;;  %v2493_v32 = vld [vmem:[#allocation5 + $0x158] sm:$0xff]  }
  0x4c   :  { %2205 = vmatprep.subr.bf16.mxu1 %v2613_v0 }
  0x4d   :  { %2170 = vmatpush3.bf16.msra.mxu0 %v2461_v34 }
  0x4e   :  { %2171 = vmatprep.subr.bf16.mxu0 %v2613_v0 }
  0x4f   :  { %2206 = vmatpush3.bf16.msra.mxu1 %v2465_v37  ;;  %v2495_v37 = vld [vmem:[#allocation5 + $0x160] sm:$0xff]  }
  0x50   :  { %2116 = vmatmul.mubr.bf16.gmra.mrb[4].mxu0 %v136_v39  ;;  %2207 = vmatprep.subr.bf16.mxu1 %v2613_v0  ;;  %v2496_v39 = vld [vmem:[#allocation5 + $0x128] sm:$0xff]  }
  0x51   :  { %2152 = vmatmul.mubr.bf16.gmra.mrb[4].mxu1 %v2683_v15  ;;  %2172 = vmatpush3.bf16.msra.mxu0 %v2464_v40  ;;  %v438_v15 = vrot.slane %v2690_v26, 1  ;;  %v645_v40 = vrot.slane %v2795_v36, 1 }
  0x52   :  { %2119 = vmatprep.mubr.msk.bf16.mxu0 %vm2614_vm0, %v2613_v0  ;;  %2155 = vmatprep.mubr.msk.bf16.mxu1 %vm2614_vm0, %v2613_v0 }
  0x53   :  { %2173 = vmatprep.subr.bf16.mxu0 %v2613_v0  ;;  %2208 = vmatpush3.bf16.msra.mxu1 %v2468_v42  ;;  %v439_v24 = vsel %vm434_vm2, %v436_v12, %v438_v15  ;;  %v441_v34 = vsel %vm434_vm2, %v438_v15, %v440_v29  ;;  %v443_v42 = vsel %vm434_vm2, %v440_v29, %v442_v38  ;;  %v2506_v12 = vld [vmem:[#allocation5 + $0x1c0] sm:$0xff]   ;;  %v1023_v29 = vrot.slane %v2781_v27, 2 }
  0x54   :  { %2209 = vmatprep.subr.bf16.mxu1 %v2613_v0  ;;  %v646_v43 = vsel %vm434_vm2, %v643_v31, %v645_v40 }
  0x55   :  { %2174 = vmatpush3.bf16.msra.mxu0 %v2467_v44  ;;  %v2498_v44 = vld [vmem:[#allocation5 + $0x130] sm:$0xff]  }
  0x56   :  { %2175 = vmatprep.subr.bf16.mxu0 %v2613_v0 }
  0x57   :  { %2210 = vmatpush3.bf16.msra.mxu1 %v2470_v47  ;;  %v444_v47 = vrot.slane %v2725_v53, 1  ;;  %v2501_v53 = vld [vmem:[#allocation5 + $0x138] sm:$0xff]  }
  0x58   :  { %2120 = vmatmul.mubr.bf16.gmra.mrb[8].mxu0 %v144_v49  ;;  %2211 = vmatprep.subr.bf16.mxu1 %v2613_v0  ;;  %v811_v49 = vshll.u32 %v2752_v9, 16 }
  0x59   :  { %2156 = vmatmul.mubr.bf16.gmra.mrb[8].mxu1 %v2690_v26  ;;  %2176 = vmatpush3.bf16.msra.mxu0 %v2469_v48  ;;  %v642_v26 = vsel %vm434_vm2, %v639_v14, %v641_v22  ;;  %v808_v48 = vshrl.u32 %v2752_v9, 16  ;;  %v830_v9 = vrot.slane %v828_v3, 2  ;;  %v1404_v3 = vrot.slane %v1402_v59, 3 }
  0x5a   :  { %2123 = vmatprep.mubr.msk.bf16.mxu0 %vm2614_vm0, %v2613_v0  ;;  %2159 = vmatprep.mubr.msk.bf16.mxu1 %vm2614_vm0, %v2613_v0 }
  0x5b   :  { %2177 = vmatprep.subr.bf16.mxu0 %v2613_v0  ;;  %2212 = vmatpush3.bf16.msra.mxu1 %v2472_v52  ;;  %v831_v14 = vor.u32 %v830_v9, %v827_v8 }
  0x5c   :  { %2213 = vmatprep.subr.bf16.mxu1 %v2613_v0 }
  0x5d   :  { %2178 = vmatpush3.bf16.msra.mxu0 %v2473_v56  ;;  %v445_v56 = vsel %vm434_vm2, %v442_v38, %v444_v47  ;;  %v2513_v38 = vld [vmem:[#allocation5 + $0x1e0] sm:$0xff]  }
  0x5e   :  { %2179 = vmatprep.subr.bf16.mxu0 %v2613_v0 }
  0x5f   :  { %2214 = vmatpush3.bf16.msra.mxu1 %v2474_v57  ;;  %v810_v57 = vrot.slane %v808_v48, 1 }
  0x60   :  { %2124 = vmatmul.mubr.bf16.gmra.mrb[12].mxu0 %v152_v58  ;;  %2215 = vmatprep.subr.bf16.mxu1 %v2613_v0  ;;  %v813_v58 = vrot.slane %v811_v49, 2 }
  0x61   :  { %2160 = vmatmul.mubr.bf16.gmra.mrb[12].mxu1 %v2699_v33  ;;  %2127 = vmatprep.mubr.msk.bf16.mxu0 %vm2614_vm0, %v2613_v0  ;;  %v644_v33 = vsel %vm434_vm2, %v641_v22, %v643_v31 }
  0x62   :  { %2163 = vmatprep.mubr.msk.bf16.mxu1 %vm2614_vm0, %v2613_v0  ;;  %2180 = vmatpush3.bf16.msra.mxu0 %v2475_v61 }
  0x63   :  { %2216 = vmatpush3.bf16.msra.mxu1 %v2477_v62  ;;  %2181 = vmatprep.subr.bf16.mxu0 %v2613_v0  ;;  %v1887_v62 = vcombine.low %v996_v55, %v2746_v6  ;;  %v2519_v55 = vld [vmem:[#allocation5 + $0x1b8] sm:$0xff]  }
  0x64   :  { %2217 = vmatprep.subr.bf16.mxu1 %v2613_v0 }
  0x66   :  { %2182 = vmatpush3.bf16.msra.mxu0 %v2478_v63  ;;  %v814_v63 = vor.u32 %v813_v58, %v810_v57  ;;  %v1399_v58 = vshrl.u32 %v2874_v51, 16 }
  0x67   :  { %2218 = vmatpush3.bf16.msra.mxu1 %v2479_v4  ;;  %2239 = vmatprep.subr.bf16.mxu0 %v2613_v0  ;;  %v1018_v4 = vrot.slane %v1887_v62, 2 }
  0x68   :  { %2128 = vmatmul.mubr.bf16.gmra.mrb[16].mxu0 %v160_v7  ;;  %2275 = vmatprep.subr.bf16.mxu1 %v2613_v0  ;;  %v823_v6 = vsel %vm806_vm3, %v814_v63, %v822_v1  ;;  %v2504_v7 = vld [vmem:[#allocation5 + $0x180] sm:$0xff]   ;;  %v1401_v2 = vrot.slane %v1399_v58, 2 }
  0x69   :  { %2164 = vmatmul.mubr.bf16.gmra.mrb[16].mxu1 %v2712_v45  ;;  %2183 = vmatprep.mubr.msk.bf16.mxu0 %vm2614_vm0, %v2613_v0  ;;  %v2499_v45 = vld [vmem:[#allocation2 + $0x2c] ss:$0 sps:$4 sm:$0x11]   ;;  %v1020_v11 = vsel %vm1017_vm4, %v1018_v4, %v1019_v5  ;;  %v2887_v4 = vld [vmem:[#allocation2 + $0x18] sm:$0xff]  }
  0x6a   :  { %2219 = vmatprep.mubr.msk.bf16.mxu1 %vm2614_vm0, %v2613_v0  ;;  %v647_v52 = vrot.slane %v2499_v45, 1  ;;  %v2867_v45 = vld [vmem:[#allocation2 + $0xc] sm:$0xf]  ;;  %v1405_v8 = vor.u32 %v1404_v3, %v1401_v2  ;;  %v1408_v9 = vshrl.u32 %v2887_v4, 16 }
  0x6c   :  { %v648_v61 = vsel %vm434_vm2, %v645_v40, %v647_v52  ;;  %v2518_v52 = vld [vmem:[#allocation5 + $0x1f0] sm:$0xff]  }
  0x70   :  { %2184 = vmatmul.mubr.bf16.vlgmr.msra.gmra.mrb[20].mxu0 %v437_v17  ;;  %v837_v17 = vshll.u32 %v2781_v27, 16 }
  0x71   :  { %2220 = vmatmul.mubr.bf16.vlgmr.msra.gmra.mrb[20].mxu1 %v640_v19  ;;  %2240 = vmatpush3.bf16.msra.mxu0 %v2483_v16  ;;  %v834_v16 = vshrl.u32 %v2781_v27, 16  ;;  %v2508_v19 = vld [vmem:[#allocation5 + $0x1c8] sm:$0xff]  }
  0x72   :  { %2241 = vmatprep.subr.bf16.mxu0 %v2613_v0  ;;  %2187 = vmatprep.mubr.msk.bf16.mxu0 %vm2614_vm0, %v2613_v0  ;;  %v839_v22 = vrot.slane %v837_v17, 2 }
  0x73   :  { %2223 = vmatprep.mubr.msk.bf16.mxu1 %vm2614_vm0, %v2613_v0  ;;  %2276 = vmatpush3.bf16.msra.mxu1 %v2486_v20  ;;  %v832_v20 = vsel %vm806_vm3, %v822_v1, %v831_v14  ;;  %v836_v15 = vrot.slane %v834_v16, 1  ;;  %v1410_v16 = vrot.slane %v1408_v9, 2 }
  0x74   :  { %2277 = vmatprep.subr.bf16.mxu1 %v2613_v0 }
  0x75   :  { %2242 = vmatpush3.bf16.msra.mxu0 %v2484_v21  ;;  %v2507_v21 = vld [vmem:[#allocation5 + $0x190] sm:$0xff]   ;;  %v840_v18 = vor.u32 %v839_v22, %v836_v15 }
  0x76   :  { %2243 = vmatprep.subr.bf16.mxu0 %v2613_v0 }
  0x77   :  { %2278 = vmatpush3.bf16.msra.mxu1 %v2488_v23  ;;  %v1022_v23 = vsel %vm1017_vm4, %v1019_v5, %v1021_v10  ;;  %v841_v31 = vsel %vm806_vm3, %v831_v14, %v840_v18 }
  0x78   :  { %2188 = vmatmul.mubr.bf16.gmra.mrb[24].mxu0 %v439_v24  ;;  %2279 = vmatprep.subr.bf16.mxu1 %v2613_v0  ;;  %v2510_v24 = vld [vmem:[#allocation5 + $0x1d0] sm:$0xff]  }
  0x79   :  { %2224 = vmatmul.mubr.bf16.gmra.mrb[24].mxu1 %v642_v26  ;;  %2244 = vmatpush3.bf16.msra.mxu0 %v2487_v25  ;;  %v2509_v25 = vld [vmem:[#allocation5 + $0x198] sm:$0xff]   ;;  %v843_v26 = vshrl.u32 %v2795_v36, 16 }
  0x7a   :  { %2191 = vmatprep.mubr.msk.bf16.mxu0 %vm2614_vm0, %v2613_v0  ;;  %2227 = vmatprep.mubr.msk.bf16.mxu1 %vm2614_vm0, %v2613_v0 }
  0x7b   :  { %2245 = vmatprep.subr.bf16.mxu0 %v2613_v0  ;;  %2280 = vmatpush3.bf16.msra.mxu1 %v2491_v28  ;;  %v846_v28 = vshll.u32 %v2795_v36, 16 }
  0x7c   :  { %2281 = vmatprep.subr.bf16.mxu1 %v2613_v0 }
  0x7d   :  { %2246 = vmatpush3.bf16.msra.mxu0 %v2490_v30  ;;  %v2512_v30 = vld [vmem:[#allocation5 + $0x1d8] sm:$0xff]  }
  0x7e   :  { %2247 = vmatprep.subr.bf16.mxu0 %v2613_v0 }
  0x7f   :  { %2282 = vmatpush3.bf16.msra.mxu1 %v2493_v32  ;;  %v2511_v32 = vld [vmem:[#allocation5 + $0x1a0] sm:$0xff]  }
  0x80   :  { %2192 = vmatmul.mubr.bf16.gmra.mrb[28].mxu0 %v441_v34  ;;  %2283 = vmatprep.subr.bf16.mxu1 %v2613_v0  ;;  %v845_v34 = vrot.slane %v843_v26, 1 }
  0x81   :  { %2228 = vmatmul.mubr.bf16.gmra.mrb[28].mxu1 %v644_v33  ;;  %2248 = vmatpush3.bf16.msra.mxu0 %v2492_v35  ;;  %v848_v35 = vrot.slane %v846_v28, 2  ;;  %v2517_v33 = vld [vmem:[#allocation2 + $0x2c] ss:$0 sps:$4 sm:$0x33]  }
  0x82   :  { %2195 = vmatprep.mubr.msk.bf16.mxu0 %vm2614_vm0, %v2613_v0  ;;  %2231 = vmatprep.mubr.msk.bf16.mxu1 %vm2614_vm0, %v2613_v0  ;;  %v852_v40 = vshrl.u32 %v2517_v33, 16  ;;  %v2914_v28 = vld [vmem:[#allocation2 + $0x28] sm:$0xff]  }
  0x83   :  { %2249 = vmatprep.subr.bf16.mxu0 %v2613_v0  ;;  %2284 = vmatpush3.bf16.msra.mxu1 %v2495_v37  ;;  %v1024_v37 = vsel %vm1017_vm4, %v1021_v10, %v1023_v29  ;;  %v849_v27 = vor.u32 %v848_v35, %v845_v34  ;;  %v2900_v10 = vld [vmem:[#allocation2 + $0x20] sm:$0xff]   ;;  %v1429_v34 = vshll.u32 %v2914_v28, 16 }
  0x84   :  { %2285 = vmatprep.subr.bf16.mxu1 %v2613_v0  ;;  %v854_v47 = vrot.slane %v852_v40, 1  ;;  %v1417_v15 = vshrl.u32 %v2900_v10, 16  ;;  %v1420_v22 = vshll.u32 %v2900_v10, 16  ;;  %v1228_v40 = vrot.slane %v2914_v28, 2 }
  0x85   :  { %2250 = vmatpush3.bf16.msra.mxu0 %v2496_v39  ;;  %v2514_v39 = vld [vmem:[#allocation5 + $0x1a8] sm:$0xff]  }
  0x86   :  { %2251 = vmatprep.subr.bf16.mxu0 %v2613_v0  ;;  %v1422_v26 = vrot.slane %v1420_v22, 3 }
  0x87   :  { %2286 = vmatpush3.bf16.msra.mxu1 %v2497_v41  ;;  %v855_v41 = vshll.u32 %v2517_v33, 16 }
  0x88   :  { %2196 = vmatmul.mubr.bf16.gmra.mrb[32].mxu0 %v443_v42  ;;  %2287 = vmatprep.subr.bf16.mxu1 %v2613_v0  ;;  %v1025_v42 = vrot.slane %v2795_v36, 2 }
  0x89   :  { %2232 = vmatmul.mubr.bf16.gmra.mrb[32].mxu1 %v646_v43  ;;  %2199 = vmatprep.mubr.msk.bf16.mxu0 %vm2614_vm0, %v2613_v0  ;;  %v2515_v43 = vld [vmem:[#allocation5 + $0x1e8] sm:$0xff]   ;;  %v857_v48 = vrot.slane %v855_v41, 2 }
  0x8a   :  { %2235 = vmatprep.mubr.msk.bf16.mxu1 %vm2614_vm0, %v2613_v0  ;;  %2252 = vmatpush3.bf16.msra.mxu0 %v2498_v44  ;;  %v1165_v44 = vld [vmem:[#allocation2 + $0x8] sm:$0xc]  ;;  %v1026_v49 = vsel %vm1017_vm4, %v1023_v29, %v1025_v42  ;;  %v1226_v29 = vrot.slane %v2900_v10, 2  ;;  %v2531_v41 = vld [vmem:[#allocation5 + $0x228] sm:$0xff]  }
  0x8b   :  { %2288 = vmatpush3.bf16.msra.mxu1 %v2500_v46  ;;  %2253 = vmatprep.subr.bf16.mxu0 %v2613_v0  ;;  %v850_v46 = vsel %vm806_vm3, %v840_v18, %v849_v27  ;;  %v1896_v36 = vcombine.low %v1165_v44, %v2867_v45 }
  0x8c   :  { %2289 = vmatprep.subr.bf16.mxu1 %v2613_v0 }
  0x8d   :  { %v1394_v57 = vshll.u32 %v1896_v36, 16  ;;  %v1221_v5 = vrot.slane %v1896_v36, 2 }
  0x8e   :  { %2254 = vmatpush3.bf16.msra.mxu0 %v2501_v53  ;;  %v858_v53 = vor.u32 %v857_v48, %v854_v47  ;;  %v2533_v47 = vld [vmem:[#allocation2 + $0x30] ss:$0 sps:$4 sm:$0x33]  }
  0x8f   :  { %2290 = vmatpush3.bf16.msra.mxu1 %v2502_v54  ;;  %2311 = vmatprep.subr.bf16.mxu0 %v2613_v0  ;;  %v1027_v54 = vrot.slane %v2517_v33, 2  ;;  %v1396_v1 = vrot.slane %v1394_v57, 3  ;;  %v2529_v33 = vld [vmem:[#allocation5 + $0x220] sm:$0xff]  }
  0x90   :  { %2200 = vmatmul.mubr.bf16.gmra.mrb[36].mxu0 %v445_v56  ;;  %2347 = vmatprep.subr.bf16.mxu1 %v2613_v0  ;;  %v1391_v56 = vshrl.u32 %v1896_v36, 16 }
  0x91   :  { %2236 = vmatmul.mubr.bf16.gmra.mrb[36].mxu1 %v648_v61  ;;  %2255 = vmatprep.mubr.msk.bf16.mxu0 %vm2614_vm0, %v2613_v0  ;;  %v859_v61 = vsel %vm806_vm3, %v849_v27, %v858_v53  ;;  %v1028_v62 = vsel %vm1017_vm4, %v1025_v42, %v1027_v54  ;;  %v1431_v27 = vrot.slane %v1429_v34, 3  ;;  %v2535_v54 = vld [vmem:[#allocation5 + $0x238] sm:$0xff]  }
  0x92   :  { %2291 = vmatprep.mubr.msk.bf16.mxu1 %vm2614_vm0, %v2613_v0  ;;  %v1393_v63 = vrot.slane %v1391_v56, 2 }
  0x98   :  { %2256 = vmatmul.mubr.bf16.vlgmr.msra.gmra.mrb[40].mxu0 %v823_v6  ;;  %v1222_v6 = vrot.slane %v2874_v51, 2 }
  0x99   :  { %2292 = vmatmul.mubr.bf16.vlgmr.msra.gmra.mrb[40].mxu1 %v1020_v11  ;;  %2312 = vmatpush3.bf16.msra.mxu0 %v2504_v7  ;;  %v1397_v7 = vor.u32 %v1396_v1, %v1393_v63  ;;  %v1411_v11 = vshll.u32 %v2887_v4, 16  ;;  %v1604_v1 = vrot.slane %v2887_v4, 3 }
  0x9a   :  { %2313 = vmatprep.subr.bf16.mxu0 %v2613_v0  ;;  %2259 = vmatprep.mubr.msk.bf16.mxu0 %vm2614_vm0, %v2613_v0 }
  0x9b   :  { %2295 = vmatprep.mubr.msk.bf16.mxu1 %vm2614_vm0, %v2613_v0  ;;  %2348 = vmatpush3.bf16.msra.mxu1 %v2506_v12  ;;  %v1223_v12 = vsel %vm1017_vm4, %v1221_v5, %v1222_v6  ;;  %v1406_v14 = vsel %vm1389_vm5, %v1397_v7, %v1405_v8  ;;  %v1413_v17 = vrot.slane %v1411_v11, 3 }
  0x9c   :  { %2349 = vmatprep.subr.bf16.mxu1 %v2613_v0 }
  0x9d   :  { %2314 = vmatpush3.bf16.msra.mxu0 %v2505_v13  ;;  %v2523_v13 = vld [vmem:[#allocation5 + $0x200] sm:$0xff]  }
  0x9e   :  { %2315 = vmatprep.subr.bf16.mxu0 %v2613_v0 }
  0x9f   :  { %2350 = vmatpush3.bf16.msra.mxu1 %v2508_v19  ;;  %v2524_v19 = vld [vmem:[#allocation5 + $0x208] sm:$0xff]  }
  0xa0   :  { %2260 = vmatmul.mubr.bf16.gmra.mrb[44].mxu0 %v832_v20  ;;  %2351 = vmatprep.subr.bf16.mxu1 %v2613_v0  ;;  %v1224_v20 = vrot.slane %v2887_v4, 2 }
  0xa1   :  { %2296 = vmatmul.mubr.bf16.gmra.mrb[44].mxu1 %v1022_v23  ;;  %2316 = vmatpush3.bf16.msra.mxu0 %v2507_v21  ;;  %v1414_v21 = vor.u32 %v1413_v17, %v1410_v16 }
  0xa2   :  { %2263 = vmatprep.mubr.msk.bf16.mxu0 %vm2614_vm0, %v2613_v0  ;;  %2299 = vmatprep.mubr.msk.bf16.mxu1 %vm2614_vm0, %v2613_v0  ;;  %v1225_v23 = vsel %vm1017_vm4, %v1222_v6, %v1224_v20  ;;  %v1227_v35 = vsel %vm1017_vm4, %v1224_v20, %v1226_v29 }
  0xa3   :  { %2317 = vmatprep.subr.bf16.mxu0 %v2613_v0  ;;  %2352 = vmatpush3.bf16.msra.mxu1 %v2510_v24  ;;  %v2526_v24 = vld [vmem:[#allocation5 + $0x210] sm:$0xff]   ;;  %v1415_v18 = vsel %vm1389_vm5, %v1405_v8, %v1414_v21 }
  0xa4   :  { %2353 = vmatprep.subr.bf16.mxu1 %v2613_v0 }
  0xa5   :  { %2318 = vmatpush3.bf16.msra.mxu0 %v2509_v25  ;;  %v1419_v25 = vrot.slane %v1417_v15, 2 }
  0xa6   :  { %2319 = vmatprep.subr.bf16.mxu0 %v2613_v0 }
  0xa7   :  { %2354 = vmatpush3.bf16.msra.mxu1 %v2512_v30  ;;  %v2528_v30 = vld [vmem:[#allocation5 + $0x218] sm:$0xff]  }
  0xa8   :  { %2264 = vmatmul.mubr.bf16.gmra.mrb[48].mxu0 %v841_v31  ;;  %2355 = vmatprep.subr.bf16.mxu1 %v2613_v0  ;;  %v1423_v31 = vor.u32 %v1422_v26, %v1419_v25 }
  0xa9   :  { %2300 = vmatmul.mubr.bf16.gmra.mrb[48].mxu1 %v1024_v37  ;;  %2320 = vmatpush3.bf16.msra.mxu0 %v2511_v32  ;;  %v1426_v32 = vshrl.u32 %v2914_v28, 16 }
  0xaa   :  { %2267 = vmatprep.mubr.msk.bf16.mxu0 %vm2614_vm0, %v2613_v0  ;;  %2303 = vmatprep.mubr.msk.bf16.mxu1 %vm2614_vm0, %v2613_v0  ;;  %v1424_v37 = vsel %vm1389_vm5, %v1414_v21, %v1423_v31 }
  0xab   :  { %2321 = vmatprep.subr.bf16.mxu0 %v2613_v0  ;;  %2356 = vmatpush3.bf16.msra.mxu1 %v2513_v38  ;;  %v1428_v38 = vrot.slane %v1426_v32, 2 }
  0xac   :  { %2357 = vmatprep.subr.bf16.mxu1 %v2613_v0 }
  0xad   :  { %2322 = vmatpush3.bf16.msra.mxu0 %v2514_v39  ;;  %v2929_v39 = vld [vmem:[#allocation2 + $0x30] ss:$0 sps:$4 sm:$0x77]   ;;  %v1432_v42 = vor.u32 %v1431_v27, %v1428_v38 }
  0xae   :  { %2323 = vmatprep.subr.bf16.mxu0 %v2613_v0  ;;  %v1438_v44 = vshll.u32 %v2929_v39, 16 }
  0xaf   :  { %2358 = vmatpush3.bf16.msra.mxu1 %v2515_v43  ;;  %v1435_v43 = vshrl.u32 %v2929_v39, 16  ;;  %v1433_v48 = vsel %vm1389_vm5, %v1423_v31, %v1432_v42 }
  0xb0   :  { %2268 = vmatmul.mubr.bf16.gmra.mrb[52].mxu0 %v850_v46  ;;  %2359 = vmatprep.subr.bf16.mxu1 %v2613_v0  ;;  %v1229_v46 = vsel %vm1017_vm4, %v1226_v29, %v1228_v40  ;;  %v1440_v36 = vrot.slane %v1438_v44, 3 }
  0xb1   :  { %2304 = vmatmul.mubr.bf16.gmra.mrb[52].mxu1 %v1026_v49  ;;  %2271 = vmatprep.mubr.msk.bf16.mxu0 %vm2614_vm0, %v2613_v0  ;;  %v2532_v49 = vld [vmem:[#allocation5 + $0x230] sm:$0xff]  }
  0xb2   :  { %2307 = vmatprep.mubr.msk.bf16.mxu1 %vm2614_vm0, %v2613_v0  ;;  %2324 = vmatpush3.bf16.msra.mxu0 %v2516_v50  ;;  %v1437_v50 = vrot.slane %v1435_v43, 2 }
  0xb3   :  { %2360 = vmatpush3.bf16.msra.mxu1 %v2518_v52  ;;  %2325 = vmatprep.subr.bf16.mxu0 %v2613_v0  ;;  %v1230_v52 = vrot.slane %v2533_v47, 2 }
  0xb4   :  { %2361 = vmatprep.subr.bf16.mxu1 %v2613_v0  ;;  %v1441_v53 = vor.u32 %v1440_v36, %v1437_v50 }
  0xb5   :  { %v1231_v56 = vsel %vm1017_vm4, %v1228_v40, %v1230_v52 }
  0xb6   :  { %2326 = vmatpush3.bf16.msra.mxu0 %v2519_v55  ;;  %v1579_v55 = vld [vmem:[#allocation2 + $0x8] sm:$0x8]  ;;  %v1442_v58 = vsel %vm1389_vm5, %v1432_v42, %v1441_v53 }
  0xb7   :  { %2362 = vmatpush3.bf16.msra.mxu1 %v2520_v60  ;;  %2383 = vmatprep.subr.bf16.mxu0 %v2613_v0  ;;  %v1919_v57 = vcombine.low %v1579_v55, %v2867_v45  ;;  %v1602_v60 = vrot.slane %v2874_v51, 3  ;;  %v1608_v45 = vrot.slane %v2914_v28, 3  ;;  %v1610_v51 = vrot.slane %v2929_v39, 3 }
  0xb8   :  { %2272 = vmatmul.mubr.bf16.gmra.mrb[56].mxu0 %v859_v61  ;;  %2419 = vmatprep.subr.bf16.mxu1 %v2613_v0  ;;  %v1606_v61 = vrot.slane %v2900_v10, 3 }
  0xb9   :  { %2308 = vmatmul.mubr.bf16.gmra.mrb[56].mxu1 %v1028_v62  ;;  %2327 = vmatprep.mubr.msk.bf16.mxu0 %vm2614_vm0, %v2613_v0  ;;  %v1601_v59 = vrot.slane %v1919_v57, 3  ;;  %v1605_v2 = vsel %vm1600_vm6, %v1602_v60, %v1604_v1  ;;  %v1611_v3 = vsel %vm1600_vm6, %v1608_v45, %v1610_v51 }
  0xba   :  { %2363 = vmatprep.mubr.msk.bf16.mxu1 %vm2614_vm0, %v2613_v0  ;;  %v1609_v63 = vsel %vm1600_vm6, %v1606_v61, %v1608_v45  ;;  %v1607_v5 = vsel %vm1600_vm6, %v1604_v1, %v1606_v61 }
  0xbb   :  { %v1603_v62 = vsel %vm1600_vm6, %v1601_v59, %v1602_v60 }
  0xc0   :  { %2328 = vmatmul.mubr.bf16.vlgmr.msra.gmra.mrb[60].mxu0 %v1223_v12 }
  0xc1   :  { %2364 = vmatmul.mubr.bf16.vlgmr.msra.gmra.mrb[60].mxu1 %v1406_v14  ;;  %2384 = vmatpush3.bf16.msra.mxu0 %v2523_v13 }
  0xc2   :  { %2385 = vmatprep.subr.bf16.mxu0 %v2613_v0  ;;  %2331 = vmatprep.mubr.msk.bf16.mxu0 %vm2614_vm0, %v2613_v0 }
  0xc3   :  { %2367 = vmatprep.mubr.msk.bf16.mxu1 %vm2614_vm0, %v2613_v0  ;;  %2427 = vmatpush3.bf16.msra.mxu1 %v2523_v13 }
  0xc4   :  { %2420 = vmatprep.subr.bf16.mxu1 %v2613_v0 }
  0xc5   :  { %2386 = vmatpush3.bf16.msra.mxu0 %v2524_v19 }
  0xc6   :  { %2387 = vmatprep.subr.bf16.mxu0 %v2613_v0 }
  0xc7   :  { %2428 = vmatpush3.bf16.msra.mxu1 %v2524_v19 }
  0xc8   :  { %2332 = vmatmul.mubr.bf16.gmra.mrb[64].mxu0 %v1225_v23  ;;  %2421 = vmatprep.subr.bf16.mxu1 %v2613_v0 }
  0xc9   :  { %2368 = vmatmul.mubr.bf16.gmra.mrb[64].mxu1 %v1415_v18  ;;  %2388 = vmatpush3.bf16.msra.mxu0 %v2526_v24 }
  0xca   :  { %2335 = vmatprep.mubr.msk.bf16.mxu0 %vm2614_vm0, %v2613_v0  ;;  %2371 = vmatprep.mubr.msk.bf16.mxu1 %vm2614_vm0, %v2613_v0 }
  0xcb   :  { %2389 = vmatprep.subr.bf16.mxu0 %v2613_v0  ;;  %2429 = vmatpush3.bf16.msra.mxu1 %v2526_v24 }
  0xcc   :  { %2422 = vmatprep.subr.bf16.mxu1 %v2613_v0 }
  0xcd   :  { %2390 = vmatpush3.bf16.msra.mxu0 %v2528_v30 }
  0xce   :  { %2391 = vmatprep.subr.bf16.mxu0 %v2613_v0 }
  0xcf   :  { %2430 = vmatpush3.bf16.msra.mxu1 %v2528_v30 }
  0xd0   :  { %2336 = vmatmul.mubr.bf16.gmra.mrb[68].mxu0 %v1227_v35  ;;  %2423 = vmatprep.subr.bf16.mxu1 %v2613_v0 }
  0xd1   :  { %2372 = vmatmul.mubr.bf16.gmra.mrb[68].mxu1 %v1424_v37  ;;  %2392 = vmatpush3.bf16.msra.mxu0 %v2529_v33 }
  0xd2   :  { %2339 = vmatprep.mubr.msk.bf16.mxu0 %vm2614_vm0, %v2613_v0  ;;  %2375 = vmatprep.mubr.msk.bf16.mxu1 %vm2614_vm0, %v2613_v0 }
  0xd3   :  { %2431 = vmatpush3.bf16.msra.mxu1 %v2529_v33  ;;  %2393 = vmatprep.subr.bf16.mxu0 %v2613_v0 }
  0xd4   :  { %2424 = vmatprep.subr.bf16.mxu1 %v2613_v0 }
  0xd5   :  { %2394 = vmatpush3.bf16.msra.mxu0 %v2531_v41 }
  0xd6   :  { %2395 = vmatprep.subr.bf16.mxu0 %v2613_v0 }
  0xd7   :  { %2432 = vmatpush3.bf16.msra.mxu1 %v2531_v41 }
  0xd8   :  { %2340 = vmatmul.mubr.bf16.gmra.mrb[72].mxu0 %v1229_v46  ;;  %2425 = vmatprep.subr.bf16.mxu1 %v2613_v0 }
  0xd9   :  { %2376 = vmatmul.mubr.bf16.gmra.mrb[72].mxu1 %v1433_v48  ;;  %2343 = vmatprep.mubr.msk.bf16.mxu0 %vm2614_vm0, %v2613_v0 }
  0xda   :  { %2379 = vmatprep.mubr.msk.bf16.mxu1 %vm2614_vm0, %v2613_v0  ;;  %2396 = vmatpush3.bf16.msra.mxu0 %v2532_v49 }
  0xdb   :  { %2433 = vmatpush3.bf16.msra.mxu1 %v2532_v49  ;;  %2397 = vmatprep.subr.bf16.mxu0 %v2613_v0 }
  0xdc   :  { %2426 = vmatprep.subr.bf16.mxu1 %v2613_v0 }
  0xde   :  { %2398 = vmatpush3.bf16.msra.mxu0 %v2535_v54 }
  0xdf   :  { %2434 = vmatpush3.bf16.msra.mxu1 %v2535_v54 }
  0xe0   :  { %2344 = vmatmul.mubr.bf16.gmra.mrb[76].mxu0 %v1231_v56 }
  0xe1   :  { %2380 = vmatmul.mubr.bf16.gmra.mrb[76].mxu1 %v1442_v58  ;;  %2399 = vmatprep.mubr.msk.bf16.mxu0 %vm2614_vm0, %v2613_v0 }
  0xe2   :  { %2411 = vmatprep.mubr.msk.bf16.mxu1 %vm2614_vm0, %v2613_v0 }
  0xe8   :  { %2400 = vmatmul.mubr.bf16.vlgmr.msra.gmra.mrb[80].mxu0 %v1603_v62 }
  0xe9   :  { %2412 = vmatmul.mubr.bf16.vlgmr.msra.gmra.mrb[80].mxu1 %v1609_v63  ;;  %2403 = vmatprep.mubr.msk.bf16.mxu0 %vm2614_vm0, %v2613_v0 }
  0xea   :  { %2415 = vmatprep.mubr.msk.bf16.mxu1 %vm2614_vm0, %v2613_v0 }
  0xf0   :  { %2404 = vmatmul.mubr.bf16.gmra.mrb[84].mxu0 %v1605_v2 }
  0xf1   :  { %2416 = vmatmul.mubr.bf16.gmra.mrb[84].mxu1 %v1611_v3  ;;  %2407 = vmatprep.mubr.msk.bf16.mxu0 %vm2614_vm0, %v2613_v0 }
  0xf8   :  { %2408 = vmatmul.mubr.bf16.gmra.mrb[88].mxu0 %v1607_v5 }
 0x11b   :  { %v248_v6 = vpop.f32.mrb[0].mxu0  ;;  %v374_v7 = vpop.f32.mrb[0].mxu1 }
 0x11c   :  { %v2113_v4 = vpop.f32.mrb[1].mxu0  ;;  %v375_v8 = vadd.f32 %v374_v7, %v248_v6  ;;  %v2149_v9 = vpop.f32.mrb[1].mxu1 }
 0x11d   :  { %v251_v11 = vpop.f32.mrb[2].mxu0  ;;  %v377_v12 = vpop.f32.mrb[2].mxu1 }
 0x11e   :  { %v2114_v13 = vpop.f32.mrb[3].mxu0  ;;  %v378_v14 = vadd.f32 %v377_v12, %v251_v11  ;;  %v2150_v16 = vpop.f32.mrb[3].mxu1 }
 0x123   :  { %v256_v17 = vpop.f32.mrb[4].mxu0 }
 0x124   :  { %v382_v10 = vpop.f32.mrb[4].mxu1  ;;  %v2117_v19 = vpop.f32.mrb[5].mxu0 }
 0x125   :  { %v383_v20 = vadd.f32 %v382_v10, %v256_v17  ;;  %v2153_v21 = vpop.f32.mrb[5].mxu1  ;;  %v259_v15 = vpop.f32.mrb[6].mxu0 }
 0x126   :  { %v385_v0 = vpop.f32.mrb[6].mxu1  ;;  %v2118_v22 = vpop.f32.mrb[7].mxu0 }
 0x127   :  { %v386_v23 = vadd.f32 %v385_v0, %v259_v15  ;;  %v2154_v24 = vpop.f32.mrb[7].mxu1 }
 0x12b   :  { %v264_v18 = vpop.f32.mrb[8].mxu0 }
 0x12c   :  { %v390_v25 = vpop.f32.mrb[8].mxu1  ;;  %v2121_v26 = vpop.f32.mrb[9].mxu0 }
 0x12d   :  { %v391_v28 = vadd.f32 %v390_v25, %v264_v18  ;;  %v2157_v29 = vpop.f32.mrb[9].mxu1  ;;  %v267_v30 = vpop.f32.mrb[10].mxu0 }
 0x12e   :  { %v393_v31 = vpop.f32.mrb[10].mxu1  ;;  %v2122_v32 = vpop.f32.mrb[11].mxu0 }
 0x12f   :  { %v394_v34 = vadd.f32 %v393_v31, %v267_v30  ;;  %v2158_v35 = vpop.f32.mrb[11].mxu1 }
 0x133   :  { %v272_v33 = vpop.f32.mrb[12].mxu0 }
 0x134   :  { %v398_v37 = vpop.f32.mrb[12].mxu1  ;;  %v2125_v38 = vpop.f32.mrb[13].mxu0 }
 0x135   :  { %v399_v27 = vadd.f32 %v398_v37, %v272_v33  ;;  %v2161_v39 = vpop.f32.mrb[13].mxu1  ;;  %v275_v40 = vpop.f32.mrb[14].mxu0 }
 0x136   :  { %v401_v41 = vpop.f32.mrb[14].mxu1  ;;  %v2126_v42 = vpop.f32.mrb[15].mxu0 }
 0x137   :  { %v402_v43 = vadd.f32 %v401_v41, %v275_v40  ;;  %v2162_v44 = vpop.f32.mrb[15].mxu1 }
 0x13b   :  { %v280_v46 = vpop.f32.mrb[16].mxu0 }
 0x13c   :  { %v406_v47 = vpop.f32.mrb[16].mxu1  ;;  %v2129_v48 = vpop.f32.mrb[17].mxu0 }
 0x13d   :  { %v407_v49 = vadd.f32 %v406_v47, %v280_v46  ;;  %v2165_v50 = vpop.f32.mrb[17].mxu1  ;;  %v283_v36 = vpop.f32.mrb[18].mxu0 }
 0x13e   :  { %v409_v52 = vpop.f32.mrb[18].mxu1  ;;  %v2130_v53 = vpop.f32.mrb[19].mxu0 }
 0x13f   :  { %v410_v54 = vadd.f32 %v409_v52, %v283_v36  ;;  %v2166_v55 = vpop.f32.mrb[19].mxu1 }
 0x143   :  { %v533_v56 = vpop.f32.mrb[20].mxu0 }
 0x144   :  { %v572_v57 = vadd.f32 %v533_v56, %v375_v8  ;;  %v2185_v58 = vpop.f32.mrb[21].mxu0  ;;  %v736_v59 = vpop.f32.mrb[20].mxu1 }
 0x145   :  { %v536_v60 = vpop.f32.mrb[22].mxu0  ;;  %v2221_v61 = vpop.f32.mrb[21].mxu1 }
 0x146   :  { %v573_v45 = vadd.f32 %v536_v60, %v378_v14  ;;  %v775_v62 = vadd.f32 %v736_v59, %v572_v57  ;;  %v2186_v63 = vpop.f32.mrb[23].mxu0  ;;  %v739_v1 = vpop.f32.mrb[22].mxu1 }
 0x147   :  { %v2222_v51 = vpop.f32.mrb[23].mxu1 }
 0x148   :  { %v776_v2 = vadd.f32 %v739_v1, %v573_v45 }
 0x14b   :  { %v541_v3 = vpop.f32.mrb[24].mxu0 }
 0x14c   :  { %v574_v5 = vadd.f32 %v541_v3, %v383_v20  ;;  %v2189_v6 = vpop.f32.mrb[25].mxu0  ;;  %v744_v7 = vpop.f32.mrb[24].mxu1 }
 0x14d   :  { %v544_v4 = vpop.f32.mrb[26].mxu0  ;;  %v2225_v9 = vpop.f32.mrb[25].mxu1 }
 0x14e   :  { %v575_v11 = vadd.f32 %v544_v4, %v386_v23  ;;  %v777_v12 = vadd.f32 %v744_v7, %v574_v5  ;;  %v2190_v13 = vpop.f32.mrb[27].mxu0  ;;  %v747_v8 = vpop.f32.mrb[26].mxu1 }
 0x14f   :  { %v2226_v16 = vpop.f32.mrb[27].mxu1 }
 0x150   :  { %v778_v17 = vadd.f32 %v747_v8, %v575_v11 }
 0x153   :  { %v549_v10 = vpop.f32.mrb[28].mxu0 }
 0x154   :  { %v576_v19 = vadd.f32 %v549_v10, %v391_v28  ;;  %v2193_v14 = vpop.f32.mrb[29].mxu0  ;;  %v752_v21 = vpop.f32.mrb[28].mxu1 }
 0x155   :  { %v552_v15 = vpop.f32.mrb[30].mxu0  ;;  %v2229_v0 = vpop.f32.mrb[29].mxu1 }
 0x156   :  { %v577_v22 = vadd.f32 %v552_v15, %v394_v34  ;;  %v779_v24 = vadd.f32 %v752_v21, %v576_v19  ;;  %v2194_v18 = vpop.f32.mrb[31].mxu0  ;;  %v755_v20 = vpop.f32.mrb[30].mxu1 }
 0x157   :  { %v2230_v25 = vpop.f32.mrb[31].mxu1 }
 0x158   :  { %v780_v26 = vadd.f32 %v755_v20, %v577_v22 }
 0x15b   :  { %v557_v29 = vpop.f32.mrb[32].mxu0 }
 0x15c   :  { %v578_v30 = vadd.f32 %v557_v29, %v399_v27  ;;  %v2197_v23 = vpop.f32.mrb[33].mxu0  ;;  %v760_v31 = vpop.f32.mrb[32].mxu1 }
 0x15d   :  { %v560_v32 = vpop.f32.mrb[34].mxu0  ;;  %v2233_v35 = vpop.f32.mrb[33].mxu1 }
 0x15e   :  { %v579_v33 = vadd.f32 %v560_v32, %v402_v43  ;;  %v781_v37 = vadd.f32 %v760_v31, %v578_v30  ;;  %v2198_v38 = vpop.f32.mrb[35].mxu0  ;;  %v763_v28 = vpop.f32.mrb[34].mxu1 }
 0x15f   :  { %v2234_v39 = vpop.f32.mrb[35].mxu1 }
 0x160   :  { %v782_v40 = vadd.f32 %v763_v28, %v579_v33 }
 0x163   :  { %v565_v41 = vpop.f32.mrb[36].mxu0 }
 0x164   :  { %v580_v42 = vadd.f32 %v565_v41, %v407_v49  ;;  %v2201_v34 = vpop.f32.mrb[37].mxu0  ;;  %v768_v44 = vpop.f32.mrb[36].mxu1 }
 0x165   :  { %v568_v46 = vpop.f32.mrb[38].mxu0  ;;  %v2237_v47 = vpop.f32.mrb[37].mxu1 }
 0x166   :  { %v581_v48 = vadd.f32 %v568_v46, %v410_v54  ;;  %v783_v50 = vadd.f32 %v768_v44, %v580_v42  ;;  %v2202_v36 = vpop.f32.mrb[39].mxu0  ;;  %v771_v27 = vpop.f32.mrb[38].mxu1 }
 0x167   :  { %v2238_v52 = vpop.f32.mrb[39].mxu1 }
 0x168   :  { %v784_v53 = vadd.f32 %v771_v27, %v581_v48 }
 0x16b   :  { %v947_v55 = vpop.f32.mrb[40].mxu0 }
 0x16c   :  { %v986_v56 = vadd.f32 %v947_v55, %v775_v62  ;;  %v2257_v43 = vpop.f32.mrb[41].mxu0  ;;  %v1116_v57 = vpop.f32.mrb[40].mxu1 }
 0x16d   :  { %v950_v58 = vpop.f32.mrb[42].mxu0  ;;  %v2293_v59 = vpop.f32.mrb[41].mxu1 }
 0x16e   :  { %v987_v60 = vadd.f32 %v950_v58, %v776_v2  ;;  %v1155_v61 = vadd.f32 %v1116_v57, %v986_v56  ;;  %v2258_v45 = vpop.f32.mrb[43].mxu0  ;;  %v1119_v49 = vpop.f32.mrb[42].mxu1 }
 0x16f   :  { %v2294_v63 = vpop.f32.mrb[43].mxu1 }
 0x170   :  { %v1156_v1 = vadd.f32 %v1119_v49, %v987_v60 }
 0x173   :  { %v955_v51 = vpop.f32.mrb[44].mxu0 }
 0x174   :  { %v988_v3 = vadd.f32 %v955_v51, %v777_v12  ;;  %v2261_v54 = vpop.f32.mrb[45].mxu0  ;;  %v1124_v5 = vpop.f32.mrb[44].mxu1 }
 0x175   :  { %v958_v6 = vpop.f32.mrb[46].mxu0  ;;  %v2297_v7 = vpop.f32.mrb[45].mxu1 }
 0x176   :  { %v989_v4 = vadd.f32 %v958_v6, %v778_v17  ;;  %v1157_v9 = vadd.f32 %v1124_v5, %v988_v3  ;;  %v2262_v11 = vpop.f32.mrb[47].mxu0  ;;  %v1127_v62 = vpop.f32.mrb[46].mxu1 }
 0x177   :  { %v2298_v13 = vpop.f32.mrb[47].mxu1 }
 0x178   :  { %v1158_v8 = vadd.f32 %v1127_v62, %v989_v4 }
 0x17b   :  { %v963_v16 = vpop.f32.mrb[48].mxu0 }
 0x17c   :  { %v990_v10 = vadd.f32 %v963_v16, %v779_v24  ;;  %v2265_v2 = vpop.f32.mrb[49].mxu0  ;;  %v1132_v19 = vpop.f32.mrb[48].mxu1 }
 0x17d   :  { %v966_v14 = vpop.f32.mrb[50].mxu0  ;;  %v2301_v21 = vpop.f32.mrb[49].mxu1 }
 0x17e   :  { %v991_v15 = vadd.f32 %v966_v14, %v780_v26  ;;  %v1159_v0 = vadd.f32 %v1132_v19, %v990_v10  ;;  %v2266_v22 = vpop.f32.mrb[51].mxu0  ;;  %v1135_v12 = vpop.f32.mrb[50].mxu1 }
 0x17f   :  { %v2302_v18 = vpop.f32.mrb[51].mxu1 }
 0x180   :  { %v1160_v20 = vadd.f32 %v1135_v12, %v991_v15 }
 0x183   :  { %v971_v25 = vpop.f32.mrb[52].mxu0 }
 0x184   :  { %v992_v29 = vadd.f32 %v971_v25, %v781_v37  ;;  %v2269_v17 = vpop.f32.mrb[53].mxu0  ;;  %v1140_v30 = vpop.f32.mrb[52].mxu1 }
 0x185   :  { %v974_v23 = vpop.f32.mrb[54].mxu0  ;;  %v2305_v31 = vpop.f32.mrb[53].mxu1 }
 0x186   :  { %v993_v32 = vadd.f32 %v974_v23, %v782_v40  ;;  %v1161_v35 = vadd.f32 %v1140_v30, %v992_v29  ;;  %v2270_v33 = vpop.f32.mrb[55].mxu0  ;;  %v1143_v24 = vpop.f32.mrb[54].mxu1 }
 0x187   :  { %v2306_v38 = vpop.f32.mrb[55].mxu1 }
 0x188   :  { %v1162_v28 = vadd.f32 %v1143_v24, %v993_v32 }
 0x18b   :  { %v979_v39 = vpop.f32.mrb[56].mxu0 }
 0x18c   :  { %v994_v41 = vadd.f32 %v979_v39, %v783_v50  ;;  %v2273_v26 = vpop.f32.mrb[57].mxu0  ;;  %v1148_v42 = vpop.f32.mrb[56].mxu1 }
 0x18d   :  { %v982_v34 = vpop.f32.mrb[58].mxu0  ;;  %v2309_v44 = vpop.f32.mrb[57].mxu1 }
 0x18e   :  { %v995_v46 = vadd.f32 %v982_v34, %v784_v53  ;;  %v1163_v47 = vadd.f32 %v1148_v42, %v994_v41  ;;  %v2274_v48 = vpop.f32.mrb[59].mxu0  ;;  %v1151_v37 = vpop.f32.mrb[58].mxu1 }
 0x18f   :  { %v2310_v36 = vpop.f32.mrb[59].mxu1 }
 0x190   :  { %v1164_v27 = vadd.f32 %v1151_v37, %v995_v46 }
 0x193   :  { %v1319_v52 = vpop.f32.mrb[60].mxu0 }
 0x194   :  { %v1358_v55 = vadd.f32 %v1319_v52, %v1155_v61  ;;  %v2329_v40 = vpop.f32.mrb[61].mxu0  ;;  %v1530_v56 = vpop.f32.mrb[60].mxu1 }
 0x195   :  { %v1322_v43 = vpop.f32.mrb[62].mxu0  ;;  %v2365_v57 = vpop.f32.mrb[61].mxu1  ;;  %v1928_v40 = vld [vmem:[%s3003_s2] ss:$0 sm:$0xff]  ;;  %s2615_s2 = smov [#allocation7]  }
 0x196   :  { %v1359_v58 = vadd.f32 %v1322_v43, %v1156_v1  ;;  %v1569_v59 = vadd.f32 %v1530_v56, %v1358_v55  ;;  %v2330_v60 = vpop.f32.mrb[63].mxu0  ;;  %v1533_v50 = vpop.f32.mrb[62].mxu1  ;;  %s1820_s11 = sshll.u32 %s2615_s2, 4  ;;  %s1821_s11 = int_to_ptr.vmem [resolvable:$true] %s1820_s11 }
 0x197   :  { %v2366_v45 = vpop.f32.mrb[63].mxu1  ;;  %s2581_s12 = scalar_lea.vmem %s1821_s11, 640  ;;  %p2586_p3 = scmp.lt.s32.totalorder %s1821_s11, %s1821_s11 }
 0x198   :  { %v1570_v49 = vadd.f32 %v1533_v50, %v1359_v58  ;;  %p2582_p2 = scmp.ne.s32.totalorder %s1821_s11, %s2581_s12  ;;  %p2587_p4 = scmp.lt.s32.totalorder %s2581_s12, %s2581_s12 }
 0x19a   :  { %p2588_p5 = por %p2587_p4, %p2586_p3 }
 0x19b   :  { %v1327_v63 = vpop.f32.mrb[64].mxu0 }
 0x19c   :  { %v1360_v51 = vadd.f32 %v1327_v63, %v1157_v9  ;;  %v2333_v53 = vpop.f32.mrb[65].mxu0  ;;  %v1538_v3 = vpop.f32.mrb[64].mxu1  ;;  %p2589_p6 = pnand %p2588_p5, %p2582_p2 }
 0x19d   :  { %v1330_v54 = vpop.f32.mrb[66].mxu0  ;;  %v2369_v5 = vpop.f32.mrb[65].mxu1 }
 0x19e   :  { %v1361_v6 = vadd.f32 %v1330_v54, %v1158_v8  ;;  %v1571_v7 = vadd.f32 %v1538_v3, %v1360_v51  ;;  %v2334_v4 = vpop.f32.mrb[67].mxu0  ;;  %v1541_v61 = vpop.f32.mrb[66].mxu1 }
 0x19f   :  { %v2370_v11 = vpop.f32.mrb[67].mxu1 }
 0x1a0   :  { %v2974_v62 = vadd.f32 %v1541_v61, %v1361_v6 }
 0x1a3   :  { %v1335_v13 = vpop.f32.mrb[68].mxu0 }
 0x1a4   :  { %v1362_v1 = vadd.f32 %v1335_v13, %v1159_v0  ;;  %v2337_v16 = vpop.f32.mrb[69].mxu0  ;;  %v1546_v10 = vpop.f32.mrb[68].mxu1 }
 0x1a5   :  { %v1338_v2 = vpop.f32.mrb[70].mxu0  ;;  %v2373_v19 = vpop.f32.mrb[69].mxu1 }
 0x1a6   :  { %v1363_v14 = vadd.f32 %v1338_v2, %v1160_v20  ;;  %v2976_v21 = vadd.f32 %v1546_v10, %v1362_v1  ;;  %v2338_v9 = vpop.f32.mrb[71].mxu0  ;;  %v1549_v15 = vpop.f32.mrb[70].mxu1 }
 0x1a7   :  { %v2374_v22 = vpop.f32.mrb[71].mxu1 }
 0x1a8   :  { %v2978_v12 = vadd.f32 %v1549_v15, %v1363_v14 }
 0x1ab   :  { %v1343_v8 = vpop.f32.mrb[72].mxu0 }
 0x1ac   :  { %v1364_v18 = vadd.f32 %v1343_v8, %v1161_v35  ;;  %v2341_v25 = vpop.f32.mrb[73].mxu0  ;;  %v1554_v29 = vpop.f32.mrb[72].mxu1 }
 0x1ad   :  { %v1346_v17 = vpop.f32.mrb[74].mxu0  ;;  %v2377_v30 = vpop.f32.mrb[73].mxu1 }
 0x1ae   :  { %v1365_v23 = vadd.f32 %v1346_v17, %v1162_v28  ;;  %v1575_v0 = vadd.f32 %v1554_v29, %v1364_v18  ;;  %v2342_v31 = vpop.f32.mrb[75].mxu0  ;;  %v1557_v32 = vpop.f32.mrb[74].mxu1 }
 0x1af   :  { %v2378_v33 = vpop.f32.mrb[75].mxu1 }
 0x1b0   :  { %v1576_v24 = vadd.f32 %v1557_v32, %v1365_v23 }
 0x1b3   :  { %v1351_v20 = vpop.f32.mrb[76].mxu0 }
 0x1b4   :  { %v1366_v38 = vadd.f32 %v1351_v20, %v1163_v47  ;;  %v2345_v39 = vpop.f32.mrb[77].mxu0  ;;  %v1562_v41 = vpop.f32.mrb[76].mxu1 }
 0x1b5   :  { %v1354_v26 = vpop.f32.mrb[78].mxu0  ;;  %v2381_v42 = vpop.f32.mrb[77].mxu1 }
 0x1b6   :  { %v1367_v34 = vadd.f32 %v1354_v26, %v1164_v27  ;;  %v1577_v44 = vadd.f32 %v1562_v41, %v1366_v38  ;;  %v2346_v46 = vpop.f32.mrb[79].mxu0  ;;  %v1565_v35 = vpop.f32.mrb[78].mxu1 }
 0x1b7   :  { %v2382_v48 = vpop.f32.mrb[79].mxu1 }
 0x1b8   :  { %v1578_v37 = vadd.f32 %v1565_v35, %v1367_v34 }
 0x1bb   :  { %v1699_v36 = vpop.f32.mrb[80].mxu0 }
 0x1bc   :  { %v1738_v52 = vadd.f32 %v1699_v36, %v1569_v59  ;;  %v1723_v28 = vpop.f32.mrb[80].mxu1  ;;  %v2401_v55 = vpop.f32.mrb[81].mxu0 }
 0x1bd   :  { %v1744_v56 = vadd.f32 %v1723_v28, %v1575_v0  ;;  %v2413_v47 = vpop.f32.mrb[81].mxu1  ;;  %v1702_v43 = vpop.f32.mrb[82].mxu0 }
 0x1be   :  { %v1739_v57 = vadd.f32 %v1702_v43, %v1570_v49  ;;  %v1726_v58 = vpop.f32.mrb[82].mxu1  ;;  %v2402_v60 = vpop.f32.mrb[83].mxu0  ;;  %v1755_v45 = vadd.f32 %v1928_v40, %v1738_v52 }
 0x1bf   :  { %v1745_v27 = vadd.f32 %v1726_v58, %v1576_v24  ;;  %v2414_v50 = vpop.f32.mrb[83].mxu1  ;;  %v1761_v51 = vadd.f32 %v1928_v40, %v1744_v56 }
 0x1c0   :  { %v1756_v63 = vadd.f32 %v1928_v40, %v1739_v57 }
 0x1c1   :  { %v1762_v53 = vadd.f32 %v1928_v40, %v1745_v27 }
 0x1c2   :  { %v1952_v3 = vpack.c.bf16 %v1756_v63, %v1755_v45 }
 0x1c3   :  { %v1967_v59 = vpack.c.bf16 %v1762_v53, %v1761_v51  ;;  %v1707_v54 = vpop.f32.mrb[84].mxu0 }
 0x1c4   :  { %1953 = vst [vmem:[#allocation7] sm:$0xff] %v1952_v3   ;;  %v1740_v5 = vadd.f32 %v1707_v54, %v1571_v7  ;;  %v1731_v6 = vpop.f32.mrb[84].mxu1  ;;  %v2405_v4 = vpop.f32.mrb[85].mxu0 }
 0x1c5   :  { %1976 = vst [vmem:[#allocation7 + $0x18] sm:$0xff] %v1967_v59   ;;  %v1746_v61 = vadd.f32 %v1731_v6, %v1577_v44  ;;  %v2417_v11 = vpop.f32.mrb[85].mxu1  ;;  %v1710_v13 = vpop.f32.mrb[86].mxu0 }
 0x1c6   :  { %v1741_v49 = vadd.f32 %v1710_v13, %v2974_v62  ;;  %v1734_v1 = vpop.f32.mrb[86].mxu1  ;;  %v2406_v16 = vpop.f32.mrb[87].mxu0  ;;  %v1757_v19 = vadd.f32 %v1928_v40, %v1740_v5 }
 0x1c7   :  { %v1747_v10 = vadd.f32 %v1734_v1, %v1578_v37  ;;  %v2418_v2 = vpop.f32.mrb[87].mxu1  ;;  %v1763_v9 = vadd.f32 %v1928_v40, %v1746_v61 }
 0x1c8   :  { %v1758_v14 = vadd.f32 %v1928_v40, %v1741_v49 }
 0x1c9   :  { %v1764_v15 = vadd.f32 %v1928_v40, %v1747_v10 }
 0x1ca   :  { %v1957_v22 = vpack.c.bf16 %v1758_v14, %v1757_v19 }
 0x1cb   :  { %v1972_v8 = vpack.c.bf16 %v1764_v15, %v1763_v9  ;;  %v1715_v18 = vpop.f32.mrb[88].mxu0 }
 0x1cc   :  { %1974 = vst [vmem:[#allocation7 + $0x8] sm:$0xff] %v1957_v22   ;;  %v1742_v7 = vadd.f32 %v1715_v18, %v2976_v21  ;;  %v2409_v25 = vpop.f32.mrb[89].mxu0 }
 0x1cd   :  { %1977 = vst [vmem:[#allocation7 + $0x20] sm:$0xff] %v1972_v8   ;;  %v1718_v29 = vpop.f32.mrb[90].mxu0 }
 0x1ce   :  { %v1743_v17 = vadd.f32 %v1718_v29, %v2978_v12  ;;  %v2410_v62 = vpop.f32.mrb[91].mxu0  ;;  %v1759_v30 = vadd.f32 %v1928_v40, %v1742_v7 }
 0x1d0   :  { %v1760_v23 = vadd.f32 %v1928_v40, %v1743_v17 }
 0x1d2   :  { %v1962_v0 = vpack.c.bf16 %v1760_v23, %v1759_v30 }
 0x1d4   :  { %1975 = vst [vmem:[#allocation7 + $0x10] sm:$0xff] %v1962_v0  }
 0x1d5   :  { %2592 = shalt.err (!%p2589_p6)
}
 0x1d6   :  { %s2593_s15 = scalar_lea.hbm %s3004_s3, 640 }
 0x1d7   :  { %p2594_p7 = scmp.ne.s32.totalorder %s3004_s3, %s2593_s15  ;;  %p2597_p8 = scmp.lt.u32.totalorder %s2593_s15, %s3004_s3 }
 0x1d9   :  { %p2599_p9 = pnand %p2597_p8, %p2594_p7 }
 0x1db   :  { %2602 = shalt.err (!%p2599_p9)
}
 0x1dc   :  { %1826 = dma.vmem_to_hbm [thread:$0]  %s1821_s11, 640, %s3004_s3, [#allocation4], %s2610_s22, %s2610_s22, %s2611_s23  }
 0x1dd   :  { %2607 = dma.done.wait [#allocation4], 640  }
 0x1de   :  { %2608 = vsyncadd [#allocation4], 4294966656 }
 0x1df   :  { %1830 = vsyncpa [#allocation3], 1 }
 0x1e0   :  { %1831 = vsyncpa [#allocation6], 1 }
 0x1e1   :  { %1832 = vsyncpa [#allocation4], 1 }

// kernel: conv_bn_act.1
= control target key start
LH: loop header
LB: loop body
LE: loop exit
PB: predicated region body
PF: predicated region fallthrough
CT: control target
= control target key end

     0   :  { %8 = vsyncpa [#allocation4], 0  ;;  %s5115_s0 = inlined_call_operand.vmem [shape: bf16[2048,256], index: 0, kind: input, shape index: {}]   ;;  %s5116_s1 = inlined_call_operand.vmem [shape: bf16[256,128], index: 1, kind: input, shape index: {}]   ;;  %s5117_s2 = inlined_call_operand.vmem [shape: f32[1,128], index: 2, kind: input, shape index: {}]   ;;  %s5118_s3 = inlined_call_operand.hbm [shape: bf16[2048,128], index: 3, kind: output, shape index: {}]  }
   0x1   :  { %10 = vsyncpa [#allocation4 + $0x1], 0  ;;  %s4582_s12 = smov 0   ;;  %s4584_s13 = smov 0  }
   0x2   :  { %s4586_s14 = smov 0   ;;  %s4588_s15 = smov 0  }
   0x3   :  { %s4590_s16 = smov 0   ;;  %s4592_s17 = smov 0  }
   0x4 LB: > { %s3377_s18 = sadd.s32 4294967295, %s4556_s17   ;;  %s3378_s19 = sadd.s32 4294967294, %s4556_s17   ;;  %s4556_s17 = sphi %s4592_s17, %s16_s17   ;;  %s4552_s16 = sphi %s4590_s16, %s5125_s16   ;;  %s4548_s15 = sphi %s4588_s15, %s5124_s15   ;;  %s4544_s14 = sphi %s4586_s14, %s5123_s14   ;;  %s4540_s13 = sphi %s4584_s13, %s5122_s13   ;;  %s4536_s12 = sphi %s4582_s12, %s5121_s12  }
   0x5   : > { %s35_s20 = sadd.s32 1, %s4552_s16  ;;  %s126_s21 = sadd.s32 1, %s4544_s14 }
   0x6   : > { %p37_p0 = scmp.ge.s32.totalorder %s35_s20, 2  ;;  %p136_p1 = scmp.ne.s32.totalorder %s4544_s14, %s4540_s13 }
   0x7   : > { %p137_p2 = scmp.eq.s32.totalorder %s3377_s18, 1  ;;  %p142_p3 = scmp.ne.s32.totalorder %s4540_s13, %s4536_s12 }
   0x8   : > { %s5127_s20 = smov (%p37_p0, %s35_s20), 0  ;;  %p143_p5 = scmp.eq.s32.totalorder %s3378_s19, 1 }
   0x9   : > { %p4622_p4 = por %p137_p2, %p136_p1  ;;  %s121_s23 = ssub.s32 %s4552_s16, %s5127_s20 }
   0xa   : > { %p3383_p6 = scmp.ge.s32.totalorder %s4556_s17, 1  ;;  %p124_p7 = scmp.eq.s32.totalorder %s121_s23, 0 }
   0xb   : > { %p4629_p8 = por %p143_p5, %p142_p3  ;;  %p194_p9 = scmp.lt.s32.totalorder %s4556_s17, 3 }
   0xc   : > { %s4635_s25 = scalar_select %p124_p7, %s4544_s14, %s126_s21  }
   0xd   : > { %p195_p10 = pnand %p3383_p6, %p194_p9 }
   0xe   : > { %v4269_v0 = vld [vmem:[%s5116_s1] sm:$0xff] (!%p195_p10)   ;;  %v4558_v1 = vmov (!%p195_p10), 0   ;;  %s3385_s28 = sshll.u32 (!%p195_p10), %s4548_s15, 7  ;;  %v4270_v2 = vld [vmem:[%s5116_s1 + $0x8] sm:$0xff] (!%p195_p10)   ;;  %v4271_v3 = vld [vmem:[%s5116_s1 + $0x10] sm:$0xff] (!%p195_p10)   ;;  %s231_s5 = sand.u32 (!%p195_p10), 1, %s4540_s13  }
   0xf   : > { %198 = sbr.rel (%p195_p10) target bundleno = 562 (0x232), region = 32  ;;  %1416 = vmatprep.subr.bf16.mxu0 (!%p195_p10), %v4558_v1  ;;  %4179 = vmatprep.subr.bf16.mxu1 (!%p195_p10), %v4558_v1  ;;  %p236_p11 = scmp.lt.s32.totalorder (!%p195_p10), %s3385_s28, 255  ;;  %v4272_v4 = vld [vmem:[%s5116_s1 + $0x18] sm:$0xff] (!%p195_p10)   ;;  %v4273_v5 = vld [vmem:[%s5116_s1 + $0x20] sm:$0xff] (!%p195_p10)   ;;  %v4274_v7 = vld [vmem:[%s5116_s1 + $0x28] sm:$0xff] (!%p195_p10)  }
  0x10   : > { %1417 = vmatpush1.bf16.msra.mxu0 (!%p195_p10), %v4269_v0  ;;  %4195 = vmatpush1.bf16.msra.mxu1 (!%p195_p10), %v4269_v0  ;;  %v4275_v9 = vld [vmem:[%s5116_s1 + $0x30] sm:$0xff] (!%p195_p10)   ;;  %v4276_v10 = vld [vmem:[%s5116_s1 + $0x38] sm:$0xff] (!%p195_p10)   ;;  %v4277_v11 = vld [vmem:[%s5116_s1 + $0x40] sm:$0xff] (!%p195_p10)   ;;  %s3384_s6 = sshll.u32 (!%p195_p10), %s231_s5, 9  ;;  %s3795_s9 = sshll.u32 (!%p195_p10), %s4548_s15, 13 }
  0x11   : > { %1418 = vmatprep.subr.bf16.mxu0 (!%p195_p10), %v4558_v1  ;;  %4180 = vmatprep.subr.bf16.mxu1 (!%p195_p10), %v4558_v1  ;;  %v4278_v12 = vld [vmem:[%s5116_s1 + $0x48] sm:$0xff] (!%p195_p10)   ;;  %v4279_v13 = vld [vmem:[%s5116_s1 + $0x50] sm:$0xff] (!%p195_p10)   ;;  %v4280_v14 = vld [vmem:[%s5116_s1 + $0x58] sm:$0xff] (!%p195_p10)   ;;  %s4849_s7 = scalar_lea.vmem (!%p195_p10), [#allocation3], %s3384_s6  ;;  %s5061_s21 = scalar_lea.hbm (!%p195_p10), %s5118_s3, %s3795_s9 }
  0x12   : > { %v4281_v15 = vld [vmem:[%s5116_s1 + $0x60] sm:$0xff] (!%p195_p10)   ;;  %v4282_v16 = vld [vmem:[%s5116_s1 + $0x68] sm:$0xff] (!%p195_p10)   ;;  %v4283_v17 = vld [vmem:[%s5116_s1 + $0x70] sm:$0xff] (!%p195_p10)   ;;  %s3266_s10 = sshll.u32 (!%p195_p10), %s4849_s7, 4  ;;  %s5069_s15 = scalar_lea.sflag (!%p195_p10), [#allocation4], %s231_s5  ;;  %s5063_s10 = int_to_ptr.vmem [resolvable:$true] %s3266_s10 }
  0x13   : > { %v4284_v18 = vld [vmem:[%s5116_s1 + $0x78] sm:$0xff] (!%p195_p10)   ;;  %s4478_s23 = scalar_lea.vmem (!%p195_p10), %s5063_s10, 8192  ;;  %s4559_s26 = smov (!%p195_p10), [#allocation3]  }
  0x14   : > { %1419 = vmatpush1.bf16.msra.mxu0 (!%p195_p10), %v4270_v2  ;;  %4196 = vmatpush1.bf16.msra.mxu1 (!%p195_p10), %v4270_v2  ;;  %p4479_p12 = scmp.ne.s32.totalorder (!%p195_p10), %s5063_s10, %s4478_s23  ;;  %s4482_s27 = sshll.u32 (!%p195_p10), %s4559_s26, 4  ;;  %s4483_s27 = int_to_ptr.vmem [resolvable:$false] %s4482_s27 }
  0x15   : > { %1420 = vmatprep.subr.bf16.mxu0 (!%p195_p10), %v4558_v1  ;;  %4181 = vmatprep.subr.bf16.mxu1 (!%p195_p10), %v4558_v1  ;;  %p4485_p1 = scmp.lt.s32.totalorder (!%p195_p10), %s5063_s10, %s4483_s27 }
  0x16   : > { %s5129_s28 = smov (!%p236_p11, %s3385_s28), 255  ;;  %p4480_p13 = pnand %p4479_p12, %p4622_p4 }
  0x17   : > { %s3666_s8 = sshll.u32 %s5129_s28, 3  ;;  %s4484_s28 = scalar_lea.vmem %s4483_s27, 16384 }
  0x18   : > { %1421 = vmatpush1.bf16.msra.mxu0 %v4271_v3  ;;  %4197 = vmatpush1.bf16.msra.mxu1 %v4271_v3  ;;  %s4664_s19 = scalar_lea.vmem %s5115_s0, %s3666_s8  ;;  %p4481_p0 = pneg %p4480_p13 }
  0x19   : > { %1422 = vmatprep.subr.bf16.mxu0 %v4558_v1  ;;  %4182 = vmatprep.subr.bf16.mxu1 %v4558_v1  ;;  %v4287_v6 = vld [vmem:[%s4664_s19 + $0x4] ss:$8 sps:$4 sm:$0xff]   ;;  %v4285_v19 = vld [vmem:[%s4664_s19] ss:$8 sps:$4 sm:$0xff]   ;;  %v4291_v21 = vld [vmem:[%s4664_s19 + $0x14] ss:$8 sps:$4 sm:$0xff]   ;;  %p4486_p2 = scmp.lt.s32.totalorder %s4484_s28, %s4478_s23 }
  0x1a   : > { %v4290_v8 = vld [vmem:[%s4664_s19 + $0x204] ss:$8 sps:$4 sm:$0xff]   ;;  %1448 = vmatprep.mubr.bf16.mxu0 %v4287_v6  ;;  %v4288_v20 = vld [vmem:[%s4664_s19 + $0x200] ss:$8 sps:$4 sm:$0xff]   ;;  %v4293_v22 = vld [vmem:[%s4664_s19 + $0x214] ss:$8 sps:$4 sm:$0xff]  }
  0x1b   : > { %1704 = vmatprep.mubr.bf16.mxu1 %v4290_v8  ;;  %v4295_v23 = vld [vmem:[%s4664_s19 + $0x10] ss:$8 sps:$4 sm:$0xff]   ;;  %v4297_v25 = vld [vmem:[%s4664_s19 + $0x24] ss:$8 sps:$4 sm:$0xff]   ;;  %v4301_v27 = vld [vmem:[%s4664_s19 + $0x20] ss:$8 sps:$4 sm:$0xff]   ;;  %p4487_p3 = por %p4486_p2, %p4485_p1 }
  0x1c   : > { %1423 = vmatpush1.bf16.msra.mxu0 %v4272_v4  ;;  %4198 = vmatpush1.bf16.msra.mxu1 %v4272_v4  ;;  %v4296_v24 = vld [vmem:[%s4664_s19 + $0x210] ss:$8 sps:$4 sm:$0xff]   ;;  %v4299_v26 = vld [vmem:[%s4664_s19 + $0x224] ss:$8 sps:$4 sm:$0xff]   ;;  %v4302_v28 = vld [vmem:[%s4664_s19 + $0x220] ss:$8 sps:$4 sm:$0xff]  }
  0x1d   : > { %1424 = vmatprep.subr.bf16.mxu0 %v4558_v1  ;;  %4183 = vmatprep.subr.bf16.mxu1 %v4558_v1  ;;  %v4303_v29 = vld [vmem:[%s4664_s19 + $0x34] ss:$8 sps:$4 sm:$0xff]   ;;  %v4307_v31 = vld [vmem:[%s4664_s19 + $0x30] ss:$8 sps:$4 sm:$0xff]   ;;  %v4309_v33 = vld [vmem:[%s4664_s19 + $0x44] ss:$8 sps:$4 sm:$0xff]   ;;  %p4488_p5 = pnand %p4487_p3, %p4481_p0 }
  0x1e   : > { %v4305_v30 = vld [vmem:[%s4664_s19 + $0x234] ss:$8 sps:$4 sm:$0xff]   ;;  %v4308_v32 = vld [vmem:[%s4664_s19 + $0x230] ss:$8 sps:$4 sm:$0xff]   ;;  %v4311_v34 = vld [vmem:[%s4664_s19 + $0x244] ss:$8 sps:$4 sm:$0xff]  }
  0x1f   : > { %v4313_v35 = vld [vmem:[%s4664_s19 + $0x40] ss:$8 sps:$4 sm:$0xff]   ;;  %v4315_v37 = vld [vmem:[%s4664_s19 + $0x54] ss:$8 sps:$4 sm:$0xff]   ;;  %v4319_v39 = vld [vmem:[%s4664_s19 + $0x50] ss:$8 sps:$4 sm:$0xff]  }
  0x20   : > { %1425 = vmatpush1.bf16.msra.mxu0 %v4273_v5  ;;  %4199 = vmatpush1.bf16.msra.mxu1 %v4273_v5  ;;  %v4314_v36 = vld [vmem:[%s4664_s19 + $0x240] ss:$8 sps:$4 sm:$0xff]   ;;  %v4317_v38 = vld [vmem:[%s4664_s19 + $0x254] ss:$8 sps:$4 sm:$0xff]   ;;  %v4320_v40 = vld [vmem:[%s4664_s19 + $0x250] ss:$8 sps:$4 sm:$0xff]  }
  0x21   : > { %1426 = vmatprep.subr.bf16.mxu0 %v4558_v1  ;;  %4184 = vmatprep.subr.bf16.mxu1 %v4558_v1  ;;  %v4321_v41 = vld [vmem:[%s4664_s19 + $0x64] ss:$8 sps:$4 sm:$0xff]   ;;  %v4325_v43 = vld [vmem:[%s4664_s19 + $0x60] ss:$8 sps:$4 sm:$0xff]   ;;  %v4327_v45 = vld [vmem:[%s4664_s19 + $0x74] ss:$8 sps:$4 sm:$0xff]  }
  0x22   : > { %v4323_v42 = vld [vmem:[%s4664_s19 + $0x264] ss:$8 sps:$4 sm:$0xff]   ;;  %v4326_v44 = vld [vmem:[%s4664_s19 + $0x260] ss:$8 sps:$4 sm:$0xff]   ;;  %v4329_v46 = vld [vmem:[%s4664_s19 + $0x274] ss:$8 sps:$4 sm:$0xff]  }
  0x23   : > { %v4331_v47 = vld [vmem:[%s4664_s19 + $0x70] ss:$8 sps:$4 sm:$0xff]   ;;  %v4333_v49 = vld [vmem:[%s4664_s19 + $0x84] ss:$8 sps:$4 sm:$0xff]   ;;  %v4337_v51 = vld [vmem:[%s4664_s19 + $0x80] ss:$8 sps:$4 sm:$0xff]  }
  0x24   : > { %1427 = vmatpush1.bf16.msra.mxu0 %v4274_v7  ;;  %4200 = vmatpush1.bf16.msra.mxu1 %v4274_v7  ;;  %v4332_v48 = vld [vmem:[%s4664_s19 + $0x270] ss:$8 sps:$4 sm:$0xff]   ;;  %v4335_v50 = vld [vmem:[%s4664_s19 + $0x284] ss:$8 sps:$4 sm:$0xff]   ;;  %v4338_v52 = vld [vmem:[%s4664_s19 + $0x280] ss:$8 sps:$4 sm:$0xff]  }
  0x25   : > { %1428 = vmatprep.subr.bf16.mxu0 %v4558_v1  ;;  %4185 = vmatprep.subr.bf16.mxu1 %v4558_v1  ;;  %v4339_v53 = vld [vmem:[%s4664_s19 + $0x94] ss:$8 sps:$4 sm:$0xff]   ;;  %v4343_v55 = vld [vmem:[%s4664_s19 + $0x90] ss:$8 sps:$4 sm:$0xff]   ;;  %v4345_v57 = vld [vmem:[%s4664_s19 + $0xa4] ss:$8 sps:$4 sm:$0xff]  }
  0x26   : > { %v4341_v54 = vld [vmem:[%s4664_s19 + $0x294] ss:$8 sps:$4 sm:$0xff]   ;;  %v4344_v56 = vld [vmem:[%s4664_s19 + $0x290] ss:$8 sps:$4 sm:$0xff]   ;;  %v4347_v58 = vld [vmem:[%s4664_s19 + $0x2a4] ss:$8 sps:$4 sm:$0xff]  }
  0x27   : > { %v4349_v59 = vld [vmem:[%s4664_s19 + $0xa0] ss:$8 sps:$4 sm:$0xff]   ;;  %v4351_v61 = vld [vmem:[%s4664_s19 + $0xb4] ss:$8 sps:$4 sm:$0xff]   ;;  %v4355_v63 = vld [vmem:[%s4664_s19 + $0xb0] ss:$8 sps:$4 sm:$0xff]  }
  0x28   : > { %1429 = vmatpush1.bf16.msra.mxu0 %v4275_v9  ;;  %4201 = vmatpush1.bf16.msra.mxu1 %v4275_v9  ;;  %v4350_v60 = vld [vmem:[%s4664_s19 + $0x2a0] ss:$8 sps:$4 sm:$0xff]   ;;  %v4353_v62 = vld [vmem:[%s4664_s19 + $0x2b4] ss:$8 sps:$4 sm:$0xff]   ;;  %v4356_v0 = vld [vmem:[%s4664_s19 + $0x2b0] ss:$8 sps:$4 sm:$0xff]  }
  0x29   : > { %1430 = vmatprep.subr.bf16.mxu0 %v4558_v1  ;;  %4186 = vmatprep.subr.bf16.mxu1 %v4558_v1  ;;  %v4359_v2 = vld [vmem:[%s4664_s19 + $0x2c4] ss:$8 sps:$4 sm:$0xff]   ;;  %v4361_v3 = vld [vmem:[%s4664_s19 + $0xc0] ss:$8 sps:$4 sm:$0xff]   ;;  %v4363_v5 = vld [vmem:[%s4664_s19 + $0xd4] ss:$8 sps:$4 sm:$0xff]  }
  0x2a   : > { %v4362_v4 = vld [vmem:[%s4664_s19 + $0x2c0] ss:$8 sps:$4 sm:$0xff]   ;;  %v4365_v6 = vld [vmem:[%s4664_s19 + $0x2d4] ss:$8 sps:$4 sm:$0xff]   ;;  %v4367_v7 = vld [vmem:[%s4664_s19 + $0xd0] ss:$8 sps:$4 sm:$0xff]  }
  0x2b   : > { %v4368_v8 = vld [vmem:[%s4664_s19 + $0x2d0] ss:$8 sps:$4 sm:$0xff]   ;;  %v4369_v9 = vld [vmem:[%s4664_s19 + $0xe4] ss:$8 sps:$4 sm:$0xff]  }
  0x2c   : > { %1431 = vmatpush1.bf16.msra.mxu0 %v4276_v10  ;;  %4202 = vmatpush1.bf16.msra.mxu1 %v4276_v10  ;;  %v4371_v10 = vld [vmem:[%s4664_s19 + $0x2e4] ss:$8 sps:$4 sm:$0xff]  }
  0x2d   : > { %1432 = vmatprep.subr.bf16.mxu0 %v4558_v1  ;;  %4187 = vmatprep.subr.bf16.mxu1 %v4558_v1 }
  0x30   : > { %1433 = vmatpush1.bf16.msra.mxu0 %v4277_v11  ;;  %4203 = vmatpush1.bf16.msra.mxu1 %v4277_v11  ;;  %v4373_v11 = vld [vmem:[%s4664_s19 + $0xe0] ss:$8 sps:$4 sm:$0xff]  }
  0x31   : > { %1434 = vmatprep.subr.bf16.mxu0 %v4558_v1  ;;  %4188 = vmatprep.subr.bf16.mxu1 %v4558_v1 }
  0x34   : > { %1435 = vmatpush1.bf16.msra.mxu0 %v4278_v12  ;;  %4204 = vmatpush1.bf16.msra.mxu1 %v4278_v12  ;;  %v4374_v12 = vld [vmem:[%s4664_s19 + $0x2e0] ss:$8 sps:$4 sm:$0xff]  }
  0x35   : > { %1436 = vmatprep.subr.bf16.mxu0 %v4558_v1  ;;  %4189 = vmatprep.subr.bf16.mxu1 %v4558_v1 }
  0x38   : > { %1437 = vmatpush1.bf16.msra.mxu0 %v4279_v13  ;;  %4205 = vmatpush1.bf16.msra.mxu1 %v4279_v13  ;;  %v4375_v13 = vld [vmem:[%s4664_s19 + $0xf4] ss:$8 sps:$4 sm:$0xff]  }
  0x39   : > { %1438 = vmatprep.subr.bf16.mxu0 %v4558_v1  ;;  %4190 = vmatprep.subr.bf16.mxu1 %v4558_v1 }
  0x3c   : > { %1439 = vmatpush1.bf16.msra.mxu0 %v4280_v14  ;;  %4206 = vmatpush1.bf16.msra.mxu1 %v4280_v14  ;;  %v4377_v14 = vld [vmem:[%s4664_s19 + $0x2f4] ss:$8 sps:$4 sm:$0xff]  }
  0x3d   : > { %1440 = vmatprep.subr.bf16.mxu0 %v4558_v1  ;;  %4191 = vmatprep.subr.bf16.mxu1 %v4558_v1 }
  0x40   : > { %1441 = vmatpush1.bf16.msra.mxu0 %v4281_v15  ;;  %4207 = vmatpush1.bf16.msra.mxu1 %v4281_v15  ;;  %v4379_v15 = vld [vmem:[%s4664_s19 + $0xf0] ss:$8 sps:$4 sm:$0xff]  }
  0x41   : > { %1442 = vmatprep.subr.bf16.mxu0 %v4558_v1  ;;  %4192 = vmatprep.subr.bf16.mxu1 %v4558_v1 }
  0x44   : > { %1443 = vmatpush1.bf16.msra.mxu0 %v4282_v16  ;;  %4208 = vmatpush1.bf16.msra.mxu1 %v4282_v16  ;;  %v4380_v16 = vld [vmem:[%s4664_s19 + $0x2f0] ss:$8 sps:$4 sm:$0xff]  }
  0x45   : > { %1444 = vmatprep.subr.bf16.mxu0 %v4558_v1  ;;  %4193 = vmatprep.subr.bf16.mxu1 %v4558_v1 }
  0x48   : > { %1445 = vmatpush1.bf16.msra.mxu0 %v4283_v17  ;;  %4209 = vmatpush1.bf16.msra.mxu1 %v4283_v17  ;;  %v4381_v17 = vld [vmem:[%s4664_s19 + $0x104] ss:$8 sps:$4 sm:$0xff]  }
  0x49   : > { %1446 = vmatprep.subr.bf16.mxu0 %v4558_v1  ;;  %4194 = vmatprep.subr.bf16.mxu1 %v4558_v1  ;;  %v4357_v1 = vld [vmem:[%s4664_s19 + $0xc4] ss:$8 sps:$4 sm:$0xff]  }
  0x4c   : > { %1447 = vmatpush1.bf16.msra.mxu0 %v4284_v18  ;;  %4210 = vmatpush1.bf16.msra.mxu1 %v4284_v18  ;;  %v4383_v18 = vld [vmem:[%s4664_s19 + $0x304] ss:$8 sps:$4 sm:$0xff]  }
  0x4f   : > { %1449 = vmatmul.mubr.bf16.vlgmr.msra.gmra.mrb[0].mxu0 %v4285_v19  ;;  %1705 = vmatmul.mubr.bf16.vlgmr.msra.gmra.mrb[0].mxu1 %v4288_v20  ;;  %v4385_v19 = vld [vmem:[%s4664_s19 + $0x100] ss:$8 sps:$4 sm:$0xff]  }
  0x50   : > { %1456 = vmatprep.mubr.bf16.mxu0 %v4291_v21  ;;  %1712 = vmatprep.mubr.bf16.mxu1 %v4293_v22  ;;  %v4386_v20 = vld [vmem:[%s4664_s19 + $0x300] ss:$8 sps:$4 sm:$0xff]   ;;  %v4387_v21 = vld [vmem:[%s4664_s19 + $0x114] ss:$8 sps:$4 sm:$0xff]  }
  0x51   : > { %v4389_v22 = vld [vmem:[%s4664_s19 + $0x314] ss:$8 sps:$4 sm:$0xff]  }
  0x57   : > { %1457 = vmatmul.mubr.bf16.gmra.mrb[4].mxu0 %v4295_v23  ;;  %1713 = vmatmul.mubr.bf16.gmra.mrb[4].mxu1 %v4296_v24  ;;  %v4391_v23 = vld [vmem:[%s4664_s19 + $0x110] ss:$8 sps:$4 sm:$0xff]  }
  0x58   : > { %1464 = vmatprep.mubr.bf16.mxu0 %v4297_v25  ;;  %1720 = vmatprep.mubr.bf16.mxu1 %v4299_v26  ;;  %v4392_v24 = vld [vmem:[%s4664_s19 + $0x310] ss:$8 sps:$4 sm:$0xff]   ;;  %v4393_v25 = vld [vmem:[%s4664_s19 + $0x124] ss:$8 sps:$4 sm:$0xff]  }
  0x59   : > { %v4395_v26 = vld [vmem:[%s4664_s19 + $0x324] ss:$8 sps:$4 sm:$0xff]  }
  0x5f   : > { %1465 = vmatmul.mubr.bf16.gmra.mrb[8].mxu0 %v4301_v27  ;;  %1721 = vmatmul.mubr.bf16.gmra.mrb[8].mxu1 %v4302_v28  ;;  %v4397_v27 = vld [vmem:[%s4664_s19 + $0x120] ss:$8 sps:$4 sm:$0xff]  }
  0x60   : > { %1472 = vmatprep.mubr.bf16.mxu0 %v4303_v29  ;;  %1728 = vmatprep.mubr.bf16.mxu1 %v4305_v30  ;;  %v4398_v28 = vld [vmem:[%s4664_s19 + $0x320] ss:$8 sps:$4 sm:$0xff]   ;;  %v4399_v29 = vld [vmem:[%s4664_s19 + $0x134] ss:$8 sps:$4 sm:$0xff]  }
  0x61   : > { %v4401_v30 = vld [vmem:[%s4664_s19 + $0x334] ss:$8 sps:$4 sm:$0xff]  }
  0x67   : > { %1473 = vmatmul.mubr.bf16.gmra.mrb[12].mxu0 %v4307_v31  ;;  %1729 = vmatmul.mubr.bf16.gmra.mrb[12].mxu1 %v4308_v32  ;;  %v4403_v31 = vld [vmem:[%s4664_s19 + $0x130] ss:$8 sps:$4 sm:$0xff]  }
  0x68   : > { %1480 = vmatprep.mubr.bf16.mxu0 %v4309_v33  ;;  %1736 = vmatprep.mubr.bf16.mxu1 %v4311_v34  ;;  %v4404_v32 = vld [vmem:[%s4664_s19 + $0x330] ss:$8 sps:$4 sm:$0xff]   ;;  %v4405_v33 = vld [vmem:[%s4664_s19 + $0x144] ss:$8 sps:$4 sm:$0xff]  }
  0x69   : > { %v4407_v34 = vld [vmem:[%s4664_s19 + $0x344] ss:$8 sps:$4 sm:$0xff]  }
  0x6f   : > { %1481 = vmatmul.mubr.bf16.gmra.mrb[16].mxu0 %v4313_v35  ;;  %1737 = vmatmul.mubr.bf16.gmra.mrb[16].mxu1 %v4314_v36  ;;  %v4409_v35 = vld [vmem:[%s4664_s19 + $0x140] ss:$8 sps:$4 sm:$0xff]  }
  0x70   : > { %1488 = vmatprep.mubr.bf16.mxu0 %v4315_v37  ;;  %1744 = vmatprep.mubr.bf16.mxu1 %v4317_v38  ;;  %v4410_v36 = vld [vmem:[%s4664_s19 + $0x340] ss:$8 sps:$4 sm:$0xff]   ;;  %v4411_v37 = vld [vmem:[%s4664_s19 + $0x154] ss:$8 sps:$4 sm:$0xff]  }
  0x71   : > { %v4413_v38 = vld [vmem:[%s4664_s19 + $0x354] ss:$8 sps:$4 sm:$0xff]  }
  0x77   : > { %1489 = vmatmul.mubr.bf16.gmra.mrb[20].mxu0 %v4319_v39  ;;  %1745 = vmatmul.mubr.bf16.gmra.mrb[20].mxu1 %v4320_v40  ;;  %v4415_v39 = vld [vmem:[%s4664_s19 + $0x150] ss:$8 sps:$4 sm:$0xff]  }
  0x78   : > { %1496 = vmatprep.mubr.bf16.mxu0 %v4321_v41  ;;  %1752 = vmatprep.mubr.bf16.mxu1 %v4323_v42  ;;  %v4416_v40 = vld [vmem:[%s4664_s19 + $0x350] ss:$8 sps:$4 sm:$0xff]   ;;  %v4417_v41 = vld [vmem:[%s4664_s19 + $0x164] ss:$8 sps:$4 sm:$0xff]  }
  0x79   : > { %v4419_v42 = vld [vmem:[%s4664_s19 + $0x364] ss:$8 sps:$4 sm:$0xff]  }
  0x7f   : > { %1497 = vmatmul.mubr.bf16.gmra.mrb[24].mxu0 %v4325_v43  ;;  %1753 = vmatmul.mubr.bf16.gmra.mrb[24].mxu1 %v4326_v44  ;;  %v4421_v43 = vld [vmem:[%s4664_s19 + $0x160] ss:$8 sps:$4 sm:$0xff]  }
  0x80   : > { %1504 = vmatprep.mubr.bf16.mxu0 %v4327_v45  ;;  %1760 = vmatprep.mubr.bf16.mxu1 %v4329_v46  ;;  %v4422_v44 = vld [vmem:[%s4664_s19 + $0x360] ss:$8 sps:$4 sm:$0xff]   ;;  %v4423_v45 = vld [vmem:[%s4664_s19 + $0x174] ss:$8 sps:$4 sm:$0xff]  }
  0x81   : > { %v4425_v46 = vld [vmem:[%s4664_s19 + $0x374] ss:$8 sps:$4 sm:$0xff]  }
  0x87   : > { %1505 = vmatmul.mubr.bf16.gmra.mrb[28].mxu0 %v4331_v47  ;;  %1761 = vmatmul.mubr.bf16.gmra.mrb[28].mxu1 %v4332_v48  ;;  %v4427_v47 = vld [vmem:[%s4664_s19 + $0x170] ss:$8 sps:$4 sm:$0xff]  }
  0x88   : > { %1512 = vmatprep.mubr.bf16.mxu0 %v4333_v49  ;;  %1768 = vmatprep.mubr.bf16.mxu1 %v4335_v50  ;;  %v4428_v48 = vld [vmem:[%s4664_s19 + $0x370] ss:$8 sps:$4 sm:$0xff]   ;;  %v4429_v49 = vld [vmem:[%s4664_s19 + $0x184] ss:$8 sps:$4 sm:$0xff]  }
  0x89   : > { %v4431_v50 = vld [vmem:[%s4664_s19 + $0x384] ss:$8 sps:$4 sm:$0xff]  }
  0x8f   : > { %1513 = vmatmul.mubr.bf16.gmra.mrb[32].mxu0 %v4337_v51  ;;  %1769 = vmatmul.mubr.bf16.gmra.mrb[32].mxu1 %v4338_v52  ;;  %v4433_v51 = vld [vmem:[%s4664_s19 + $0x180] ss:$8 sps:$4 sm:$0xff]  }
  0x90   : > { %1520 = vmatprep.mubr.bf16.mxu0 %v4339_v53  ;;  %1776 = vmatprep.mubr.bf16.mxu1 %v4341_v54  ;;  %v4434_v52 = vld [vmem:[%s4664_s19 + $0x380] ss:$8 sps:$4 sm:$0xff]   ;;  %v4435_v53 = vld [vmem:[%s4664_s19 + $0x194] ss:$8 sps:$4 sm:$0xff]  }
  0x91   : > { %v4437_v54 = vld [vmem:[%s4664_s19 + $0x394] ss:$8 sps:$4 sm:$0xff]  }
  0x97   : > { %1521 = vmatmul.mubr.bf16.gmra.mrb[36].mxu0 %v4343_v55  ;;  %1777 = vmatmul.mubr.bf16.gmra.mrb[36].mxu1 %v4344_v56  ;;  %v4439_v55 = vld [vmem:[%s4664_s19 + $0x190] ss:$8 sps:$4 sm:$0xff]  }
  0x98   : > { %1528 = vmatprep.mubr.bf16.mxu0 %v4345_v57  ;;  %1784 = vmatprep.mubr.bf16.mxu1 %v4347_v58  ;;  %v4440_v56 = vld [vmem:[%s4664_s19 + $0x390] ss:$8 sps:$4 sm:$0xff]   ;;  %v4441_v57 = vld [vmem:[%s4664_s19 + $0x1a4] ss:$8 sps:$4 sm:$0xff]  }
  0x99   : > { %v4443_v58 = vld [vmem:[%s4664_s19 + $0x3a4] ss:$8 sps:$4 sm:$0xff]  }
  0x9f   : > { %1529 = vmatmul.mubr.bf16.gmra.mrb[40].mxu0 %v4349_v59  ;;  %1785 = vmatmul.mubr.bf16.gmra.mrb[40].mxu1 %v4350_v60  ;;  %v4445_v59 = vld [vmem:[%s4664_s19 + $0x1a0] ss:$8 sps:$4 sm:$0xff]  }
  0xa0   : > { %1536 = vmatprep.mubr.bf16.mxu0 %v4351_v61  ;;  %1792 = vmatprep.mubr.bf16.mxu1 %v4353_v62  ;;  %v4446_v60 = vld [vmem:[%s4664_s19 + $0x3a0] ss:$8 sps:$4 sm:$0xff]   ;;  %v4447_v61 = vld [vmem:[%s4664_s19 + $0x1b4] ss:$8 sps:$4 sm:$0xff]  }
  0xa1   : > { %v4449_v62 = vld [vmem:[%s4664_s19 + $0x3b4] ss:$8 sps:$4 sm:$0xff]  }
  0xa7   : > { %1537 = vmatmul.mubr.bf16.gmra.mrb[44].mxu0 %v4355_v63  ;;  %1793 = vmatmul.mubr.bf16.gmra.mrb[44].mxu1 %v4356_v0  ;;  %v4836_v63 = vld [vmem:[%s5117_s2] ss:$0 sm:$0xff] }
  0xa8   : > { %1544 = vmatprep.mubr.bf16.mxu0 %v4357_v1  ;;  %1800 = vmatprep.mubr.bf16.mxu1 %v4359_v2 }
  0xaf   : > { %1545 = vmatmul.mubr.bf16.gmra.mrb[48].mxu0 %v4361_v3  ;;  %1801 = vmatmul.mubr.bf16.gmra.mrb[48].mxu1 %v4362_v4 }
  0xb0   : > { %1552 = vmatprep.mubr.bf16.mxu0 %v4363_v5  ;;  %1808 = vmatprep.mubr.bf16.mxu1 %v4365_v6  ;;  %v4451_v6 = vld [vmem:[%s4664_s19 + $0x1b0] ss:$8 sps:$4 sm:$0xff]  }
  0xb7   : > { %1553 = vmatmul.mubr.bf16.gmra.mrb[52].mxu0 %v4367_v7  ;;  %1809 = vmatmul.mubr.bf16.gmra.mrb[52].mxu1 %v4368_v8  ;;  %v4452_v7 = vld [vmem:[%s4664_s19 + $0x3b0] ss:$8 sps:$4 sm:$0xff]  }
  0xb8   : > { %1560 = vmatprep.mubr.bf16.mxu0 %v4369_v9  ;;  %1816 = vmatprep.mubr.bf16.mxu1 %v4371_v10  ;;  %v4453_v10 = vld [vmem:[%s4664_s19 + $0x1c4] ss:$8 sps:$4 sm:$0xff]  }
  0xbf   : > { %1561 = vmatmul.mubr.bf16.gmra.mrb[56].mxu0 %v4373_v11  ;;  %1817 = vmatmul.mubr.bf16.gmra.mrb[56].mxu1 %v4374_v12  ;;  %v4455_v11 = vld [vmem:[%s4664_s19 + $0x3c4] ss:$8 sps:$4 sm:$0xff]  }
  0xc0   : > { %1568 = vmatprep.mubr.bf16.mxu0 %v4375_v13  ;;  %1824 = vmatprep.mubr.bf16.mxu1 %v4377_v14 }
  0xc7   : > { %1569 = vmatmul.mubr.bf16.gmra.mrb[60].mxu0 %v4379_v15  ;;  %1825 = vmatmul.mubr.bf16.gmra.mrb[60].mxu1 %v4380_v16 }
  0xc8   : > { %1576 = vmatprep.mubr.bf16.mxu0 %v4381_v17  ;;  %1832 = vmatprep.mubr.bf16.mxu1 %v4383_v18 }
  0xcf   : > { %1577 = vmatmul.mubr.bf16.gmra.mrb[64].mxu0 %v4385_v19  ;;  %1833 = vmatmul.mubr.bf16.gmra.mrb[64].mxu1 %v4386_v20 }
  0xd0   : > { %1584 = vmatprep.mubr.bf16.mxu0 %v4387_v21  ;;  %1840 = vmatprep.mubr.bf16.mxu1 %v4389_v22 }
  0xd7   : > { %1585 = vmatmul.mubr.bf16.gmra.mrb[68].mxu0 %v4391_v23  ;;  %1841 = vmatmul.mubr.bf16.gmra.mrb[68].mxu1 %v4392_v24 }
  0xd8   : > { %1592 = vmatprep.mubr.bf16.mxu0 %v4393_v25  ;;  %1848 = vmatprep.mubr.bf16.mxu1 %v4395_v26 }
  0xdf   : > { %1593 = vmatmul.mubr.bf16.gmra.mrb[72].mxu0 %v4397_v27  ;;  %1849 = vmatmul.mubr.bf16.gmra.mrb[72].mxu1 %v4398_v28  ;;  %v4457_v28 = vld [vmem:[%s4664_s19 + $0x1c0] ss:$8 sps:$4 sm:$0xff]  }
  0xe0   : > { %1600 = vmatprep.mubr.bf16.mxu0 %v4399_v29  ;;  %1856 = vmatprep.mubr.bf16.mxu1 %v4401_v30  ;;  %v4458_v29 = vld [vmem:[%s4664_s19 + $0x3c0] ss:$8 sps:$4 sm:$0xff]  }
  0xe7   : > { %1601 = vmatmul.mubr.bf16.gmra.mrb[76].mxu0 %v4403_v31  ;;  %1857 = vmatmul.mubr.bf16.gmra.mrb[76].mxu1 %v4404_v32  ;;  %v4459_v32 = vld [vmem:[%s4664_s19 + $0x1d4] ss:$8 sps:$4 sm:$0xff]  }
  0xe8   : > { %1608 = vmatprep.mubr.bf16.mxu0 %v4405_v33  ;;  %1864 = vmatprep.mubr.bf16.mxu1 %v4407_v34  ;;  %v4461_v33 = vld [vmem:[%s4664_s19 + $0x3d4] ss:$8 sps:$4 sm:$0xff]  }
  0xef   : > { %1609 = vmatmul.mubr.bf16.gmra.mrb[80].mxu0 %v4409_v35  ;;  %1865 = vmatmul.mubr.bf16.gmra.mrb[80].mxu1 %v4410_v36 }
  0xf0   : > { %1616 = vmatprep.mubr.bf16.mxu0 %v4411_v37  ;;  %1872 = vmatprep.mubr.bf16.mxu1 %v4413_v38 }
  0xf7   : > { %1617 = vmatmul.mubr.bf16.gmra.mrb[84].mxu0 %v4415_v39  ;;  %1873 = vmatmul.mubr.bf16.gmra.mrb[84].mxu1 %v4416_v40 }
  0xf8   : > { %1624 = vmatprep.mubr.bf16.mxu0 %v4417_v41  ;;  %1880 = vmatprep.mubr.bf16.mxu1 %v4419_v42 }
  0xff   : > { %1625 = vmatmul.mubr.bf16.gmra.mrb[88].mxu0 %v4421_v43  ;;  %1881 = vmatmul.mubr.bf16.gmra.mrb[88].mxu1 %v4422_v44 }
 0x100   : > { %1632 = vmatprep.mubr.bf16.mxu0 %v4423_v45  ;;  %1888 = vmatprep.mubr.bf16.mxu1 %v4425_v46 }
 0x107   : > { %1633 = vmatmul.mubr.bf16.gmra.mrb[92].mxu0 %v4427_v47  ;;  %1889 = vmatmul.mubr.bf16.gmra.mrb[92].mxu1 %v4428_v48 }
 0x108   : > { %1640 = vmatprep.mubr.bf16.mxu0 %v4429_v49  ;;  %1896 = vmatprep.mubr.bf16.mxu1 %v4431_v50  ;;  %v4463_v50 = vld [vmem:[%s4664_s19 + $0x1d0] ss:$8 sps:$4 sm:$0xff]  }
 0x10f   : > { %1641 = vmatmul.mubr.bf16.gmra.mrb[96].mxu0 %v4433_v51  ;;  %1897 = vmatmul.mubr.bf16.gmra.mrb[96].mxu1 %v4434_v52  ;;  %v4464_v51 = vld [vmem:[%s4664_s19 + $0x3d0] ss:$8 sps:$4 sm:$0xff]  }
 0x110   : > { %1648 = vmatprep.mubr.bf16.mxu0 %v4435_v53  ;;  %1904 = vmatprep.mubr.bf16.mxu1 %v4437_v54  ;;  %v4465_v54 = vld [vmem:[%s4664_s19 + $0x1e4] ss:$8 sps:$4 sm:$0xff]  }
 0x117   : > { %1649 = vmatmul.mubr.bf16.gmra.mrb[100].mxu0 %v4439_v55  ;;  %1905 = vmatmul.mubr.bf16.gmra.mrb[100].mxu1 %v4440_v56  ;;  %v4467_v55 = vld [vmem:[%s4664_s19 + $0x3e4] ss:$8 sps:$4 sm:$0xff]  }
 0x118   : > { %1656 = vmatprep.mubr.bf16.mxu0 %v4441_v57  ;;  %1912 = vmatprep.mubr.bf16.mxu1 %v4443_v58 }
 0x11f   : > { %1657 = vmatmul.mubr.bf16.gmra.mrb[104].mxu0 %v4445_v59  ;;  %1913 = vmatmul.mubr.bf16.gmra.mrb[104].mxu1 %v4446_v60 }
 0x120   : > { %1664 = vmatprep.mubr.bf16.mxu0 %v4447_v61  ;;  %1920 = vmatprep.mubr.bf16.mxu1 %v4449_v62 }
 0x122   : > { %v1450_v0 = vpop.f32.mrb[0].mxu0  ;;  %v1706_v1 = vpop.f32.mrb[0].mxu1 }
 0x123   : > { %v2355_v2 = vadd.f32 %v4836_v63, %v1450_v0  ;;  %v2419_v3 = vadd.f32 %v4836_v63, %v1706_v1  ;;  %v1452_v4 = vpop.f32.mrb[1].mxu0  ;;  %v1708_v5 = vpop.f32.mrb[1].mxu1 }
 0x124   : > { %v1453_v8 = vpop.f32.mrb[2].mxu0  ;;  %v1709_v9 = vpop.f32.mrb[2].mxu1 }
 0x125   : > { %v2356_v12 = vadd.f32 %v4836_v63, %v1453_v8  ;;  %v2420_v13 = vadd.f32 %v4836_v63, %v1709_v9  ;;  %v1455_v14 = vpop.f32.mrb[3].mxu0  ;;  %v1711_v15 = vpop.f32.mrb[3].mxu1  ;;  %v2483_v16 = vmax.f32 %v2355_v2, 0.0  ;;  %v2547_v17 = vmax.f32 %v2419_v3, 0.0  ;;  %v4469_v9 = vld [vmem:[%s4664_s19 + $0x1e0] ss:$8 sps:$4 sm:$0xff]  }
 0x126   : > { %v4473_v14 = vld [vmem:[%s4664_s19 + $0x3f4] ss:$8 sps:$4 sm:$0xff]  }
 0x127   : > { %v2484_v18 = vmax.f32 %v2356_v12, 0.0  ;;  %v2548_v19 = vmax.f32 %v2420_v13, 0.0  ;;  %1665 = vmatmul.mubr.bf16.gmra.mrb[108].mxu0 %v4451_v6  ;;  %1921 = vmatmul.mubr.bf16.gmra.mrb[108].mxu1 %v4452_v7  ;;  %v4471_v13 = vld [vmem:[%s4664_s19 + $0x1f4] ss:$8 sps:$4 sm:$0xff]  }
 0x128   : > { %1672 = vmatprep.mubr.bf16.mxu0 %v4453_v10  ;;  %1928 = vmatprep.mubr.bf16.mxu1 %v4455_v11  ;;  %v4470_v10 = vld [vmem:[%s4664_s19 + $0x3e0] ss:$8 sps:$4 sm:$0xff]  }
 0x129   : > { %v3799_v20 = vpack.c.bf16 %v2484_v18, %v2483_v16  ;;  %v3959_v21 = vpack.c.bf16 %v2548_v19, %v2547_v17 }
 0x12a   : > { %v1458_v22 = vpop.f32.mrb[4].mxu0  ;;  %v1714_v23 = vpop.f32.mrb[4].mxu1 }
 0x12b   : > { %3800 = vst [vmem:[%s4849_s7] sm:$0xff] %v3799_v20   ;;  %4147 = vst [vmem:[%s4849_s7 + $0x100] sm:$0xff] %v3959_v21   ;;  %v2357_v24 = vadd.f32 %v4836_v63, %v1458_v22  ;;  %v2421_v25 = vadd.f32 %v4836_v63, %v1714_v23  ;;  %v1460_v26 = vpop.f32.mrb[5].mxu0  ;;  %v1716_v27 = vpop.f32.mrb[5].mxu1 }
 0x12c   : > { %v1461_v30 = vpop.f32.mrb[6].mxu0  ;;  %v1717_v31 = vpop.f32.mrb[6].mxu1 }
 0x12d   : > { %v2358_v34 = vadd.f32 %v4836_v63, %v1461_v30  ;;  %v2422_v35 = vadd.f32 %v4836_v63, %v1717_v31  ;;  %v1463_v36 = vpop.f32.mrb[7].mxu0  ;;  %v1719_v37 = vpop.f32.mrb[7].mxu1  ;;  %v2485_v38 = vmax.f32 %v2357_v24, 0.0  ;;  %v2549_v39 = vmax.f32 %v2421_v25, 0.0  ;;  %v4475_v31 = vld [vmem:[%s4664_s19 + $0x1f0] ss:$8 sps:$4 sm:$0xff]  }
 0x12f   : > { %v2486_v40 = vmax.f32 %v2358_v34, 0.0  ;;  %v2550_v41 = vmax.f32 %v2422_v35, 0.0  ;;  %1673 = vmatmul.mubr.bf16.gmra.mrb[112].mxu0 %v4457_v28  ;;  %1929 = vmatmul.mubr.bf16.gmra.mrb[112].mxu1 %v4458_v29 }
 0x130   : > { %1680 = vmatprep.mubr.bf16.mxu0 %v4459_v32  ;;  %1936 = vmatprep.mubr.bf16.mxu1 %v4461_v33  ;;  %v4476_v32 = vld [vmem:[%s4664_s19 + $0x3f0] ss:$8 sps:$4 sm:$0xff]  }
 0x131   : > { %v3804_v42 = vpack.c.bf16 %v2486_v40, %v2485_v38  ;;  %v3964_v43 = vpack.c.bf16 %v2550_v41, %v2549_v39 }
 0x132   : > { %v1466_v44 = vpop.f32.mrb[8].mxu0  ;;  %v1722_v45 = vpop.f32.mrb[8].mxu1 }
 0x133   : > { %4116 = vst [vmem:[%s4849_s7 + $0x8] sm:$0xff] %v3804_v42   ;;  %4148 = vst [vmem:[%s4849_s7 + $0x108] sm:$0xff] %v3964_v43   ;;  %v2359_v46 = vadd.f32 %v4836_v63, %v1466_v44  ;;  %v2423_v47 = vadd.f32 %v4836_v63, %v1722_v45  ;;  %v1468_v48 = vpop.f32.mrb[9].mxu0  ;;  %v1724_v49 = vpop.f32.mrb[9].mxu1 }
 0x134   : > { %v1469_v52 = vpop.f32.mrb[10].mxu0  ;;  %v1725_v53 = vpop.f32.mrb[10].mxu1 }
 0x135   : > { %v2360_v56 = vadd.f32 %v4836_v63, %v1469_v52  ;;  %v2424_v57 = vadd.f32 %v4836_v63, %v1725_v53  ;;  %v1471_v58 = vpop.f32.mrb[11].mxu0  ;;  %v1727_v59 = vpop.f32.mrb[11].mxu1  ;;  %v2487_v60 = vmax.f32 %v2359_v46, 0.0  ;;  %v2551_v61 = vmax.f32 %v2423_v47, 0.0 }
 0x137   : > { %v2488_v62 = vmax.f32 %v2360_v56, 0.0  ;;  %v2552_v0 = vmax.f32 %v2424_v57, 0.0  ;;  %1681 = vmatmul.mubr.bf16.gmra.mrb[116].mxu0 %v4463_v50  ;;  %1937 = vmatmul.mubr.bf16.gmra.mrb[116].mxu1 %v4464_v51 }
 0x138   : > { %1688 = vmatprep.mubr.bf16.mxu0 %v4465_v54  ;;  %1944 = vmatprep.mubr.bf16.mxu1 %v4467_v55 }
 0x139   : > { %v3809_v1 = vpack.c.bf16 %v2488_v62, %v2487_v60  ;;  %v3969_v2 = vpack.c.bf16 %v2552_v0, %v2551_v61 }
 0x13a   : > { %v1474_v3 = vpop.f32.mrb[12].mxu0  ;;  %v1730_v4 = vpop.f32.mrb[12].mxu1 }
 0x13b   : > { %4117 = vst [vmem:[%s4849_s7 + $0x10] sm:$0xff] %v3809_v1   ;;  %4149 = vst [vmem:[%s4849_s7 + $0x110] sm:$0xff] %v3969_v2   ;;  %v2361_v5 = vadd.f32 %v4836_v63, %v1474_v3  ;;  %v2425_v6 = vadd.f32 %v4836_v63, %v1730_v4  ;;  %v1476_v7 = vpop.f32.mrb[13].mxu0  ;;  %v1732_v8 = vpop.f32.mrb[13].mxu1 }
 0x13c   : > { %v1477_v11 = vpop.f32.mrb[14].mxu0  ;;  %v1733_v12 = vpop.f32.mrb[14].mxu1 }
 0x13d   : > { %v2362_v15 = vadd.f32 %v4836_v63, %v1477_v11  ;;  %v2426_v16 = vadd.f32 %v4836_v63, %v1733_v12  ;;  %v1479_v17 = vpop.f32.mrb[15].mxu0  ;;  %v1735_v18 = vpop.f32.mrb[15].mxu1  ;;  %v2489_v19 = vmax.f32 %v2361_v5, 0.0  ;;  %v2553_v20 = vmax.f32 %v2425_v6, 0.0 }
 0x13f   : > { %v2490_v21 = vmax.f32 %v2362_v15, 0.0  ;;  %v2554_v22 = vmax.f32 %v2426_v16, 0.0  ;;  %1689 = vmatmul.mubr.bf16.gmra.mrb[120].mxu0 %v4469_v9  ;;  %1945 = vmatmul.mubr.bf16.gmra.mrb[120].mxu1 %v4470_v10 }
 0x140   : > { %1696 = vmatprep.mubr.bf16.mxu0 %v4471_v13  ;;  %1952 = vmatprep.mubr.bf16.mxu1 %v4473_v14 }
 0x141   : > { %v3814_v23 = vpack.c.bf16 %v2490_v21, %v2489_v19  ;;  %v3974_v24 = vpack.c.bf16 %v2554_v22, %v2553_v20 }
 0x142   : > { %v1482_v25 = vpop.f32.mrb[16].mxu0  ;;  %v1738_v26 = vpop.f32.mrb[16].mxu1 }
 0x143   : > { %4118 = vst [vmem:[%s4849_s7 + $0x18] sm:$0xff] %v3814_v23   ;;  %4150 = vst [vmem:[%s4849_s7 + $0x118] sm:$0xff] %v3974_v24   ;;  %v2363_v27 = vadd.f32 %v4836_v63, %v1482_v25  ;;  %v2427_v28 = vadd.f32 %v4836_v63, %v1738_v26  ;;  %v1484_v29 = vpop.f32.mrb[17].mxu0  ;;  %v1740_v30 = vpop.f32.mrb[17].mxu1 }
 0x144   : > { %v1485_v33 = vpop.f32.mrb[18].mxu0  ;;  %v1741_v34 = vpop.f32.mrb[18].mxu1 }
 0x145   : > { %v2364_v35 = vadd.f32 %v4836_v63, %v1485_v33  ;;  %v2428_v36 = vadd.f32 %v4836_v63, %v1741_v34  ;;  %v1487_v37 = vpop.f32.mrb[19].mxu0  ;;  %v1743_v38 = vpop.f32.mrb[19].mxu1  ;;  %v2491_v39 = vmax.f32 %v2363_v27, 0.0  ;;  %v2555_v40 = vmax.f32 %v2427_v28, 0.0 }
 0x147   : > { %v2492_v41 = vmax.f32 %v2364_v35, 0.0  ;;  %v2556_v42 = vmax.f32 %v2428_v36, 0.0  ;;  %1697 = vmatmul.mubr.bf16.gmra.mrb[124].mxu0 %v4475_v31  ;;  %1953 = vmatmul.mubr.bf16.gmra.mrb[124].mxu1 %v4476_v32 }
 0x149   : > { %v3819_v43 = vpack.c.bf16 %v2492_v41, %v2491_v39  ;;  %v3979_v44 = vpack.c.bf16 %v2556_v42, %v2555_v40 }
 0x14a   : > { %v1490_v45 = vpop.f32.mrb[20].mxu0  ;;  %v1746_v46 = vpop.f32.mrb[20].mxu1 }
 0x14b   : > { %4119 = vst [vmem:[%s4849_s7 + $0x20] sm:$0xff] %v3819_v43   ;;  %4151 = vst [vmem:[%s4849_s7 + $0x120] sm:$0xff] %v3979_v44   ;;  %v2365_v47 = vadd.f32 %v4836_v63, %v1490_v45  ;;  %v2429_v48 = vadd.f32 %v4836_v63, %v1746_v46  ;;  %v1492_v49 = vpop.f32.mrb[21].mxu0  ;;  %v1748_v50 = vpop.f32.mrb[21].mxu1 }
 0x14c   : > { %v1493_v51 = vpop.f32.mrb[22].mxu0  ;;  %v1749_v52 = vpop.f32.mrb[22].mxu1 }
 0x14d   : > { %v2366_v53 = vadd.f32 %v4836_v63, %v1493_v51  ;;  %v2430_v54 = vadd.f32 %v4836_v63, %v1749_v52  ;;  %v1495_v55 = vpop.f32.mrb[23].mxu0  ;;  %v1751_v56 = vpop.f32.mrb[23].mxu1  ;;  %v2493_v57 = vmax.f32 %v2365_v47, 0.0  ;;  %v2557_v58 = vmax.f32 %v2429_v48, 0.0 }
 0x14f   : > { %v2494_v59 = vmax.f32 %v2366_v53, 0.0  ;;  %v2558_v60 = vmax.f32 %v2430_v54, 0.0 }
 0x151   : > { %v3824_v61 = vpack.c.bf16 %v2494_v59, %v2493_v57  ;;  %v3984_v62 = vpack.c.bf16 %v2558_v60, %v2557_v58 }
 0x152   : > { %v1498_v0 = vpop.f32.mrb[24].mxu0  ;;  %v1754_v1 = vpop.f32.mrb[24].mxu1 }
 0x153   : > { %4120 = vst [vmem:[%s4849_s7 + $0x28] sm:$0xff] %v3824_v61   ;;  %4152 = vst [vmem:[%s4849_s7 + $0x128] sm:$0xff] %v3984_v62   ;;  %v2367_v2 = vadd.f32 %v4836_v63, %v1498_v0  ;;  %v2431_v3 = vadd.f32 %v4836_v63, %v1754_v1  ;;  %v1500_v4 = vpop.f32.mrb[25].mxu0  ;;  %v1756_v5 = vpop.f32.mrb[25].mxu1 }
 0x154   : > { %v1501_v6 = vpop.f32.mrb[26].mxu0  ;;  %v1757_v7 = vpop.f32.mrb[26].mxu1 }
 0x155   : > { %v2368_v8 = vadd.f32 %v4836_v63, %v1501_v6  ;;  %v2432_v9 = vadd.f32 %v4836_v63, %v1757_v7  ;;  %v1503_v10 = vpop.f32.mrb[27].mxu0  ;;  %v1759_v11 = vpop.f32.mrb[27].mxu1  ;;  %v2495_v12 = vmax.f32 %v2367_v2, 0.0  ;;  %v2559_v13 = vmax.f32 %v2431_v3, 0.0 }
 0x157   : > { %v2496_v14 = vmax.f32 %v2368_v8, 0.0  ;;  %v2560_v15 = vmax.f32 %v2432_v9, 0.0 }
 0x159   : > { %v3829_v16 = vpack.c.bf16 %v2496_v14, %v2495_v12  ;;  %v3989_v17 = vpack.c.bf16 %v2560_v15, %v2559_v13 }
 0x15a   : > { %v1506_v18 = vpop.f32.mrb[28].mxu0  ;;  %v1762_v19 = vpop.f32.mrb[28].mxu1 }
 0x15b   : > { %4121 = vst [vmem:[%s4849_s7 + $0x30] sm:$0xff] %v3829_v16   ;;  %4153 = vst [vmem:[%s4849_s7 + $0x130] sm:$0xff] %v3989_v17   ;;  %v2369_v20 = vadd.f32 %v4836_v63, %v1506_v18  ;;  %v2433_v21 = vadd.f32 %v4836_v63, %v1762_v19  ;;  %v1508_v22 = vpop.f32.mrb[29].mxu0  ;;  %v1764_v23 = vpop.f32.mrb[29].mxu1 }
 0x15c   : > { %v1509_v24 = vpop.f32.mrb[30].mxu0  ;;  %v1765_v25 = vpop.f32.mrb[30].mxu1 }
 0x15d   : > { %v2370_v26 = vadd.f32 %v4836_v63, %v1509_v24  ;;  %v2434_v27 = vadd.f32 %v4836_v63, %v1765_v25  ;;  %v1511_v28 = vpop.f32.mrb[31].mxu0  ;;  %v1767_v29 = vpop.f32.mrb[31].mxu1  ;;  %v2497_v30 = vmax.f32 %v2369_v20, 0.0  ;;  %v2561_v31 = vmax.f32 %v2433_v21, 0.0 }
 0x15f   : > { %v2498_v32 = vmax.f32 %v2370_v26, 0.0  ;;  %v2562_v33 = vmax.f32 %v2434_v27, 0.0 }
 0x161   : > { %v3834_v34 = vpack.c.bf16 %v2498_v32, %v2497_v30  ;;  %v3994_v35 = vpack.c.bf16 %v2562_v33, %v2561_v31 }
 0x162   : > { %v1514_v36 = vpop.f32.mrb[32].mxu0  ;;  %v1770_v37 = vpop.f32.mrb[32].mxu1 }
 0x163   : > { %4122 = vst [vmem:[%s4849_s7 + $0x38] sm:$0xff] %v3834_v34   ;;  %4154 = vst [vmem:[%s4849_s7 + $0x138] sm:$0xff] %v3994_v35   ;;  %v2371_v38 = vadd.f32 %v4836_v63, %v1514_v36  ;;  %v2435_v39 = vadd.f32 %v4836_v63, %v1770_v37  ;;  %v1516_v40 = vpop.f32.mrb[33].mxu0  ;;  %v1772_v41 = vpop.f32.mrb[33].mxu1 }
 0x164   : > { %v1517_v42 = vpop.f32.mrb[34].mxu0  ;;  %v1773_v43 = vpop.f32.mrb[34].mxu1 }
 0x165   : > { %v2372_v44 = vadd.f32 %v4836_v63, %v1517_v42  ;;  %v2436_v45 = vadd.f32 %v4836_v63, %v1773_v43  ;;  %v1519_v46 = vpop.f32.mrb[35].mxu0  ;;  %v1775_v47 = vpop.f32.mrb[35].mxu1  ;;  %v2499_v48 = vmax.f32 %v2371_v38, 0.0  ;;  %v2563_v49 = vmax.f32 %v2435_v39, 0.0 }
 0x167   : > { %v2500_v50 = vmax.f32 %v2372_v44, 0.0  ;;  %v2564_v51 = vmax.f32 %v2436_v45, 0.0 }
 0x169   : > { %v3839_v52 = vpack.c.bf16 %v2500_v50, %v2499_v48  ;;  %v3999_v53 = vpack.c.bf16 %v2564_v51, %v2563_v49 }
 0x16a   : > { %v1522_v54 = vpop.f32.mrb[36].mxu0  ;;  %v1778_v55 = vpop.f32.mrb[36].mxu1 }
 0x16b   : > { %4123 = vst [vmem:[%s4849_s7 + $0x40] sm:$0xff] %v3839_v52   ;;  %4155 = vst [vmem:[%s4849_s7 + $0x140] sm:$0xff] %v3999_v53   ;;  %v2373_v56 = vadd.f32 %v4836_v63, %v1522_v54  ;;  %v2437_v57 = vadd.f32 %v4836_v63, %v1778_v55  ;;  %v1524_v58 = vpop.f32.mrb[37].mxu0  ;;  %v1780_v59 = vpop.f32.mrb[37].mxu1 }
 0x16c   : > { %v1525_v60 = vpop.f32.mrb[38].mxu0  ;;  %v1781_v61 = vpop.f32.mrb[38].mxu1 }
 0x16d   : > { %v2374_v62 = vadd.f32 %v4836_v63, %v1525_v60  ;;  %v2438_v0 = vadd.f32 %v4836_v63, %v1781_v61  ;;  %v1527_v1 = vpop.f32.mrb[39].mxu0  ;;  %v1783_v2 = vpop.f32.mrb[39].mxu1  ;;  %v2501_v3 = vmax.f32 %v2373_v56, 0.0  ;;  %v2565_v4 = vmax.f32 %v2437_v57, 0.0 }
 0x16f   : > { %v2502_v5 = vmax.f32 %v2374_v62, 0.0  ;;  %v2566_v6 = vmax.f32 %v2438_v0, 0.0 }
 0x171   : > { %v3844_v7 = vpack.c.bf16 %v2502_v5, %v2501_v3  ;;  %v4004_v8 = vpack.c.bf16 %v2566_v6, %v2565_v4 }
 0x172   : > { %v1530_v9 = vpop.f32.mrb[40].mxu0  ;;  %v1786_v10 = vpop.f32.mrb[40].mxu1 }
 0x173   : > { %4124 = vst [vmem:[%s4849_s7 + $0x48] sm:$0xff] %v3844_v7   ;;  %4156 = vst [vmem:[%s4849_s7 + $0x148] sm:$0xff] %v4004_v8   ;;  %v2375_v11 = vadd.f32 %v4836_v63, %v1530_v9  ;;  %v2439_v12 = vadd.f32 %v4836_v63, %v1786_v10  ;;  %v1532_v13 = vpop.f32.mrb[41].mxu0  ;;  %v1788_v14 = vpop.f32.mrb[41].mxu1 }
 0x174   : > { %v1533_v15 = vpop.f32.mrb[42].mxu0  ;;  %v1789_v16 = vpop.f32.mrb[42].mxu1 }
 0x175   : > { %v2376_v17 = vadd.f32 %v4836_v63, %v1533_v15  ;;  %v2440_v18 = vadd.f32 %v4836_v63, %v1789_v16  ;;  %v1535_v19 = vpop.f32.mrb[43].mxu0  ;;  %v1791_v20 = vpop.f32.mrb[43].mxu1  ;;  %v2503_v21 = vmax.f32 %v2375_v11, 0.0  ;;  %v2567_v22 = vmax.f32 %v2439_v12, 0.0 }
 0x177   : > { %v2504_v23 = vmax.f32 %v2376_v17, 0.0  ;;  %v2568_v24 = vmax.f32 %v2440_v18, 0.0 }
 0x179   : > { %v3849_v25 = vpack.c.bf16 %v2504_v23, %v2503_v21  ;;  %v4009_v26 = vpack.c.bf16 %v2568_v24, %v2567_v22 }
 0x17a   : > { %v1538_v27 = vpop.f32.mrb[44].mxu0  ;;  %v1794_v28 = vpop.f32.mrb[44].mxu1 }
 0x17b   : > { %4125 = vst [vmem:[%s4849_s7 + $0x50] sm:$0xff] %v3849_v25   ;;  %4157 = vst [vmem:[%s4849_s7 + $0x150] sm:$0xff] %v4009_v26   ;;  %v2377_v29 = vadd.f32 %v4836_v63, %v1538_v27  ;;  %v2441_v30 = vadd.f32 %v4836_v63, %v1794_v28  ;;  %v1540_v31 = vpop.f32.mrb[45].mxu0  ;;  %v1796_v32 = vpop.f32.mrb[45].mxu1 }
 0x17c   : > { %v1541_v33 = vpop.f32.mrb[46].mxu0  ;;  %v1797_v34 = vpop.f32.mrb[46].mxu1 }
 0x17d   : > { %v2378_v35 = vadd.f32 %v4836_v63, %v1541_v33  ;;  %v2442_v36 = vadd.f32 %v4836_v63, %v1797_v34  ;;  %v1543_v37 = vpop.f32.mrb[47].mxu0  ;;  %v1799_v38 = vpop.f32.mrb[47].mxu1  ;;  %v2505_v39 = vmax.f32 %v2377_v29, 0.0  ;;  %v2569_v40 = vmax.f32 %v2441_v30, 0.0 }
 0x17f   : > { %v2506_v41 = vmax.f32 %v2378_v35, 0.0  ;;  %v2570_v42 = vmax.f32 %v2442_v36, 0.0 }
 0x181   : > { %v3854_v43 = vpack.c.bf16 %v2506_v41, %v2505_v39  ;;  %v4014_v44 = vpack.c.bf16 %v2570_v42, %v2569_v40 }
 0x182   : > { %v1546_v45 = vpop.f32.mrb[48].mxu0  ;;  %v1802_v46 = vpop.f32.mrb[48].mxu1 }
 0x183   : > { %4126 = vst [vmem:[%s4849_s7 + $0x58] sm:$0xff] %v3854_v43   ;;  %4158 = vst [vmem:[%s4849_s7 + $0x158] sm:$0xff] %v4014_v44   ;;  %v2379_v47 = vadd.f32 %v4836_v63, %v1546_v45  ;;  %v2443_v48 = vadd.f32 %v4836_v63, %v1802_v46  ;;  %v1548_v49 = vpop.f32.mrb[49].mxu0  ;;  %v1804_v50 = vpop.f32.mrb[49].mxu1 }
 0x184   : > { %v1549_v51 = vpop.f32.mrb[50].mxu0  ;;  %v1805_v52 = vpop.f32.mrb[50].mxu1 }
 0x185   : > { %v2380_v53 = vadd.f32 %v4836_v63, %v1549_v51  ;;  %v2444_v54 = vadd.f32 %v4836_v63, %v1805_v52  ;;  %v1551_v55 = vpop.f32.mrb[51].mxu0  ;;  %v1807_v56 = vpop.f32.mrb[51].mxu1  ;;  %v2507_v57 = vmax.f32 %v2379_v47, 0.0  ;;  %v2571_v58 = vmax.f32 %v2443_v48, 0.0 }
 0x187   : > { %v2508_v59 = vmax.f32 %v2380_v53, 0.0  ;;  %v2572_v60 = vmax.f32 %v2444_v54, 0.0 }
 0x189   : > { %v3859_v61 = vpack.c.bf16 %v2508_v59, %v2507_v57  ;;  %v4019_v62 = vpack.c.bf16 %v2572_v60, %v2571_v58 }
 0x18a   : > { %v1554_v0 = vpop.f32.mrb[52].mxu0  ;;  %v1810_v1 = vpop.f32.mrb[52].mxu1 }
 0x18b   : > { %4127 = vst [vmem:[%s4849_s7 + $0x60] sm:$0xff] %v3859_v61   ;;  %4159 = vst [vmem:[%s4849_s7 + $0x160] sm:$0xff] %v4019_v62   ;;  %v2381_v2 = vadd.f32 %v4836_v63, %v1554_v0  ;;  %v2445_v3 = vadd.f32 %v4836_v63, %v1810_v1  ;;  %v1556_v4 = vpop.f32.mrb[53].mxu0  ;;  %v1812_v5 = vpop.f32.mrb[53].mxu1 }
 0x18c   : > { %v1557_v6 = vpop.f32.mrb[54].mxu0  ;;  %v1813_v7 = vpop.f32.mrb[54].mxu1 }
 0x18d   : > { %v2382_v8 = vadd.f32 %v4836_v63, %v1557_v6  ;;  %v2446_v9 = vadd.f32 %v4836_v63, %v1813_v7  ;;  %v1559_v10 = vpop.f32.mrb[55].mxu0  ;;  %v1815_v11 = vpop.f32.mrb[55].mxu1  ;;  %v2509_v12 = vmax.f32 %v2381_v2, 0.0  ;;  %v2573_v13 = vmax.f32 %v2445_v3, 0.0 }
 0x18f   : > { %v2510_v14 = vmax.f32 %v2382_v8, 0.0  ;;  %v2574_v15 = vmax.f32 %v2446_v9, 0.0 }
 0x191   : > { %v3864_v16 = vpack.c.bf16 %v2510_v14, %v2509_v12  ;;  %v4024_v17 = vpack.c.bf16 %v2574_v15, %v2573_v13 }
 0x192   : > { %v1562_v18 = vpop.f32.mrb[56].mxu0  ;;  %v1818_v19 = vpop.f32.mrb[56].mxu1 }
 0x193   : > { %4128 = vst [vmem:[%s4849_s7 + $0x68] sm:$0xff] %v3864_v16   ;;  %4160 = vst [vmem:[%s4849_s7 + $0x168] sm:$0xff] %v4024_v17   ;;  %v2383_v20 = vadd.f32 %v4836_v63, %v1562_v18  ;;  %v2447_v21 = vadd.f32 %v4836_v63, %v1818_v19  ;;  %v1564_v22 = vpop.f32.mrb[57].mxu0  ;;  %v1820_v23 = vpop.f32.mrb[57].mxu1 }
 0x194   : > { %v1565_v24 = vpop.f32.mrb[58].mxu0  ;;  %v1821_v25 = vpop.f32.mrb[58].mxu1 }
 0x195   : > { %v2384_v26 = vadd.f32 %v4836_v63, %v1565_v24  ;;  %v2448_v27 = vadd.f32 %v4836_v63, %v1821_v25  ;;  %v1567_v28 = vpop.f32.mrb[59].mxu0  ;;  %v1823_v29 = vpop.f32.mrb[59].mxu1  ;;  %v2511_v30 = vmax.f32 %v2383_v20, 0.0  ;;  %v2575_v31 = vmax.f32 %v2447_v21, 0.0 }
 0x197   : > { %v2512_v32 = vmax.f32 %v2384_v26, 0.0  ;;  %v2576_v33 = vmax.f32 %v2448_v27, 0.0 }
 0x199   : > { %v3869_v34 = vpack.c.bf16 %v2512_v32, %v2511_v30  ;;  %v4029_v35 = vpack.c.bf16 %v2576_v33, %v2575_v31 }
 0x19a   : > { %v1570_v36 = vpop.f32.mrb[60].mxu0  ;;  %v1826_v37 = vpop.f32.mrb[60].mxu1 }
 0x19b   : > { %4129 = vst [vmem:[%s4849_s7 + $0x70] sm:$0xff] %v3869_v34   ;;  %4161 = vst [vmem:[%s4849_s7 + $0x170] sm:$0xff] %v4029_v35   ;;  %v2385_v38 = vadd.f32 %v4836_v63, %v1570_v36  ;;  %v2449_v39 = vadd.f32 %v4836_v63, %v1826_v37  ;;  %v1572_v40 = vpop.f32.mrb[61].mxu0  ;;  %v1828_v41 = vpop.f32.mrb[61].mxu1 }
 0x19c   : > { %v1573_v42 = vpop.f32.mrb[62].mxu0  ;;  %v1829_v43 = vpop.f32.mrb[62].mxu1 }
 0x19d   : > { %v2386_v44 = vadd.f32 %v4836_v63, %v1573_v42  ;;  %v2450_v45 = vadd.f32 %v4836_v63, %v1829_v43  ;;  %v1575_v46 = vpop.f32.mrb[63].mxu0  ;;  %v1831_v47 = vpop.f32.mrb[63].mxu1  ;;  %v2513_v48 = vmax.f32 %v2385_v38, 0.0  ;;  %v2577_v49 = vmax.f32 %v2449_v39, 0.0 }
 0x19f   : > { %v2514_v50 = vmax.f32 %v2386_v44, 0.0  ;;  %v2578_v51 = vmax.f32 %v2450_v45, 0.0 }
 0x1a1   : > { %v3874_v52 = vpack.c.bf16 %v2514_v50, %v2513_v48  ;;  %v4034_v53 = vpack.c.bf16 %v2578_v51, %v2577_v49 }
 0x1a2   : > { %v1578_v54 = vpop.f32.mrb[64].mxu0  ;;  %v1834_v55 = vpop.f32.mrb[64].mxu1 }
 0x1a3   : > { %4130 = vst [vmem:[%s4849_s7 + $0x78] sm:$0xff] %v3874_v52   ;;  %4162 = vst [vmem:[%s4849_s7 + $0x178] sm:$0xff] %v4034_v53   ;;  %v2387_v56 = vadd.f32 %v4836_v63, %v1578_v54  ;;  %v2451_v57 = vadd.f32 %v4836_v63, %v1834_v55  ;;  %v1580_v58 = vpop.f32.mrb[65].mxu0  ;;  %v1836_v59 = vpop.f32.mrb[65].mxu1 }
 0x1a4   : > { %v1581_v60 = vpop.f32.mrb[66].mxu0  ;;  %v1837_v61 = vpop.f32.mrb[66].mxu1 }
 0x1a5   : > { %v2388_v62 = vadd.f32 %v4836_v63, %v1581_v60  ;;  %v2452_v0 = vadd.f32 %v4836_v63, %v1837_v61  ;;  %v1583_v1 = vpop.f32.mrb[67].mxu0  ;;  %v1839_v2 = vpop.f32.mrb[67].mxu1  ;;  %v2515_v3 = vmax.f32 %v2387_v56, 0.0  ;;  %v2579_v4 = vmax.f32 %v2451_v57, 0.0 }
 0x1a7   : > { %v2516_v5 = vmax.f32 %v2388_v62, 0.0  ;;  %v2580_v6 = vmax.f32 %v2452_v0, 0.0 }
 0x1a9   : > { %v3879_v7 = vpack.c.bf16 %v2516_v5, %v2515_v3  ;;  %v4039_v8 = vpack.c.bf16 %v2580_v6, %v2579_v4 }
 0x1aa   : > { %v1586_v9 = vpop.f32.mrb[68].mxu0  ;;  %v1842_v10 = vpop.f32.mrb[68].mxu1 }
 0x1ab   : > { %4131 = vst [vmem:[%s4849_s7 + $0x80] sm:$0xff] %v3879_v7   ;;  %4163 = vst [vmem:[%s4849_s7 + $0x180] sm:$0xff] %v4039_v8   ;;  %v2389_v11 = vadd.f32 %v4836_v63, %v1586_v9  ;;  %v2453_v12 = vadd.f32 %v4836_v63, %v1842_v10  ;;  %v1588_v13 = vpop.f32.mrb[69].mxu0  ;;  %v1844_v14 = vpop.f32.mrb[69].mxu1 }
 0x1ac   : > { %v1589_v15 = vpop.f32.mrb[70].mxu0  ;;  %v1845_v16 = vpop.f32.mrb[70].mxu1 }
 0x1ad   : > { %v2390_v17 = vadd.f32 %v4836_v63, %v1589_v15  ;;  %v2454_v18 = vadd.f32 %v4836_v63, %v1845_v16  ;;  %v1591_v19 = vpop.f32.mrb[71].mxu0  ;;  %v1847_v20 = vpop.f32.mrb[71].mxu1  ;;  %v2517_v21 = vmax.f32 %v2389_v11, 0.0  ;;  %v2581_v22 = vmax.f32 %v2453_v12, 0.0 }
 0x1af   : > { %v2518_v23 = vmax.f32 %v2390_v17, 0.0  ;;  %v2582_v24 = vmax.f32 %v2454_v18, 0.0 }
 0x1b1   : > { %v3884_v25 = vpack.c.bf16 %v2518_v23, %v2517_v21  ;;  %v4044_v26 = vpack.c.bf16 %v2582_v24, %v2581_v22 }
 0x1b2   : > { %v1594_v27 = vpop.f32.mrb[72].mxu0  ;;  %v1850_v28 = vpop.f32.mrb[72].mxu1 }
 0x1b3   : > { %4132 = vst [vmem:[%s4849_s7 + $0x88] sm:$0xff] %v3884_v25   ;;  %4164 = vst [vmem:[%s4849_s7 + $0x188] sm:$0xff] %v4044_v26   ;;  %v2391_v29 = vadd.f32 %v4836_v63, %v1594_v27  ;;  %v2455_v30 = vadd.f32 %v4836_v63, %v1850_v28  ;;  %v1596_v31 = vpop.f32.mrb[73].mxu0  ;;  %v1852_v32 = vpop.f32.mrb[73].mxu1 }
 0x1b4   : > { %v1597_v33 = vpop.f32.mrb[74].mxu0  ;;  %v1853_v34 = vpop.f32.mrb[74].mxu1 }
 0x1b5   : > { %v2392_v35 = vadd.f32 %v4836_v63, %v1597_v33  ;;  %v2456_v36 = vadd.f32 %v4836_v63, %v1853_v34  ;;  %v1599_v37 = vpop.f32.mrb[75].mxu0  ;;  %v1855_v38 = vpop.f32.mrb[75].mxu1  ;;  %v2519_v39 = vmax.f32 %v2391_v29, 0.0  ;;  %v2583_v40 = vmax.f32 %v2455_v30, 0.0 }
 0x1b7   : > { %v2520_v41 = vmax.f32 %v2392_v35, 0.0  ;;  %v2584_v42 = vmax.f32 %v2456_v36, 0.0 }
 0x1b9   : > { %v3889_v43 = vpack.c.bf16 %v2520_v41, %v2519_v39  ;;  %v4049_v44 = vpack.c.bf16 %v2584_v42, %v2583_v40 }
 0x1ba   : > { %v1602_v45 = vpop.f32.mrb[76].mxu0  ;;  %v1858_v46 = vpop.f32.mrb[76].mxu1 }
 0x1bb   : > { %4133 = vst [vmem:[%s4849_s7 + $0x90] sm:$0xff] %v3889_v43   ;;  %4165 = vst [vmem:[%s4849_s7 + $0x190] sm:$0xff] %v4049_v44   ;;  %v2393_v47 = vadd.f32 %v4836_v63, %v1602_v45  ;;  %v2457_v48 = vadd.f32 %v4836_v63, %v1858_v46  ;;  %v1604_v49 = vpop.f32.mrb[77].mxu0  ;;  %v1860_v50 = vpop.f32.mrb[77].mxu1 }
 0x1bc   : > { %v1605_v51 = vpop.f32.mrb[78].mxu0  ;;  %v1861_v52 = vpop.f32.mrb[78].mxu1 }
 0x1bd   : > { %v2394_v53 = vadd.f32 %v4836_v63, %v1605_v51  ;;  %v2458_v54 = vadd.f32 %v4836_v63, %v1861_v52  ;;  %v1607_v55 = vpop.f32.mrb[79].mxu0  ;;  %v1863_v56 = vpop.f32.mrb[79].mxu1  ;;  %v2521_v57 = vmax.f32 %v2393_v47, 0.0  ;;  %v2585_v58 = vmax.f32 %v2457_v48, 0.0 }
 0x1bf   : > { %v2522_v59 = vmax.f32 %v2394_v53, 0.0  ;;  %v2586_v60 = vmax.f32 %v2458_v54, 0.0 }
 0x1c1   : > { %v3894_v61 = vpack.c.bf16 %v2522_v59, %v2521_v57  ;;  %v4054_v62 = vpack.c.bf16 %v2586_v60, %v2585_v58 }
 0x1c2   : > { %v1610_v0 = vpop.f32.mrb[80].mxu0  ;;  %v1866_v1 = vpop.f32.mrb[80].mxu1 }
 0x1c3   : > { %4134 = vst [vmem:[%s4849_s7 + $0x98] sm:$0xff] %v3894_v61   ;;  %4166 = vst [vmem:[%s4849_s7 + $0x198] sm:$0xff] %v4054_v62   ;;  %v2395_v2 = vadd.f32 %v4836_v63, %v1610_v0  ;;  %v2459_v3 = vadd.f32 %v4836_v63, %v1866_v1  ;;  %v1612_v4 = vpop.f32.mrb[81].mxu0  ;;  %v1868_v5 = vpop.f32.mrb[81].mxu1 }
 0x1c4   : > { %v1613_v6 = vpop.f32.mrb[82].mxu0  ;;  %v1869_v7 = vpop.f32.mrb[82].mxu1 }
 0x1c5   : > { %v2396_v8 = vadd.f32 %v4836_v63, %v1613_v6  ;;  %v2460_v9 = vadd.f32 %v4836_v63, %v1869_v7  ;;  %v1615_v10 = vpop.f32.mrb[83].mxu0  ;;  %v1871_v11 = vpop.f32.mrb[83].mxu1  ;;  %v2523_v12 = vmax.f32 %v2395_v2, 0.0  ;;  %v2587_v13 = vmax.f32 %v2459_v3, 0.0 }
 0x1c6   : > { %v5008_v11 = vld [vmem:[%s5117_s2] ss:$0 sm:$0xff] }
 0x1c7   : > { %v2524_v14 = vmax.f32 %v2396_v8, 0.0  ;;  %v2588_v15 = vmax.f32 %v2460_v9, 0.0 }
 0x1c9   : > { %v3899_v16 = vpack.c.bf16 %v2524_v14, %v2523_v12  ;;  %v4059_v17 = vpack.c.bf16 %v2588_v15, %v2587_v13 }
 0x1ca   : > { %v1618_v18 = vpop.f32.mrb[84].mxu0  ;;  %v1874_v19 = vpop.f32.mrb[84].mxu1 }
 0x1cb   : > { %4135 = vst [vmem:[%s4849_s7 + $0xa0] sm:$0xff] %v3899_v16   ;;  %4167 = vst [vmem:[%s4849_s7 + $0x1a0] sm:$0xff] %v4059_v17   ;;  %v2397_v20 = vadd.f32 %v4836_v63, %v1618_v18  ;;  %v2461_v21 = vadd.f32 %v4836_v63, %v1874_v19  ;;  %v1620_v22 = vpop.f32.mrb[85].mxu0  ;;  %v1876_v23 = vpop.f32.mrb[85].mxu1 }
 0x1cc   : > { %v1621_v24 = vpop.f32.mrb[86].mxu0  ;;  %v1877_v25 = vpop.f32.mrb[86].mxu1 }
 0x1cd   : > { %v2398_v26 = vadd.f32 %v4836_v63, %v1621_v24  ;;  %v2462_v27 = vadd.f32 %v4836_v63, %v1877_v25  ;;  %v1623_v28 = vpop.f32.mrb[87].mxu0  ;;  %v1879_v29 = vpop.f32.mrb[87].mxu1  ;;  %v2525_v30 = vmax.f32 %v2397_v20, 0.0  ;;  %v2589_v31 = vmax.f32 %v2461_v21, 0.0 }
 0x1cf   : > { %v2526_v32 = vmax.f32 %v2398_v26, 0.0  ;;  %v2590_v33 = vmax.f32 %v2462_v27, 0.0 }
 0x1d1   : > { %v3904_v34 = vpack.c.bf16 %v2526_v32, %v2525_v30  ;;  %v4064_v35 = vpack.c.bf16 %v2590_v33, %v2589_v31 }
 0x1d2   : > { %v1626_v36 = vpop.f32.mrb[88].mxu0  ;;  %v1882_v37 = vpop.f32.mrb[88].mxu1 }
 0x1d3   : > { %4136 = vst [vmem:[%s4849_s7 + $0xa8] sm:$0xff] %v3904_v34   ;;  %4168 = vst [vmem:[%s4849_s7 + $0x1a8] sm:$0xff] %v4064_v35   ;;  %v2399_v38 = vadd.f32 %v4836_v63, %v1626_v36  ;;  %v2463_v39 = vadd.f32 %v4836_v63, %v1882_v37  ;;  %v1628_v40 = vpop.f32.mrb[89].mxu0  ;;  %v1884_v41 = vpop.f32.mrb[89].mxu1 }
 0x1d4   : > { %v1629_v42 = vpop.f32.mrb[90].mxu0  ;;  %v1885_v43 = vpop.f32.mrb[90].mxu1 }
 0x1d5   : > { %v2400_v44 = vadd.f32 %v4836_v63, %v1629_v42  ;;  %v2464_v45 = vadd.f32 %v4836_v63, %v1885_v43  ;;  %v1631_v46 = vpop.f32.mrb[91].mxu0  ;;  %v1887_v47 = vpop.f32.mrb[91].mxu1  ;;  %v2527_v48 = vmax.f32 %v2399_v38, 0.0  ;;  %v2591_v49 = vmax.f32 %v2463_v39, 0.0 }
 0x1d7   : > { %v2528_v50 = vmax.f32 %v2400_v44, 0.0  ;;  %v2592_v51 = vmax.f32 %v2464_v45, 0.0 }
 0x1d9   : > { %v3909_v52 = vpack.c.bf16 %v2528_v50, %v2527_v48  ;;  %v4069_v53 = vpack.c.bf16 %v2592_v51, %v2591_v49 }
 0x1da   : > { %v1634_v54 = vpop.f32.mrb[92].mxu0  ;;  %v1890_v55 = vpop.f32.mrb[92].mxu1 }
 0x1db   : > { %4137 = vst [vmem:[%s4849_s7 + $0xb0] sm:$0xff] %v3909_v52   ;;  %4169 = vst [vmem:[%s4849_s7 + $0x1b0] sm:$0xff] %v4069_v53   ;;  %v2401_v56 = vadd.f32 %v4836_v63, %v1634_v54  ;;  %v2465_v57 = vadd.f32 %v4836_v63, %v1890_v55  ;;  %v1636_v58 = vpop.f32.mrb[93].mxu0  ;;  %v1892_v59 = vpop.f32.mrb[93].mxu1 }
 0x1dc   : > { %v1637_v60 = vpop.f32.mrb[94].mxu0  ;;  %v1893_v61 = vpop.f32.mrb[94].mxu1 }
 0x1dd   : > { %v2402_v62 = vadd.f32 %v4836_v63, %v1637_v60  ;;  %v2466_v0 = vadd.f32 %v4836_v63, %v1893_v61  ;;  %v1639_v1 = vpop.f32.mrb[95].mxu0  ;;  %v1895_v2 = vpop.f32.mrb[95].mxu1  ;;  %v2529_v3 = vmax.f32 %v2401_v56, 0.0  ;;  %v2593_v4 = vmax.f32 %v2465_v57, 0.0 }
 0x1df   : > { %v2530_v5 = vmax.f32 %v2402_v62, 0.0  ;;  %v2594_v6 = vmax.f32 %v2466_v0, 0.0 }
 0x1e1   : > { %v3914_v7 = vpack.c.bf16 %v2530_v5, %v2529_v3  ;;  %v4074_v8 = vpack.c.bf16 %v2594_v6, %v2593_v4 }
 0x1e2   : > { %v1642_v9 = vpop.f32.mrb[96].mxu0  ;;  %v1898_v10 = vpop.f32.mrb[96].mxu1 }
 0x1e3   : > { %4138 = vst [vmem:[%s4849_s7 + $0xb8] sm:$0xff] %v3914_v7   ;;  %4170 = vst [vmem:[%s4849_s7 + $0x1b8] sm:$0xff] %v4074_v8   ;;  %v2403_v12 = vadd.f32 %v5008_v11, %v1642_v9  ;;  %v2467_v63 = vadd.f32 %v5008_v11, %v1898_v10  ;;  %v1644_v13 = vpop.f32.mrb[97].mxu0  ;;  %v1900_v14 = vpop.f32.mrb[97].mxu1 }
 0x1e4   : > { %v1645_v15 = vpop.f32.mrb[98].mxu0  ;;  %v1901_v16 = vpop.f32.mrb[98].mxu1 }
 0x1e5   : > { %v2404_v17 = vadd.f32 %v5008_v11, %v1645_v15  ;;  %v2468_v18 = vadd.f32 %v5008_v11, %v1901_v16  ;;  %v1647_v19 = vpop.f32.mrb[99].mxu0  ;;  %v1903_v20 = vpop.f32.mrb[99].mxu1  ;;  %v2531_v21 = vmax.f32 %v2403_v12, 0.0  ;;  %v2595_v22 = vmax.f32 %v2467_v63, 0.0 }
 0x1e7   : > { %v2532_v23 = vmax.f32 %v2404_v17, 0.0  ;;  %v2596_v24 = vmax.f32 %v2468_v18, 0.0 }
 0x1e9   : > { %v3919_v25 = vpack.c.bf16 %v2532_v23, %v2531_v21  ;;  %v4079_v26 = vpack.c.bf16 %v2596_v24, %v2595_v22 }
 0x1ea   : > { %v1650_v27 = vpop.f32.mrb[100].mxu0  ;;  %v1906_v28 = vpop.f32.mrb[100].mxu1 }
 0x1eb   : > { %4139 = vst [vmem:[%s4849_s7 + $0xc0] sm:$0xff] %v3919_v25   ;;  %4171 = vst [vmem:[%s4849_s7 + $0x1c0] sm:$0xff] %v4079_v26   ;;  %v2405_v29 = vadd.f32 %v5008_v11, %v1650_v27  ;;  %v2469_v30 = vadd.f32 %v5008_v11, %v1906_v28  ;;  %v1652_v31 = vpop.f32.mrb[101].mxu0  ;;  %v1908_v32 = vpop.f32.mrb[101].mxu1 }
 0x1ec   : > { %v1653_v33 = vpop.f32.mrb[102].mxu0  ;;  %v1909_v34 = vpop.f32.mrb[102].mxu1 }
 0x1ed   : > { %v2406_v35 = vadd.f32 %v5008_v11, %v1653_v33  ;;  %v2470_v36 = vadd.f32 %v5008_v11, %v1909_v34  ;;  %v1655_v37 = vpop.f32.mrb[103].mxu0  ;;  %v1911_v38 = vpop.f32.mrb[103].mxu1  ;;  %v2533_v39 = vmax.f32 %v2405_v29, 0.0  ;;  %v2597_v40 = vmax.f32 %v2469_v30, 0.0 }
 0x1ef   : > { %v2534_v41 = vmax.f32 %v2406_v35, 0.0  ;;  %v2598_v42 = vmax.f32 %v2470_v36, 0.0 }
 0x1f1   : > { %v3924_v43 = vpack.c.bf16 %v2534_v41, %v2533_v39  ;;  %v4084_v44 = vpack.c.bf16 %v2598_v42, %v2597_v40 }
 0x1f2   : > { %v1658_v45 = vpop.f32.mrb[104].mxu0  ;;  %v1914_v46 = vpop.f32.mrb[104].mxu1 }
 0x1f3   : > { %4140 = vst [vmem:[%s4849_s7 + $0xc8] sm:$0xff] %v3924_v43   ;;  %4172 = vst [vmem:[%s4849_s7 + $0x1c8] sm:$0xff] %v4084_v44   ;;  %v2407_v47 = vadd.f32 %v5008_v11, %v1658_v45  ;;  %v2471_v48 = vadd.f32 %v5008_v11, %v1914_v46  ;;  %v1660_v49 = vpop.f32.mrb[105].mxu0  ;;  %v1916_v50 = vpop.f32.mrb[105].mxu1 }
 0x1f4   : > { %v1661_v51 = vpop.f32.mrb[106].mxu0  ;;  %v1917_v52 = vpop.f32.mrb[106].mxu1 }
 0x1f5   : > { %v2408_v53 = vadd.f32 %v5008_v11, %v1661_v51  ;;  %v2472_v54 = vadd.f32 %v5008_v11, %v1917_v52  ;;  %v1663_v55 = vpop.f32.mrb[107].mxu0  ;;  %v1919_v56 = vpop.f32.mrb[107].mxu1  ;;  %v2535_v57 = vmax.f32 %v2407_v47, 0.0  ;;  %v2599_v58 = vmax.f32 %v2471_v48, 0.0 }
 0x1f7   : > { %v2536_v59 = vmax.f32 %v2408_v53, 0.0  ;;  %v2600_v60 = vmax.f32 %v2472_v54, 0.0 }
 0x1f9   : > { %v3929_v61 = vpack.c.bf16 %v2536_v59, %v2535_v57  ;;  %v4089_v62 = vpack.c.bf16 %v2600_v60, %v2599_v58 }
 0x1fa   : > { %v1666_v0 = vpop.f32.mrb[108].mxu0  ;;  %v1922_v1 = vpop.f32.mrb[108].mxu1 }
 0x1fb   : > { %4141 = vst [vmem:[%s4849_s7 + $0xd0] sm:$0xff] %v3929_v61   ;;  %4173 = vst [vmem:[%s4849_s7 + $0x1d0] sm:$0xff] %v4089_v62   ;;  %v2409_v2 = vadd.f32 %v5008_v11, %v1666_v0  ;;  %v2473_v3 = vadd.f32 %v5008_v11, %v1922_v1  ;;  %v1668_v4 = vpop.f32.mrb[109].mxu0  ;;  %v1924_v5 = vpop.f32.mrb[109].mxu1 }
 0x1fc   : > { %v1669_v6 = vpop.f32.mrb[110].mxu0  ;;  %v1925_v7 = vpop.f32.mrb[110].mxu1 }
 0x1fd   : > { %v2410_v8 = vadd.f32 %v5008_v11, %v1669_v6  ;;  %v2474_v9 = vadd.f32 %v5008_v11, %v1925_v7  ;;  %v1671_v10 = vpop.f32.mrb[111].mxu0  ;;  %v1927_v12 = vpop.f32.mrb[111].mxu1  ;;  %v2537_v63 = vmax.f32 %v2409_v2, 0.0  ;;  %v2601_v13 = vmax.f32 %v2473_v3, 0.0 }
 0x1ff   : > { %v2538_v14 = vmax.f32 %v2410_v8, 0.0  ;;  %v2602_v15 = vmax.f32 %v2474_v9, 0.0 }
 0x201   : > { %v3934_v16 = vpack.c.bf16 %v2538_v14, %v2537_v63  ;;  %v4094_v17 = vpack.c.bf16 %v2602_v15, %v2601_v13 }
 0x202   : > { %v1674_v18 = vpop.f32.mrb[112].mxu0  ;;  %v1930_v19 = vpop.f32.mrb[112].mxu1 }
 0x203   : > { %4142 = vst [vmem:[%s4849_s7 + $0xd8] sm:$0xff] %v3934_v16   ;;  %4174 = vst [vmem:[%s4849_s7 + $0x1d8] sm:$0xff] %v4094_v17   ;;  %v2411_v20 = vadd.f32 %v5008_v11, %v1674_v18  ;;  %v2475_v21 = vadd.f32 %v5008_v11, %v1930_v19  ;;  %v1676_v22 = vpop.f32.mrb[113].mxu0  ;;  %v1932_v23 = vpop.f32.mrb[113].mxu1 }
 0x204   : > { %v1677_v24 = vpop.f32.mrb[114].mxu0  ;;  %v1933_v25 = vpop.f32.mrb[114].mxu1 }
 0x205   : > { %v2412_v26 = vadd.f32 %v5008_v11, %v1677_v24  ;;  %v2476_v27 = vadd.f32 %v5008_v11, %v1933_v25  ;;  %v1679_v28 = vpop.f32.mrb[115].mxu0  ;;  %v1935_v29 = vpop.f32.mrb[115].mxu1  ;;  %v2539_v30 = vmax.f32 %v2411_v20, 0.0  ;;  %v2603_v31 = vmax.f32 %v2475_v21, 0.0 }
 0x207   : > { %v2540_v32 = vmax.f32 %v2412_v26, 0.0  ;;  %v2604_v33 = vmax.f32 %v2476_v27, 0.0 }
 0x209   : > { %v3939_v34 = vpack.c.bf16 %v2540_v32, %v2539_v30  ;;  %v4099_v35 = vpack.c.bf16 %v2604_v33, %v2603_v31 }
 0x20a   : > { %v1682_v36 = vpop.f32.mrb[116].mxu0  ;;  %v1938_v37 = vpop.f32.mrb[116].mxu1 }
 0x20b   : > { %4143 = vst [vmem:[%s4849_s7 + $0xe0] sm:$0xff] %v3939_v34   ;;  %4175 = vst [vmem:[%s4849_s7 + $0x1e0] sm:$0xff] %v4099_v35   ;;  %v2413_v38 = vadd.f32 %v5008_v11, %v1682_v36  ;;  %v2477_v39 = vadd.f32 %v5008_v11, %v1938_v37  ;;  %v1684_v40 = vpop.f32.mrb[117].mxu0  ;;  %v1940_v41 = vpop.f32.mrb[117].mxu1 }
 0x20c   : > { %v1685_v42 = vpop.f32.mrb[118].mxu0  ;;  %v1941_v43 = vpop.f32.mrb[118].mxu1 }
 0x20d   : > { %v2414_v44 = vadd.f32 %v5008_v11, %v1685_v42  ;;  %v2478_v45 = vadd.f32 %v5008_v11, %v1941_v43  ;;  %v1687_v46 = vpop.f32.mrb[119].mxu0  ;;  %v1943_v47 = vpop.f32.mrb[119].mxu1  ;;  %v2541_v48 = vmax.f32 %v2413_v38, 0.0  ;;  %v2605_v49 = vmax.f32 %v2477_v39, 0.0 }
 0x20f   : > { %v2542_v50 = vmax.f32 %v2414_v44, 0.0  ;;  %v2606_v51 = vmax.f32 %v2478_v45, 0.0 }
 0x211   : > { %v3944_v52 = vpack.c.bf16 %v2542_v50, %v2541_v48  ;;  %v4104_v53 = vpack.c.bf16 %v2606_v51, %v2605_v49 }
 0x212   : > { %v1690_v54 = vpop.f32.mrb[120].mxu0  ;;  %v1946_v55 = vpop.f32.mrb[120].mxu1 }
 0x213   : > { %4144 = vst [vmem:[%s4849_s7 + $0xe8] sm:$0xff] %v3944_v52   ;;  %4176 = vst [vmem:[%s4849_s7 + $0x1e8] sm:$0xff] %v4104_v53   ;;  %v2415_v56 = vadd.f32 %v5008_v11, %v1690_v54  ;;  %v2479_v57 = vadd.f32 %v5008_v11, %v1946_v55  ;;  %v1692_v58 = vpop.f32.mrb[121].mxu0  ;;  %v1948_v59 = vpop.f32.mrb[121].mxu1 }
 0x214   : > { %v1693_v60 = vpop.f32.mrb[122].mxu0  ;;  %v1949_v61 = vpop.f32.mrb[122].mxu1 }
 0x215   : > { %v2416_v62 = vadd.f32 %v5008_v11, %v1693_v60  ;;  %v2480_v0 = vadd.f32 %v5008_v11, %v1949_v61  ;;  %v1695_v1 = vpop.f32.mrb[123].mxu0  ;;  %v1951_v2 = vpop.f32.mrb[123].mxu1  ;;  %v2543_v3 = vmax.f32 %v2415_v56, 0.0  ;;  %v2607_v4 = vmax.f32 %v2479_v57, 0.0 }
 0x217   : > { %v2544_v5 = vmax.f32 %v2416_v62, 0.0  ;;  %v2608_v6 = vmax.f32 %v2480_v0, 0.0 }
 0x219   : > { %v3949_v7 = vpack.c.bf16 %v2544_v5, %v2543_v3  ;;  %v4109_v8 = vpack.c.bf16 %v2608_v6, %v2607_v4 }
 0x21a   : > { %v1698_v9 = vpop.f32.mrb[124].mxu0  ;;  %v1954_v10 = vpop.f32.mrb[124].mxu1 }
 0x21b   : > { %4145 = vst [vmem:[%s4849_s7 + $0xf0] sm:$0xff] %v3949_v7   ;;  %4177 = vst [vmem:[%s4849_s7 + $0x1f0] sm:$0xff] %v4109_v8   ;;  %v2417_v12 = vadd.f32 %v5008_v11, %v1698_v9  ;;  %v2481_v63 = vadd.f32 %v5008_v11, %v1954_v10  ;;  %v1700_v13 = vpop.f32.mrb[125].mxu0  ;;  %v1956_v14 = vpop.f32.mrb[125].mxu1 }
 0x21c   : > { %v1701_v15 = vpop.f32.mrb[126].mxu0  ;;  %v1957_v16 = vpop.f32.mrb[126].mxu1 }
 0x21d   : > { %v2418_v17 = vadd.f32 %v5008_v11, %v1701_v15  ;;  %v2482_v18 = vadd.f32 %v5008_v11, %v1957_v16  ;;  %v1703_v19 = vpop.f32.mrb[127].mxu0  ;;  %v1959_v20 = vpop.f32.mrb[127].mxu1  ;;  %v2545_v21 = vmax.f32 %v2417_v12, 0.0  ;;  %v2609_v22 = vmax.f32 %v2481_v63, 0.0 }
 0x21f   : > { %v2546_v23 = vmax.f32 %v2418_v17, 0.0  ;;  %v2610_v24 = vmax.f32 %v2482_v18, 0.0 }
 0x221   : > { %v3954_v11 = vpack.c.bf16 %v2546_v23, %v2545_v21  ;;  %v4114_v25 = vpack.c.bf16 %v2610_v24, %v2609_v22 }
 0x223   : > { %4146 = vst [vmem:[%s4849_s7 + $0xf8] sm:$0xff] %v3954_v11   ;;  %4178 = vst [vmem:[%s4849_s7 + $0x1f8] sm:$0xff] %v4114_v25  }
 0x224   : > { %4491 = shalt.err (!%p4488_p5)
}
 0x225   : > { %s4492_s29 = scalar_lea.hbm %s5061_s21, 8192  ;;  %s4496_s5 = scalar_lea.hbm %s5118_s3, 16384 }
 0x226   : > { %p4493_p6 = scmp.ne.s32.totalorder %s5061_s21, %s4492_s29  ;;  %p4497_p10 = scmp.lt.u32.totalorder %s5061_s21, %s5118_s3 }
 0x227   : > { %p4498_p11 = scmp.lt.u32.totalorder %s4496_s5, %s4492_s29  ;;  %p4500_p13 = scmp.lt.u32.totalorder %s4492_s29, %s5061_s21 }
 0x228   : > { %p4494_p7 = pnand %p4493_p6, %p4622_p4 }
 0x229   : > { %p4499_p12 = por %p4498_p11, %p4497_p10 }
 0x22a   : > { %p4495_p9 = pneg %p4494_p7 }
 0x22b   : > { %p4501_p0 = por %p4500_p13, %p4499_p12 }
 0x22d   : > { %p4502_p1 = pnand %p4501_p0, %p4495_p9 }
 0x22f   : > { %4505 = shalt.err (!%p4502_p1)
}
 0x230   : > { %s4560_s19 = smov 64   ;;  %s4561_s8 = smov 4  }
 0x231   : > { %4211 = dma.vmem_to_hbm [thread:$0]  (%p4622_p4), %s5063_s10, 8192, %s5061_s21, %s5069_s15, %s4560_s19, %s4560_s19, %s4561_s8  }
 0x232 PF: > { %p4217_p2 = scmp.ge.s32.totalorder %s4556_s17, 2  ;;  %s3281_s9 = sand.u32 1, %s4536_s12  }
 0x233   : > { %s3282_s11 = scalar_lea.sflag [#allocation4], %s3281_s9 }
 0x234   : > { %p4214_p3 = pnand %p4217_p2, %p4629_p8 }
 0x236   : > { %4531 = dma.done.wait (!%p4214_p3), %s3282_s11, 8192  }
 0x237   : > { %4533 = vsyncadd (!%p4214_p3), %s3282_s11, 4294959104  ;;  %s16_s17 = sadd.s32 1, %s4556_s17   ;;  %s5121_s12 = smov %s4540_s13 }
 0x238   : > { %p13_p5 = scmp.ge.s32.totalorder %s16_s17, 4   ;;  %s5122_s13 = smov %s4544_s14 }
 0x239   : > { %s5123_s14 = smov %s4635_s25  ;;  %s5124_s15 = smov %s4552_s16 }
 0x23a   : > { %s5125_s16 = smov %s5127_s20  ;;  %15 = sbr.rel (!%p13_p5) target bundleno = 4 (0x4), region = 81 }
 0x241   :  { %3287 = vsyncpa [#allocation4], 1 }
 0x242   :  { %3289 = vsyncpa [#allocation4 + $0x1], 1 }

</bundles_post_ra>
